<compile_context>
chip_gen: v7x
topology: tpu7x:2x2x1
jax: 0.10.0
libtpu: 0.0.40
codegen_flags: <defaults>
</compile_context>

<pallas_src>
from functools import partial

import jax
import jax.numpy as jnp
from jax.experimental import pallas as pl
from jax.experimental.pallas import tpu as pltpu

V_DIM = 128        # encoder output / vis_emb_fc input dim
H_DIM = 256        # hidden dim
L_DIM = 256        # language feature dim
C_IN = 6           # point feature dim (xyz + rgb)
P_PTS = 32         # points per candidate object (dense surrogate)
N_MAX = 8          # fixed candidate-object capacity (multiple of 8)
B_PAD = 8          # padded language batch rows (multiple of 8)
SCORE_LANES = 128  # lane-dense score slab width

EPS_BN = 1e-5
EPS_LN = 1e-5
EPS_NORM = 1e-12


def _vmem():
    # every operand is small -> whole array resident in VMEM, no grid tiling
    return pl.BlockSpec(memory_space=pltpu.MemorySpace.VMEM)


def _l2_normalize(x):
    # x * rsqrt(max(sum x^2, eps)) -> sqrt/div chain goes to the EUP slot
    ssq = jnp.sum(x * x, axis=1, keepdims=True)
    return x * jax.lax.rsqrt(jnp.maximum(ssq, EPS_NORM))


# ----------------------------------------------------------------------------
# Fused kernel: encoder surrogate + lang_emb_fc + vis_emb_fc + attribute score
# ----------------------------------------------------------------------------
def fused_attribute_kernel(
        pts_ref, bidx_ref, lang_ref,
        w_enc_ref, b_enc_ref,
        lw1_ref, lb1_ref, lw2_ref, lb2_ref,
        vw1_ref, vb1_ref, vg_ref, vbeta_ref, vw2_ref, vb2_ref,
        obj_feats_ref, lang_emb_ref, vis_emb_ref, score_ref,
        *, n_max, pts_per_obj, b_true, b_pad):
    rows = n_max * pts_per_obj

    # --- encoder surrogate: per-point Linear (VPU FMA unroll over K=C_IN)
    #     + ReLU + per-object global max pool (one batched sublane reduce)
    pts = pts_ref[...]                               # [rows, C_IN]
    w_enc = w_enc_ref[...]                           # [C_IN, V_DIM]
    acc = jnp.zeros((rows, V_DIM), jnp.float32)
    for c in range(C_IN):                            # 6 broadcast FMAs; MXU stays free
        acc = acc + pts[:, c:c + 1] * w_enc[c:c + 1, :]
    h = jnp.maximum(acc + b_enc_ref[...], 0.0)
    obj_feats = jnp.max(h.reshape(n_max, pts_per_obj, V_DIM), axis=1)   # [N_MAX, 128]
    obj_feats_ref[...] = obj_feats

    # --- lang_emb_fc: Linear -> BatchNorm1d (batch stats over the TRUE batch
    #     rows; gamma=1 / beta=0 per weight_initialization) -> ReLU -> Linear
    #     -> L2 normalize
    l = jnp.dot(lang_ref[...], lw1_ref[...],
                preferred_element_type=jnp.float32) + lb1_ref[...]      # [B_PAD, 256]
    l_true = l[:b_true, :]                           # static slice: ignore padded rows
    mu = jnp.mean(l_true, axis=0, keepdims=True)
    var = jnp.mean((l_true - mu) ** 2, axis=0, keepdims=True)
    l = (l - mu) * jax.lax.rsqrt(var + EPS_BN)
    l = jnp.maximum(l, 0.0)
    l = jnp.dot(l, lw2_ref[...],
                preferred_element_type=jnp.float32) + lb2_ref[...]
    lang_n = _l2_normalize(l)                        # [B_PAD, 256]
    lang_emb_ref[...] = lang_n

    # --- vis_emb_fc: Linear -> LayerNorm -> ReLU -> Linear -> L2 normalize
    v = jnp.dot(obj_feats, vw1_ref[...],
                preferred_element_type=jnp.float32) + vb1_ref[...]      # [N_MAX, 256]
    mu = jnp.mean(v, axis=1, keepdims=True)
    var = jnp.mean((v - mu) ** 2, axis=1, keepdims=True)
    v = (v - mu) * jax.lax.rsqrt(var + EPS_LN)
    v = v * vg_ref[...] + vbeta_ref[...]
    v = jnp.maximum(v, 0.0)
    v = jnp.dot(v, vw2_ref[...],
                preferred_element_type=jnp.float32) + vb2_ref[...]
    vis_n = _l2_normalize(v)                         # [N_MAX, 256]
    vis_emb_ref[...] = vis_n

    # --- in-kernel lang "repeat": gather lang row by ORIGINAL batch index via
    #     one-hot select, then per-object dot with the visual embedding
    sel = (bidx_ref[...] ==
           jax.lax.broadcasted_iota(jnp.int32, (n_max, b_pad), 1)
           ).astype(jnp.float32)                     # [N_MAX, B_PAD]
    lang_rep = jnp.dot(sel, lang_n, preferred_element_type=jnp.float32)  # [N_MAX, 256]
    sc = jnp.sum(vis_n * lang_rep, axis=1, keepdims=True)                # [N_MAX, 1]
    score_ref[...] = jnp.broadcast_to(sc, (n_max, SCORE_LANES))          # lane-dense vst


def attribute_forward(pts_flat_pad, obj_bidx_pad, lang_pad, params, *, b_true):
    n_max = pts_flat_pad.shape[0] // P_PTS
    b_pad = lang_pad.shape[0]
    kernel = partial(fused_attribute_kernel, n_max=n_max, pts_per_obj=P_PTS,
                     b_true=b_true, b_pad=b_pad)
    return pl.pallas_call(
        kernel,
        out_shape=(
            jax.ShapeDtypeStruct((n_max, V_DIM), jnp.float32),        # obj_feats
            jax.ShapeDtypeStruct((b_pad, H_DIM), jnp.float32),        # lang_emb (normalized)
            jax.ShapeDtypeStruct((n_max, H_DIM), jnp.float32),        # vis_emb (normalized)
            jax.ShapeDtypeStruct((n_max, SCORE_LANES), jnp.float32),  # attribute scores slab
        ),
        in_specs=[_vmem()] * 15,
        out_specs=(_vmem(),) * 4,
    )(pts_flat_pad, obj_bidx_pad, lang_pad,
      params['w_enc'], params['b_enc'],
      params['lw1'], params['lb1'], params['lw2'], params['lb2'],
      params['vw1'], params['vb1'], params['vg'], params['vbeta'],
      params['vw2'], params['vb2'])


# ----------------------------------------------------------------------------
# Pure-JAX reference (unpadded) for correctness check
# ----------------------------------------------------------------------------
def ref_forward(pts_flat, obj_bidx, lang_feats, params):
    HI = jax.lax.Precision.HIGHEST
    p = params
    n_obj = obj_bidx.shape[0]

    h = jnp.maximum(jnp.dot(pts_flat, p['w_enc'], precision=HI) + p['b_enc'], 0.0)
    obj_feats = jnp.max(h.reshape(n_obj, P_PTS, V_DIM), axis=1)

    l = jnp.dot(lang_feats, p['lw1'], precision=HI) + p['lb1']
    mu = jnp.mean(l, axis=0, keepdims=True)
    var = jnp.mean((l - mu) ** 2, axis=0, keepdims=True)
    l = jnp.maximum((l - mu) * jax.lax.rsqrt(var + EPS_BN), 0.0)
    l = jnp.dot(l, p['lw2'], precision=HI) + p['lb2']
    l = l * jax.lax.rsqrt(jnp.maximum(jnp.sum(l * l, 1, keepdims=True), EPS_NORM))
    l_rep = l[obj_bidx]                                 # original batch index gather

    v = jnp.dot(obj_feats, p['vw1'], precision=HI) + p['vb1']
    mu = jnp.mean(v, axis=1, keepdims=True)
    var = jnp.mean((v - mu) ** 2, axis=1, keepdims=True)
    v = (v - mu) * jax.lax.rsqrt(var + EPS_LN) * p['vg'] + p['vbeta']
    v = jnp.maximum(v, 0.0)
    v = jnp.dot(v, p['vw2'], precision=HI) + p['vb2']
    v = v * jax.lax.rsqrt(jnp.maximum(jnp.sum(v * v, 1, keepdims=True), EPS_NORM))
    scores = jnp.sum(v * l_rep, axis=1)
    return obj_feats, l, v, scores


# ----------------------------------------------------------------------------
# Driver
# ----------------------------------------------------------------------------
if __name__ == "__main__":
    key = jax.random.PRNGKey(0)
    ks = jax.random.split(key, 12)

    # --- deterministic parameters (synthetic init, no checkpoint load) ---
    params = {
        'w_enc': 0.05 * jax.random.normal(ks[0], (C_IN, V_DIM), jnp.float32),
        'b_enc': 0.05 * jax.random.normal(ks[1], (1, V_DIM), jnp.float32),
        'vw1': 0.05 * jax.random.normal(ks[2], (V_DIM, H_DIM), jnp.float32),
        'vb1': 0.05 * jax.random.normal(ks[3], (1, H_DIM), jnp.float32),
        'vg': jnp.ones((1, H_DIM), jnp.float32),      # LayerNorm weight
        'vbeta': jnp.zeros((1, H_DIM), jnp.float32),  # LayerNorm bias
        'vw2': 0.05 * jax.random.normal(ks[4], (H_DIM, H_DIM), jnp.float32),
        'vb2': 0.05 * jax.random.normal(ks[5], (1, H_DIM), jnp.float32),
        'lw1': 0.05 * jax.random.normal(ks[6], (L_DIM, H_DIM), jnp.float32),
        'lb1': 0.05 * jax.random.normal(ks[7], (1, H_DIM), jnp.float32),
        'lw2': 0.05 * jax.random.normal(ks[8], (H_DIM, H_DIM), jnp.float32),
        'lb2': 0.05 * jax.random.normal(ks[9], (1, H_DIM), jnp.float32),
    }

    # --- synthetic data_dict (small shapes): batch=2 ---
    batch_size = 2
    instance_class = [[1, 2, 1, 1], [5, 5, 3]]        # per-batch object classes
    lang_cls_pred = [1, 5]                            # predicted language class
    instance_points = [
        jax.random.normal(ks[10], (4, P_PTS, C_IN), jnp.float32),
        jax.random.normal(ks[11], (3, P_PTS, C_IN), jnp.float32),
    ]
    lang_attr_feats = jax.random.normal(jax.random.PRNGKey(42),
                                        (batch_size, L_DIM), jnp.float32)

    # --- glue: filter_candidates (data-dependent Python, as in the module) ---
    kept_pts = []
    kept_bidx = []              # ORIGINAL batch index per kept object
    num_filtered_objs = []
    for i in range(batch_size):
        matched = [instance_points[i][j] for j in range(len(instance_class[i]))
                   if instance_class[i][j] == lang_cls_pred[i]]
        num_filtered_objs.append(len(matched))
        if len(matched) < 2:    # module drops batches with <2 candidates
            continue
        kept_pts += matched
        kept_bidx += [i] * len(matched)
    n_obj = len(kept_pts)
    assert n_obj <= N_MAX, "raise N_MAX capacity"

    # --- pad to fixed shapes (one compile for the whole workload) ---
    pad_obj = jnp.zeros((P_PTS, C_IN), jnp.float32)
    pts_flat_pad = jnp.stack(kept_pts + [pad_obj] * (N_MAX - n_obj),
                             axis=0).reshape(N_MAX * P_PTS, C_IN)
    obj_bidx_pad = jnp.asarray(kept_bidx + [0] * (N_MAX - n_obj),
                               jnp.int32).reshape(N_MAX, 1)
    lang_pad = jnp.zeros((B_PAD, L_DIM), jnp.float32).at[:batch_size].set(
        lang_attr_feats)

    # --- fused Pallas hot path (single launch) ---
    obj_feats_p, lang_emb_p, vis_emb_p, score_p = attribute_forward(
        pts_flat_pad, obj_bidx_pad, lang_pad, params, b_true=batch_size)
    jax.block_until_ready((obj_feats_p, lang_emb_p, vis_emb_p, score_p))

    obj_feats = obj_feats_p[:n_obj]
    lang_emb = lang_emb_p[:batch_size]
    vis_emb = vis_emb_p[:n_obj]
    scores = score_p[:n_obj, 0]

    # --- correctness check against pure-JAX reference (unpadded) ---
    if n_obj > 0:
        pts_flat = jnp.stack(kept_pts, axis=0).reshape(n_obj * P_PTS, C_IN)
        obj_bidx = jnp.asarray(kept_bidx, jnp.int32)
        ref_obj, ref_lang, ref_vis, ref_scores = ref_forward(
            pts_flat, obj_bidx, lang_attr_feats, params)
        assert jnp.allclose(obj_feats, ref_obj, atol=2e-4, rtol=2e-4)
        assert jnp.allclose(lang_emb, ref_lang, atol=2e-4, rtol=2e-4)
        assert jnp.allclose(vis_emb, ref_vis, atol=2e-4, rtol=2e-4)
        assert jnp.allclose(scores, ref_scores, atol=2e-4, rtol=2e-4)

    print("KERNEL_OK")
</pallas_src>

<mosaic_0001>
module attributes {stable_mosaic.version = 11 : i64} {
  func.func @fused_attribute_kernel(%arg0: memref<256x6xf32, #tpu.memory_space<vmem>>, %arg1: memref<8x1xi32, #tpu.memory_space<vmem>>, %arg2: memref<8x256xf32, #tpu.memory_space<vmem>>, %arg3: memref<6x128xf32, #tpu.memory_space<vmem>>, %arg4: memref<1x128xf32, #tpu.memory_space<vmem>>, %arg5: memref<256x256xf32, #tpu.memory_space<vmem>>, %arg6: memref<1x256xf32, #tpu.memory_space<vmem>>, %arg7: memref<256x256xf32, #tpu.memory_space<vmem>>, %arg8: memref<1x256xf32, #tpu.memory_space<vmem>>, %arg9: memref<128x256xf32, #tpu.memory_space<vmem>>, %arg10: memref<1x256xf32, #tpu.memory_space<vmem>>, %arg11: memref<1x256xf32, #tpu.memory_space<vmem>>, %arg12: memref<1x256xf32, #tpu.memory_space<vmem>>, %arg13: memref<256x256xf32, #tpu.memory_space<vmem>>, %arg14: memref<1x256xf32, #tpu.memory_space<vmem>>, %arg15: memref<8x128xf32, #tpu.memory_space<vmem>>, %arg16: memref<8x256xf32, #tpu.memory_space<vmem>>, %arg17: memref<8x256xf32, #tpu.memory_space<vmem>>, %arg18: memref<8x128xf32, #tpu.memory_space<vmem>>) attributes {dimension_semantics = [], scalar_prefetch = 0 : i64, scratch_operands = 0 : i64, tpu.core_type = #tpu.core_type<tc>} {
    %c0 = arith.constant 0 : index
    %c0_0 = arith.constant 0 : index
    %0 = vector.load %arg0[%c0, %c0_0] : memref<256x6xf32, #tpu.memory_space<vmem>>, vector<256x6xf32>
    %c0_1 = arith.constant 0 : index
    %c0_2 = arith.constant 0 : index
    %1 = vector.load %arg3[%c0_1, %c0_2] : memref<6x128xf32, #tpu.memory_space<vmem>>, vector<6x128xf32>
    %cst = arith.constant 0.000000e+00 : f32
    %2 = vector.broadcast %cst : f32 to vector<256x128xf32>
    %3 = vector.extract_strided_slice %0 {offsets = [0, 0], sizes = [256, 1], strides = [1, 1]} : vector<256x6xf32> to vector<256x1xf32>
    %4 = vector.extract_strided_slice %1 {offsets = [0, 0], sizes = [1, 128], strides = [1, 1]} : vector<6x128xf32> to vector<1x128xf32>
    %5 = vector.broadcast %3 : vector<256x1xf32> to vector<256x128xf32>
    %6 = vector.broadcast %4 : vector<1x128xf32> to vector<256x128xf32>
    %7 = arith.mulf %5, %6 : vector<256x128xf32>
    %8 = arith.addf %2, %7 : vector<256x128xf32>
    %9 = vector.extract_strided_slice %0 {offsets = [0, 1], sizes = [256, 1], strides = [1, 1]} : vector<256x6xf32> to vector<256x1xf32>
    %10 = vector.extract_strided_slice %1 {offsets = [1, 0], sizes = [1, 128], strides = [1, 1]} : vector<6x128xf32> to vector<1x128xf32>
    %11 = vector.broadcast %9 : vector<256x1xf32> to vector<256x128xf32>
    %12 = vector.broadcast %10 : vector<1x128xf32> to vector<256x128xf32>
    %13 = arith.mulf %11, %12 : vector<256x128xf32>
    %14 = arith.addf %8, %13 : vector<256x128xf32>
    %15 = vector.extract_strided_slice %0 {offsets = [0, 2], sizes = [256, 1], strides = [1, 1]} : vector<256x6xf32> to vector<256x1xf32>
    %16 = vector.extract_strided_slice %1 {offsets = [2, 0], sizes = [1, 128], strides = [1, 1]} : vector<6x128xf32> to vector<1x128xf32>
    %17 = vector.broadcast %15 : vector<256x1xf32> to vector<256x128xf32>
    %18 = vector.broadcast %16 : vector<1x128xf32> to vector<256x128xf32>
    %19 = arith.mulf %17, %18 : vector<256x128xf32>
    %20 = arith.addf %14, %19 : vector<256x128xf32>
    %21 = vector.extract_strided_slice %0 {offsets = [0, 3], sizes = [256, 1], strides = [1, 1]} : vector<256x6xf32> to vector<256x1xf32>
    %22 = vector.extract_strided_slice %1 {offsets = [3, 0], sizes = [1, 128], strides = [1, 1]} : vector<6x128xf32> to vector<1x128xf32>
    %23 = vector.broadcast %21 : vector<256x1xf32> to vector<256x128xf32>
    %24 = vector.broadcast %22 : vector<1x128xf32> to vector<256x128xf32>
    %25 = arith.mulf %23, %24 : vector<256x128xf32>
    %26 = arith.addf %20, %25 : vector<256x128xf32>
    %27 = vector.extract_strided_slice %0 {offsets = [0, 4], sizes = [256, 1], strides = [1, 1]} : vector<256x6xf32> to vector<256x1xf32>
    %28 = vector.extract_strided_slice %1 {offsets = [4, 0], sizes = [1, 128], strides = [1, 1]} : vector<6x128xf32> to vector<1x128xf32>
    %29 = vector.broadcast %27 : vector<256x1xf32> to vector<256x128xf32>
    %30 = vector.broadcast %28 : vector<1x128xf32> to vector<256x128xf32>
    %31 = arith.mulf %29, %30 : vector<256x128xf32>
    %32 = arith.addf %26, %31 : vector<256x128xf32>
    %33 = vector.extract_strided_slice %0 {offsets = [0, 5], sizes = [256, 1], strides = [1, 1]} : vector<256x6xf32> to vector<256x1xf32>
    %34 = vector.extract_strided_slice %1 {offsets = [5, 0], sizes = [1, 128], strides = [1, 1]} : vector<6x128xf32> to vector<1x128xf32>
    %35 = vector.broadcast %33 : vector<256x1xf32> to vector<256x128xf32>
    %36 = vector.broadcast %34 : vector<1x128xf32> to vector<256x128xf32>
    %37 = arith.mulf %35, %36 : vector<256x128xf32>
    %38 = arith.addf %32, %37 : vector<256x128xf32>
    %c0_3 = arith.constant 0 : index
    %c0_4 = arith.constant 0 : index
    %39 = vector.load %arg4[%c0_3, %c0_4] : memref<1x128xf32, #tpu.memory_space<vmem>>, vector<1x128xf32>
    %40 = vector.broadcast %39 : vector<1x128xf32> to vector<256x128xf32>
    %41 = arith.addf %38, %40 : vector<256x128xf32>
    %cst_5 = arith.constant 0.000000e+00 : f32
    %42 = vector.broadcast %cst_5 : f32 to vector<256x128xf32>
    %43 = arith.maximumf %41, %42 : vector<256x128xf32>
    %44 = vector.shape_cast %43 : vector<256x128xf32> to vector<8x32x128xf32>
    %cst_6 = arith.constant dense<0xFF800000> : vector<8x128xf32>
    %45 = vector.multi_reduction <maximumf>, %44, %cst_6 [1] : vector<8x32x128xf32> to vector<8x128xf32>
    %c0_7 = arith.constant 0 : index
    %c0_8 = arith.constant 0 : index
    %46 = vector.load %arg15[%c0_7, %c0_8] : memref<8x128xf32, #tpu.memory_space<vmem>>, vector<8x128xf32>
    tpu.vector_store %arg15[%c0_7, %c0_8], %45 {strides = array<i32>} : memref<8x128xf32, #tpu.memory_space<vmem>>, vector<8x128xf32>,
    %c0_9 = arith.constant 0 : index
    %c0_10 = arith.constant 0 : index
    %47 = vector.load %arg2[%c0_9, %c0_10] : memref<8x256xf32, #tpu.memory_space<vmem>>, vector<8x256xf32>
    %c0_11 = arith.constant 0 : index
    %c0_12 = arith.constant 0 : index
    %48 = vector.load %arg5[%c0_11, %c0_12] : memref<256x256xf32, #tpu.memory_space<vmem>>, vector<256x256xf32>
    %cst_13 = arith.constant dense<0.000000e+00> : vector<8x256xf32>
    %49 = tpu.matmul %47, %48, %cst_13 {dimension_numbers = #tpu.dot_dimension_numbers<[1], [0], [0], [1], [0, 0, 1, 1], [], []>} : vector<8x256xf32>, vector<256x256xf32>, vector<8x256xf32> -> vector<8x256xf32>
    %c0_14 = arith.constant 0 : index
    %c0_15 = arith.constant 0 : index
    %50 = vector.load %arg6[%c0_14, %c0_15] : memref<1x256xf32, #tpu.memory_space<vmem>>, vector<1x256xf32>
    %51 = vector.broadcast %50 : vector<1x256xf32> to vector<8x256xf32>
    %52 = arith.addf %49, %51 : vector<8x256xf32>
    %53 = vector.extract_strided_slice %52 {offsets = [0, 0], sizes = [2, 256], strides = [1, 1]} : vector<8x256xf32> to vector<2x256xf32>
    %cst_16 = arith.constant dense<0.000000e+00> : vector<256xf32>
    %54 = vector.multi_reduction <add>, %53, %cst_16 [0] : vector<2x256xf32> to vector<256xf32>
    %55 = vector.shape_cast %54 : vector<256xf32> to vector<1x256xf32>
    %cst_17 = arith.constant 2.000000e+00 : f32
    %56 = vector.broadcast %cst_17 : f32 to vector<1x256xf32>
    %57 = arith.divf %55, %56 : vector<1x256xf32>
    %58 = vector.broadcast %57 : vector<1x256xf32> to vector<2x256xf32>
    %59 = arith.subf %53, %58 : vector<2x256xf32>
    %60 = arith.mulf %59, %59 : vector<2x256xf32>
    %cst_18 = arith.constant dense<0.000000e+00> : vector<256xf32>
    %61 = vector.multi_reduction <add>, %60, %cst_18 [0] : vector<2x256xf32> to vector<256xf32>
    %62 = vector.shape_cast %61 : vector<256xf32> to vector<1x256xf32>
    %cst_19 = arith.constant 2.000000e+00 : f32
    %63 = vector.broadcast %cst_19 : f32 to vector<1x256xf32>
    %64 = arith.divf %62, %63 : vector<1x256xf32>
    %65 = vector.broadcast %57 : vector<1x256xf32> to vector<8x256xf32>
    %66 = arith.subf %52, %65 : vector<8x256xf32>
    %cst_20 = arith.constant 9.99999974E-6 : f32
    %67 = vector.broadcast %cst_20 : f32 to vector<1x256xf32>
    %68 = arith.addf %64, %67 : vector<1x256xf32>
    %69 = math.rsqrt %68 : vector<1x256xf32>
    %70 = vector.broadcast %69 : vector<1x256xf32> to vector<8x256xf32>
    %71 = arith.mulf %66, %70 : vector<8x256xf32>
    %cst_21 = arith.constant 0.000000e+00 : f32
    %72 = vector.broadcast %cst_21 : f32 to vector<8x256xf32>
    %73 = arith.maximumf %71, %72 : vector<8x256xf32>
    %c0_22 = arith.constant 0 : index
    %c0_23 = arith.constant 0 : index
    %74 = vector.load %arg7[%c0_22, %c0_23] : memref<256x256xf32, #tpu.memory_space<vmem>>, vector<256x256xf32>
    %cst_24 = arith.constant dense<0.000000e+00> : vector<8x256xf32>
    %75 = tpu.matmul %73, %74, %cst_24 {dimension_numbers = #tpu.dot_dimension_numbers<[1], [0], [0], [1], [0, 0, 1, 1], [], []>} : vector<8x256xf32>, vector<256x256xf32>, vector<8x256xf32> -> vector<8x256xf32>
    %c0_25 = arith.constant 0 : index
    %c0_26 = arith.constant 0 : index
    %76 = vector.load %arg8[%c0_25, %c0_26] : memref<1x256xf32, #tpu.memory_space<vmem>>, vector<1x256xf32>
    %77 = vector.broadcast %76 : vector<1x256xf32> to vector<8x256xf32>
    %78 = arith.addf %75, %77 : vector<8x256xf32>
    %79 = arith.mulf %78, %78 : vector<8x256xf32>
    %cst_27 = arith.constant dense<0.000000e+00> : vector<8xf32>
    %80 = vector.multi_reduction <add>, %79, %cst_27 [1] : vector<8x256xf32> to vector<8xf32>
    %81 = vector.shape_cast %80 : vector<8xf32> to vector<8x1xf32>
    %cst_28 = arith.constant 9.99999996E-13 : f32
    %82 = vector.broadcast %cst_28 : f32 to vector<8x1xf32>
    %83 = arith.maximumf %81, %82 : vector<8x1xf32>
    %84 = math.rsqrt %83 : vector<8x1xf32>
    %85 = vector.broadcast %84 : vector<8x1xf32> to vector<8x256xf32>
    %86 = arith.mulf %78, %85 : vector<8x256xf32>
    %c0_29 = arith.constant 0 : index
    %c0_30 = arith.constant 0 : index
    %87 = vector.load %arg16[%c0_29, %c0_30] : memref<8x256xf32, #tpu.memory_space<vmem>>, vector<8x256xf32>
    tpu.vector_store %arg16[%c0_29, %c0_30], %86 {strides = array<i32>} : memref<8x256xf32, #tpu.memory_space<vmem>>, vector<8x256xf32>,
    %c0_31 = arith.constant 0 : index
    %c0_32 = arith.constant 0 : index
    %88 = vector.load %arg9[%c0_31, %c0_32] : memref<128x256xf32, #tpu.memory_space<vmem>>, vector<128x256xf32>
    %cst_33 = arith.constant dense<0.000000e+00> : vector<8x256xf32>
    %89 = tpu.matmul %45, %88, %cst_33 {dimension_numbers = #tpu.dot_dimension_numbers<[1], [0], [0], [1], [0, 0, 1, 1], [], []>} : vector<8x128xf32>, vector<128x256xf32>, vector<8x256xf32> -> vector<8x256xf32>
    %c0_34 = arith.constant 0 : index
    %c0_35 = arith.constant 0 : index
    %90 = vector.load %arg10[%c0_34, %c0_35] : memref<1x256xf32, #tpu.memory_space<vmem>>, vector<1x256xf32>
    %91 = vector.broadcast %90 : vector<1x256xf32> to vector<8x256xf32>
    %92 = arith.addf %89, %91 : vector<8x256xf32>
    %cst_36 = arith.constant dense<0.000000e+00> : vector<8xf32>
    %93 = vector.multi_reduction <add>, %92, %cst_36 [1] : vector<8x256xf32> to vector<8xf32>
    %94 = vector.shape_cast %93 : vector<8xf32> to vector<8x1xf32>
    %cst_37 = arith.constant 2.560000e+02 : f32
    %95 = vector.broadcast %cst_37 : f32 to vector<8x1xf32>
    %96 = arith.divf %94, %95 : vector<8x1xf32>
    %97 = vector.broadcast %96 : vector<8x1xf32> to vector<8x256xf32>
    %98 = arith.subf %92, %97 : vector<8x256xf32>
    %99 = arith.mulf %98, %98 : vector<8x256xf32>
    %cst_38 = arith.constant dense<0.000000e+00> : vector<8xf32>
    %100 = vector.multi_reduction <add>, %99, %cst_38 [1] : vector<8x256xf32> to vector<8xf32>
    %101 = vector.shape_cast %100 : vector<8xf32> to vector<8x1xf32>
    %cst_39 = arith.constant 2.560000e+02 : f32
    %102 = vector.broadcast %cst_39 : f32 to vector<8x1xf32>
    %103 = arith.divf %101, %102 : vector<8x1xf32>
    %104 = vector.broadcast %96 : vector<8x1xf32> to vector<8x256xf32>
    %105 = arith.subf %92, %104 : vector<8x256xf32>
    %cst_40 = arith.constant 9.99999974E-6 : f32
    %106 = vector.broadcast %cst_40 : f32 to vector<8x1xf32>
    %107 = arith.addf %103, %106 : vector<8x1xf32>
    %108 = math.rsqrt %107 : vector<8x1xf32>
    %109 = vector.broadcast %108 : vector<8x1xf32> to vector<8x256xf32>
    %110 = arith.mulf %105, %109 : vector<8x256xf32>
    %c0_41 = arith.constant 0 : index
    %c0_42 = arith.constant 0 : index
    %111 = vector.load %arg11[%c0_41, %c0_42] : memref<1x256xf32, #tpu.memory_space<vmem>>, vector<1x256xf32>
    %112 = vector.broadcast %111 : vector<1x256xf32> to vector<8x256xf32>
    %113 = arith.mulf %110, %112 : vector<8x256xf32>
    %c0_43 = arith.constant 0 : index
    %c0_44 = arith.constant 0 : index
    %114 = vector.load %arg12[%c0_43, %c0_44] : memref<1x256xf32, #tpu.memory_space<vmem>>, vector<1x256xf32>
    %115 = vector.broadcast %114 : vector<1x256xf32> to vector<8x256xf32>
    %116 = arith.addf %113, %115 : vector<8x256xf32>
    %cst_45 = arith.constant 0.000000e+00 : f32
    %117 = vector.broadcast %cst_45 : f32 to vector<8x256xf32>
    %118 = arith.maximumf %116, %117 : vector<8x256xf32>
    %c0_46 = arith.constant 0 : index
    %c0_47 = arith.constant 0 : index
    %119 = vector.load %arg13[%c0_46, %c0_47] : memref<256x256xf32, #tpu.memory_space<vmem>>, vector<256x256xf32>
    %cst_48 = arith.constant dense<0.000000e+00> : vector<8x256xf32>
    %120 = tpu.matmul %118, %119, %cst_48 {dimension_numbers = #tpu.dot_dimension_numbers<[1], [0], [0], [1], [0, 0, 1, 1], [], []>} : vector<8x256xf32>, vector<256x256xf32>, vector<8x256xf32> -> vector<8x256xf32>
    %c0_49 = arith.constant 0 : index
    %c0_50 = arith.constant 0 : index
    %121 = vector.load %arg14[%c0_49, %c0_50] : memref<1x256xf32, #tpu.memory_space<vmem>>, vector<1x256xf32>
    %122 = vector.broadcast %121 : vector<1x256xf32> to vector<8x256xf32>
    %123 = arith.addf %120, %122 : vector<8x256xf32>
    %124 = arith.mulf %123, %123 : vector<8x256xf32>
    %cst_51 = arith.constant dense<0.000000e+00> : vector<8xf32>
    %125 = vector.multi_reduction <add>, %124, %cst_51 [1] : vector<8x256xf32> to vector<8xf32>
    %126 = vector.shape_cast %125 : vector<8xf32> to vector<8x1xf32>
    %cst_52 = arith.constant 9.99999996E-13 : f32
    %127 = vector.broadcast %cst_52 : f32 to vector<8x1xf32>
    %128 = arith.maximumf %126, %127 : vector<8x1xf32>
    %129 = math.rsqrt %128 : vector<8x1xf32>
    %130 = vector.broadcast %129 : vector<8x1xf32> to vector<8x256xf32>
    %131 = arith.mulf %123, %130 : vector<8x256xf32>
    %c0_53 = arith.constant 0 : index
    %c0_54 = arith.constant 0 : index
    %132 = vector.load %arg17[%c0_53, %c0_54] : memref<8x256xf32, #tpu.memory_space<vmem>>, vector<8x256xf32>
    tpu.vector_store %arg17[%c0_53, %c0_54], %131 {strides = array<i32>} : memref<8x256xf32, #tpu.memory_space<vmem>>, vector<8x256xf32>,
    %c0_55 = arith.constant 0 : index
    %c0_56 = arith.constant 0 : index
    %133 = vector.load %arg1[%c0_55, %c0_56] : memref<8x1xi32, #tpu.memory_space<vmem>>, vector<8x1xi32>
    %134 = tpu.iota {dimensions = array<i32: 1>} : vector<8x8xi32>
    %135 = vector.broadcast %133 : vector<8x1xi32> to vector<8x8xi32>
    %136 = arith.cmpi eq, %135, %134 : vector<8x8xi32>
    %137 = arith.extui %136 : vector<8x8xi1> to vector<8x8xi32>
    %138 = arith.sitofp %137 : vector<8x8xi32> to vector<8x8xf32>
    %cst_57 = arith.constant dense<0.000000e+00> : vector<8x256xf32>
    %139 = tpu.matmul %138, %86, %cst_57 {dimension_numbers = #tpu.dot_dimension_numbers<[1], [0], [0], [1], [0, 0, 1, 1], [], []>} : vector<8x8xf32>, vector<8x256xf32>, vector<8x256xf32> -> vector<8x256xf32>
    %140 = arith.mulf %131, %139 : vector<8x256xf32>
    %cst_58 = arith.constant dense<0.000000e+00> : vector<8xf32>
    %141 = vector.multi_reduction <add>, %140, %cst_58 [1] : vector<8x256xf32> to vector<8xf32>
    %142 = vector.shape_cast %141 : vector<8xf32> to vector<8x1xf32>
    %143 = vector.shape_cast %142 : vector<8x1xf32> to vector<8x1xf32>
    %144 = vector.broadcast %143 : vector<8x1xf32> to vector<8x128xf32>
    %c0_59 = arith.constant 0 : index
    %c0_60 = arith.constant 0 : index
    %145 = vector.load %arg18[%c0_59, %c0_60] : memref<8x128xf32, #tpu.memory_space<vmem>>, vector<8x128xf32>
    tpu.vector_store %arg18[%c0_59, %c0_60], %144 {strides = array<i32>} : memref<8x128xf32, #tpu.memory_space<vmem>>, vector<8x128xf32>,
    return
  }
}

</mosaic_0001>

<bundles_post_ra>
// kernel: tpu_custom_call.1
= control target key start
LH: loop header
LB: loop body
LE: loop exit
PB: predicated region body
PF: predicated region fallthrough
CT: control target
= control target key end

     0   :  { %s4465_s0 = inlined_call_operand.vmem [shape: f32[256,6], index: 0, kind: input, shape index: {}]   ;;  %s4466_s1 = inlined_call_operand.vmem [shape: s32[8,1], index: 1, kind: input, shape index: {}]   ;;  %s4467_s2 = inlined_call_operand.vmem [shape: f32[8,256], index: 2, kind: input, shape index: {}]   ;;  %s4468_s3 = inlined_call_operand.vmem [shape: f32[6,128], index: 3, kind: input, shape index: {}]   ;;  %s4469_s4 = inlined_call_operand.vmem [shape: f32[1,128], index: 4, kind: input, shape index: {}]   ;;  %s4470_s5 = inlined_call_operand.hbm [shape: f32[256,256], index: 5, kind: input, shape index: {}]   ;;  %s4471_s6 = inlined_call_operand.vmem [shape: f32[1,256], index: 6, kind: input, shape index: {}]   ;;  %s4472_s7 = inlined_call_operand.hbm [shape: f32[256,256], index: 7, kind: input, shape index: {}]   ;;  %s4473_s8 = inlined_call_operand.vmem [shape: f32[1,256], index: 8, kind: input, shape index: {}]   ;;  %s4474_s9 = inlined_call_operand.vmem [shape: f32[128,256], index: 9, kind: input, shape index: {}]   ;;  %s4475_s10 = inlined_call_operand.vmem [shape: f32[1,256], index: 10, kind: input, shape index: {}]   ;;  %s4476_s11 = inlined_call_operand.vmem [shape: f32[1,256], index: 11, kind: input, shape index: {}]   ;;  %s4477_s12 = inlined_call_operand.vmem [shape: f32[1,256], index: 12, kind: input, shape index: {}]   ;;  %s4478_s13 = inlined_call_operand.hbm [shape: f32[256,256], index: 13, kind: input, shape index: {}]   ;;  %s4479_s14 = inlined_call_operand.vmem [shape: f32[1,256], index: 14, kind: input, shape index: {}]   ;;  %s4480_s15 = inlined_call_operand.hbm [shape: f32[8,128], index: 15, kind: output, shape index: {0}]   ;;  %s4481_s16 = inlined_call_operand.hbm [shape: f32[8,256], index: 16, kind: output, shape index: {1}]   ;;  %s4482_s17 = inlined_call_operand.hbm [shape: f32[8,256], index: 17, kind: output, shape index: {2}]   ;;  %s4483_s18 = inlined_call_operand.hbm [shape: f32[8,128], index: 18, kind: output, shape index: {3}]  }
   0x1   :  { %4508 = sst [smem:[#allocation95_spill]] %s4465_s0 }
   0x2   :  { %4509 = sst [smem:[#allocation96_spill]] %s4466_s1 }
   0x3   :  { %4510 = sst [smem:[#allocation97_spill]] %s4467_s2 }
   0x4   :  { %24 = vsyncpa [#allocation3], 0 }
   0x5   :  { %25 = vsyncpa [#allocation6], 0 }
   0x6   :  { %26 = vsyncpa [#allocation4], 0 }
   0x7   :  { %27 = vsyncpa [#allocation10], 0 }
   0x8   :  { %28 = vsyncpa [#allocation13], 0  ;;  %s2826_s27 = smov [#allocation5]   ;;  %s2827_s29 = smov [#allocation2]  }
   0x9   :  { %s58_s28 = sshll.u32 %s2826_s27, 4  ;;  %s44_s30 = sshll.u32 %s2827_s29, 4  ;;  %s59_s28 = int_to_ptr.vmem [resolvable:$true] %s58_s28  ;;  %s2937_s30 = int_to_ptr.vmem [resolvable:$true] %s44_s30 }
   0xa   :  { %s2662_s1 = scalar_lea.hbm %s4472_s7, 8192 }
   0xb   :  { %p2663_p0 = scmp.ne.s32.totalorder %s4472_s7, %s2662_s1  ;;  %p2666_p1 = scmp.lt.u32.totalorder %s2662_s1, %s4472_s7 }
   0xd   :  { %p2668_p2 = pnand %p2666_p1, %p2663_p0 }
   0xf   :  { %2671 = shalt.err (!%p2668_p2)
}
  0x10   :  { %s2672_s23 = scalar_lea.vmem %s59_s28, 8192  ;;  %p2677_p4 = scmp.lt.s32.totalorder %s59_s28, %s59_s28 }
  0x11   :  { %p2673_p3 = scmp.ne.s32.totalorder %s59_s28, %s2672_s23  ;;  %p2678_p5 = scmp.lt.s32.totalorder %s2672_s23, %s2672_s23 }
  0x13   :  { %p2679_p6 = por %p2678_p5, %p2677_p4 }
  0x15   :  { %p2680_p7 = pnand %p2679_p6, %p2673_p3 }
  0x17   :  { %2683 = shalt.err (!%p2680_p7)
}
  0x18   :  { %s2828_s24 = smov 256   ;;  %s2829_s25 = smov 16  }
  0x19   :  { %64 = dma.hbm_to_vmem [thread:$0]  %s4472_s7, 8192, %s59_s28, [#allocation6], %s2828_s24, %s2828_s24, %s2829_s25  }
  0x1a   :  { %s2684_s19 = scalar_lea.hbm %s4470_s5, 8192 }
  0x1b   :  { %p2685_p8 = scmp.ne.s32.totalorder %s4470_s5, %s2684_s19  ;;  %p2688_p9 = scmp.lt.u32.totalorder %s2684_s19, %s4470_s5 }
  0x1d   :  { %p2690_p10 = pnand %p2688_p9, %p2685_p8 }
  0x1f   :  { %2693 = shalt.err (!%p2690_p10)
}
  0x20   :  { %s2694_s2 = scalar_lea.vmem %s2937_s30, 8192  ;;  %p2699_p12 = scmp.lt.s32.totalorder %s2937_s30, %s2937_s30 }
  0x21   :  { %p2695_p11 = scmp.ne.s32.totalorder %s2937_s30, %s2694_s2  ;;  %p2700_p13 = scmp.lt.s32.totalorder %s2694_s2, %s2694_s2 }
  0x23   :  { %p2701_p0 = por %p2700_p13, %p2699_p12 }
  0x25   :  { %p2702_p1 = pnand %p2701_p0, %p2695_p11 }
  0x27   :  { %2705 = shalt.err (!%p2702_p1)
}
  0x28   :  { %50 = dma.hbm_to_vmem [thread:$0]  %s4470_s5, 8192, %s2937_s30, [#allocation3], %s2828_s24, %s2828_s24, %s2829_s25  }
  0x29   :  { %s2830_s23 = smov [#allocation7]   ;;  %s2706_s0 = scalar_lea.hbm %s4478_s13, 8192 }
  0x2a   :  { %s80_s26 = sshll.u32 %s2830_s23, 4  ;;  %p2707_p2 = scmp.ne.s32.totalorder %s4478_s13, %s2706_s0  ;;  %s81_s26 = int_to_ptr.vmem [resolvable:$true] %s80_s26 }
  0x2b   :  { %p2710_p3 = scmp.lt.u32.totalorder %s2706_s0, %s4478_s13 }
  0x2d   :  { %p2712_p4 = pnand %p2710_p3, %p2707_p2 }
  0x2f   :  { %2715 = shalt.err (!%p2712_p4)
}
  0x30   :  { %s2716_s22 = scalar_lea.vmem %s81_s26, 8192  ;;  %p2721_p6 = scmp.lt.s32.totalorder %s81_s26, %s81_s26 }
  0x31   :  { %p2717_p5 = scmp.ne.s32.totalorder %s81_s26, %s2716_s22  ;;  %p2722_p7 = scmp.lt.s32.totalorder %s2716_s22, %s2716_s22 }
  0x33   :  { %p2723_p8 = por %p2722_p7, %p2721_p6 }
  0x35   :  { %p2724_p9 = pnand %p2723_p8, %p2717_p5 }
  0x37   :  { %2727 = shalt.err (!%p2724_p9)
}
  0x38   :  { %86 = dma.hbm_to_vmem [thread:$0]  %s4478_s13, 8192, %s81_s26, [#allocation6], %s2828_s24, %s2828_s24, %s2829_s25  }
  0x39   :  { %2816 = dma.done.wait [#allocation3], 8192  }
  0x3a   :  { %2817 = vsyncadd [#allocation3], 4294959104 }
  0x3b   :  { %2818 = dma.done.wait [#allocation6], 16384  }
  0x3c   :  { %2819 = vsyncadd [#allocation6], 4294950912  ;;  %v4490_v0 = vmov 1   ;;  %v4486_v1 = vmov 0   ;;  %s4511_s28 = sld [smem:[#allocation95_spill]]  ;;  %v4492_v20 = vmov 2  }
  0x3d   :  { %2570 = vset.pattern.permute.xlu0 %v4490_v0  ;;  %2569 = vset.pattern.permute.xlu1 %v4486_v1  ;;  %v4488_v31 = vmov 3   ;;  %s4611_s0 = sld [smem:[#allocation97_spill]]  ;;  %vm1490_vm0 = vcmask 1041409   ;;  %vm1492_vm1 = vcmask 1042434   ;;  %vm1494_vm2 = vcmask 1043459   ;;  %s2839_s5 = smov [#allocation8]  }
  0x3e   :  { %vm1496_vm3 = vcmask 1044484   ;;  %vm1655_vm4 = vcmask 1041408   ;;  %vm1498_vm5 = vcmask 1045509   ;;  %vm1500_vm6 = vcmask 1046534   ;;  %s2275_s30 = sshll.u32 %s2839_s5, 4  ;;  %s2276_s30 = int_to_ptr.vmem [resolvable:$true] %s2275_s30 }
  0x3f   :  { %vm1502_vm7 = vcmask 1047559   ;;  %vm2188_vm8 = vcmask 64512  }
  0x42   :  { %v2994_v2 = vld [vmem:[%s4511_s28 + $0x20] sm:$0xff]  ;;  %v3006_v4 = vld [vmem:[%s4511_s28 + $0x28] sm:$0xff]  ;;  %v3013_v5 = vld [vmem:[%s4511_s28 + $0x10] sm:$0xff] }
  0x43   :  { %v2999_v3 = vld [vmem:[%s4511_s28] sm:$0xff]  ;;  %153 = vperm.xlu1 %2569, %v2994_v2   ;;  %v3018_v6 = vld [vmem:[%s4511_s28 + $0x8] sm:$0xff]  ;;  %v3033_v8 = vld [vmem:[%s4511_s28 + $0x50] sm:$0xff] }
  0x44   :  { %360 = vperm.xlu0 %2570, %v2999_v3   ;;  %v3026_v7 = vld [vmem:[%s4511_s28 + $0x68] sm:$0xff]  ;;  %v3038_v9 = vld [vmem:[%s4511_s28 + $0x40] sm:$0xff]  ;;  %v3045_v10 = vld [vmem:[%s4511_s28 + $0x38] sm:$0xff] }
  0x45   :  { %v3052_v11 = vld [vmem:[%s4511_s28 + $0xa8] sm:$0xff]  ;;  %v3065_v13 = vld [vmem:[%s4511_s28 + $0x58] sm:$0xff]  ;;  %v3072_v14 = vld [vmem:[%s4511_s28 + $0x30] sm:$0xff] }
  0x46   :  { %v3060_v12 = vld [vmem:[%s4511_s28 + $0x48] sm:$0xff]  ;;  %v3085_v16 = vld [vmem:[%s4511_s28 + $0xb0] sm:$0xff]  ;;  %v3100_v18 = vld [vmem:[%s4511_s28 + $0xb8] sm:$0xff] }
  0x47   :  { %158 = vperm.xlu1 %2569, %v3006_v4   ;;  %v3077_v15 = vld [vmem:[%s4511_s28 + $0xc8] sm:$0xff]  ;;  %v3092_v17 = vld [vmem:[%s4511_s28 + $0xd0] sm:$0xff]  ;;  %v3105_v19 = vld [vmem:[%s4511_s28 + $0x60] sm:$0xff] }
  0x48   :  { %380 = vperm.xlu0 %2570, %v3006_v4   ;;  %4512 = vst [vmem:[#allocation19_spill] sm:$0xff] %v3092_v17  ;;  %v3120_v21 = vld [vmem:[%s4511_s28 + $0x80] sm:$0xff]  ;;  %v3128_v22 = vld [vmem:[%s4511_s28 + $0x88] sm:$0xff]  ;;  %v3141_v23 = vld [vmem:[%s4511_s28 + $0x90] sm:$0xff] }
  0x49   :  { %v3149_v24 = vld [vmem:[%s4511_s28 + $0xe0] sm:$0xff]  ;;  %v3154_v25 = vld [vmem:[%s4511_s28 + $0x18] sm:$0xff]  ;;  %v3167_v27 = vld [vmem:[%s4511_s28 + $0x70] sm:$0xff] }
  0x4a   :  { %4513 = vst [vmem:[#allocation20_spill] sm:$0xff] %v3149_v24  ;;  %v3162_v26 = vld [vmem:[%s4511_s28 + $0x98] sm:$0xff]  ;;  %v3179_v29 = vld [vmem:[%s4511_s28 + $0xa0] sm:$0xff]  ;;  %v3295_v57 = vld [vmem:[%s4511_s28 + $0xe8] sm:$0xff] }
  0x4b   :  { %2571 = vset.pattern.permute.xlu1 %v4490_v0  ;;  %v3174_v28 = vld [vmem:[%s4511_s28 + $0xd8] sm:$0xff]  ;;  %v3200_v30 = vld [vmem:[%s4511_s28 + $0xc0] sm:$0xff]  ;;  %4534 = vst [vmem:[#allocation41_spill] sm:$0xff] %v3295_v57 }
  0x4c   :  { %368 = vperm.xlu0 %2570, %v3013_v5   ;;  %364 = vperm.xlu1 %2571, %v3018_v6   ;;  %4514 = vst [vmem:[#allocation21_spill] sm:$0xff] %v3200_v30  ;;  %v3225_v37 = vld [vmem:[%s4511_s28 + $0xf8] sm:$0xff] }
  0x4d   :  { %v3279_v53 = vld [vmem:[%s4511_s28 + $0x78] sm:$0xff] }
  0x4e   :  { %4530 = vst [vmem:[#allocation37_spill] sm:$0xff] %v3279_v53 }
  0x50   :  { %412 = vperm.xlu0 %2570, %v3026_v7   ;;  %376 = vperm.xlu1 %2571, %v2994_v2  }
  0x54   :  { %400 = vperm.xlu0 %2570, %v3033_v8   ;;  %2572 = vset.pattern.permute.xlu1 %v4486_v1 }
  0x55   :  { %173 = vperm.xlu1 %2572, %v3038_v9  }
  0x58   :  { %388 = vperm.xlu0 %2570, %v3045_v10  }
  0x59   :  { %2573 = vset.pattern.permute.xlu1 %v4490_v0 }
  0x5a   :  { %392 = vperm.xlu1 %2573, %v3038_v9  }
  0x5c   :  { %444 = vperm.xlu0 %2570, %v3052_v11  }
  0x5e   :  { %396 = vperm.xlu1 %2573, %v3060_v12  }
  0x60   :  { %404 = vperm.xlu0 %2570, %v3065_v13  }
  0x62   :  { %2574 = vset.pattern.permute.xlu1 %v4486_v1 }
  0x63   :  { %163 = vperm.xlu1 %2574, %v3072_v14  }
  0x64   :  { %460 = vperm.xlu0 %2570, %v3077_v15  }
  0x67   :  { %198 = vperm.xlu1 %2574, %v3026_v7  }
  0x68   :  { %448 = vperm.xlu0 %2570, %v3085_v16  }
  0x6b   :  { %2575 = vset.pattern.permute.xlu1 %v4490_v0 }
  0x6c   :  { %464 = vperm.xlu0 %2570, %v3092_v17   ;;  %384 = vperm.xlu1 %2575, %v3072_v14  }
  0x70   :  { %452 = vperm.xlu0 %2570, %v3100_v18   ;;  %408 = vperm.xlu1 %2575, %v3105_v19  }
  0x74   :  { %2599 = vset.pattern.permute.xlu0 %v4486_v1  ;;  %2576 = vset.pattern.permute.xlu1 %v4492_v20 }
  0x75   :  { %133 = vperm.xlu0 %2599, %v2999_v3   ;;  %556 = vperm.xlu1 %2576, %v2999_v3  }
  0x79   :  { %138 = vperm.xlu0 %2599, %v3018_v6   ;;  %572 = vperm.xlu1 %2576, %v2994_v2  }
  0x7d   :  { %178 = vperm.xlu0 %2599, %v3060_v12   ;;  %576 = vperm.xlu1 %2576, %v3006_v4  }
  0x81   :  { %143 = vperm.xlu0 %2599, %v3013_v5   ;;  %2577 = vset.pattern.permute.xlu1 %v4486_v1 }
  0x82   :  { %213 = vperm.xlu1 %2577, %v3120_v21  }
  0x85   :  { %193 = vperm.xlu0 %2599, %v3105_v19  }
  0x86   :  { %218 = vperm.xlu1 %2577, %v3128_v22  }
  0x89   :  { %183 = vperm.xlu0 %2599, %v3033_v8  }
  0x8a   :  { %2578 = vset.pattern.permute.xlu1 %v4490_v0 }
  0x8b   :  { %424 = vperm.xlu1 %2578, %v3120_v21  }
  0x8d   :  { %168 = vperm.xlu0 %2599, %v3045_v10  }
  0x8f   :  { %428 = vperm.xlu1 %2578, %v3128_v22  }
  0x91   :  { %238 = vperm.xlu0 %2599, %v3052_v11  }
  0x93   :  { %2579 = vset.pattern.permute.xlu1 %v4492_v20 }
  0x94   :  { %592 = vperm.xlu1 %2579, %v3060_v12  }
  0x95   :  { %223 = vperm.xlu0 %2599, %v3141_v23  }
  0x98   :  { %2580 = vset.pattern.permute.xlu1 %v4486_v1 }
  0x99   :  { %273 = vperm.xlu0 %2599, %v3149_v24   ;;  %148 = vperm.xlu1 %2580, %v3154_v25  }
  0x9d   :  { %228 = vperm.xlu0 %2599, %v3162_v26   ;;  %203 = vperm.xlu1 %2580, %v3167_v27  }
  0xa1   :  { %268 = vperm.xlu0 %2599, %v3174_v28   ;;  %233 = vperm.xlu1 %2580, %v3179_v29  }
  0xa5   :  { %2605 = vset.pattern.permute.xlu0 %v4492_v20  ;;  %2581 = vset.pattern.permute.xlu1 %v4490_v0 }
  0xa6   :  { %560 = vperm.xlu0 %2605, %v3018_v6   ;;  %372 = vperm.xlu1 %2581, %v3154_v25  }
  0xaa   :  { %588 = vperm.xlu0 %2605, %v3038_v9   ;;  %416 = vperm.xlu1 %2581, %v3167_v27  }
  0xae   :  { %580 = vperm.xlu0 %2605, %v3072_v14   ;;  %440 = vperm.xlu1 %2581, %v3179_v29  }
  0xb2   :  { %620 = vperm.xlu0 %2605, %v3120_v21   ;;  %2582 = vset.pattern.permute.xlu1 %v4492_v20 }
  0xb3   :  { %564 = vperm.xlu1 %2582, %v3013_v5  }
  0xb6   :  { %568 = vperm.xlu0 %2605, %v3154_v25  }
  0xb7   :  { %604 = vperm.xlu1 %2582, %v3105_v19  }
  0xba   :  { %636 = vperm.xlu0 %2605, %v3179_v29  }
  0xbb   :  { %608 = vperm.xlu1 %2582, %v3026_v7  }
  0xbe   :  { %652 = vperm.xlu0 %2605, %v3200_v30  }
  0xbf   :  { %2583 = vset.pattern.permute.xlu1 %v4488_v31 }
  0xc0   :  { %756 = vperm.xlu1 %2583, %v3018_v6  }
  0xc2   :  { %644 = vperm.xlu0 %2605, %v3085_v16   ;;  %v3207_v32 = vpop.permute.xlu1 %153 }
  0xc3   :  { %4515 = vst [vmem:[#allocation22_spill] sm:$0xff] %v3207_v32  ;;  %v3209_v33 = vpop.permute.xlu0 %360 }
  0xc4   :  { %4516 = vst [vmem:[#allocation23_spill] sm:$0xff] %v3209_v33  ;;  %768 = vperm.xlu1 %2583, %v2994_v2  }
  0xc6   :  { %660 = vperm.xlu0 %2605, %v3092_v17   ;;  %v3213_v34 = vpop.permute.xlu1 %158 }
  0xc7   :  { %4517 = vst [vmem:[#allocation24_spill] sm:$0xff] %v3213_v34  ;;  %v3215_v35 = vpop.permute.xlu0 %380 }
  0xc8   :  { %4518 = vst [vmem:[#allocation25_spill] sm:$0xff] %v3215_v35  ;;  %2584 = vset.pattern.permute.xlu1 %v4486_v1 }
  0xc9   :  { %188 = vperm.xlu1 %2584, %v3065_v13  }
  0xca   :  { %648 = vperm.xlu0 %2605, %v3100_v18  }
  0xcb   :  { %v3220_v36 = vpop.permute.xlu0 %368  ;;  %v3227_v38 = vpop.permute.xlu1 %364 }
  0xcc   :  { %4519 = vst [vmem:[#allocation26_spill] sm:$0xff] %v3227_v38 }
  0xcd   :  { %253 = vperm.xlu1 %2584, %v3200_v30  }
  0xce   :  { %680 = vperm.xlu0 %2605, %v3225_v37  }
  0xcf   :  { %v3231_v39 = vpop.permute.xlu0 %412  ;;  %v3233_v40 = vpop.permute.xlu1 %376 }
  0xd0   :  { %4520 = vst [vmem:[#allocation27_spill] sm:$0xff] %v3233_v40 }
  0xd1   :  { %258 = vperm.xlu1 %2584, %v3077_v15  }
  0xd2   :  { %2621 = vset.pattern.permute.xlu0 %v4488_v31 }
  0xd3   :  { %752 = vperm.xlu0 %2621, %v2999_v3   ;;  %v3238_v41 = vpop.permute.xlu0 %400 }
  0xd4   :  { %4521 = vst [vmem:[#allocation28_spill] sm:$0xff] %v3238_v41  ;;  %v3240_v42 = vpop.permute.xlu1 %173 }
  0xd5   :  { %4522 = vst [vmem:[#allocation29_spill] sm:$0xff] %v3240_v42  ;;  %2585 = vset.pattern.permute.xlu1 %v4490_v0 }
  0xd6   :  { %432 = vperm.xlu1 %2585, %v3141_v23  }
  0xd7   :  { %772 = vperm.xlu0 %2621, %v3006_v4   ;;  %v3245_v43 = vpop.permute.xlu0 %388 }
  0xd8   :  { %4523 = vst [vmem:[#allocation30_spill] sm:$0xff] %v3245_v43 }
  0xd9   :  { %v3247_v44 = vpop.permute.xlu1 %392 }
  0xda   :  { %4524 = vst [vmem:[#allocation31_spill] sm:$0xff] %v3247_v44  ;;  %456 = vperm.xlu1 %2585, %v3200_v30  }
  0xdb   :  { %788 = vperm.xlu0 %2621, %v3060_v12   ;;  %v3251_v45 = vpop.permute.xlu0 %444 }
  0xdc   :  { %4525 = vst [vmem:[#allocation32_spill] sm:$0xff] %v3251_v45  ;;  %v4542_v45 = vmov 2  }
  0xdd   :  { %v3253_v46 = vpop.permute.xlu1 %396 }
  0xde   :  { %2586 = vset.pattern.permute.xlu1 %v4492_v20 }
  0xdf   :  { %760 = vperm.xlu0 %2621, %v3013_v5   ;;  %v3257_v47 = vpop.permute.xlu0 %404  ;;  %596 = vperm.xlu1 %2586, %v3033_v8  }
  0xe0   :  { %4526 = vst [vmem:[#allocation33_spill] sm:$0xff] %v3257_v47 }
  0xe2   :  { %v3260_v48 = vpop.permute.xlu1 %163 }
  0xe3   :  { %4527 = vst [vmem:[#allocation34_spill] sm:$0xff] %v3260_v48  ;;  %804 = vperm.xlu0 %2621, %v3026_v7   ;;  %v3263_v49 = vpop.permute.xlu0 %460  ;;  %624 = vperm.xlu1 %2586, %v3128_v22  }
  0xe4   :  { %4528 = vst [vmem:[#allocation35_spill] sm:$0xff] %v3263_v49 }
  0xe6   :  { %v3266_v50 = vpop.permute.xlu1 %198 }
  0xe7   :  { %816 = vperm.xlu0 %2621, %v3120_v21   ;;  %v3269_v51 = vpop.permute.xlu0 %448  ;;  %2587 = vset.pattern.permute.xlu1 %v4488_v31  ;;  %v4494_v31 = vmov 4  }
  0xe8   :  { %784 = vperm.xlu1 %2587, %v3038_v9  }
  0xeb   :  { %764 = vperm.xlu0 %2621, %v3154_v25   ;;  %v3274_v52 = vpop.permute.xlu0 %464  ;;  %v3281_v54 = vpop.permute.xlu1 %384 }
  0xec   :  { %4529 = vst [vmem:[#allocation36_spill] sm:$0xff] %v3274_v52  ;;  %4531 = vst [vmem:[#allocation38_spill] sm:$0xff] %v3281_v54  ;;  %2588 = vset.pattern.permute.xlu1 %v4486_v1  ;;  %v4547_v52 = vmov 3   ;;  %v4551_v54 = vmov 4  }
  0xed   :  { %208 = vperm.xlu1 %2588, %v3279_v53  }
  0xef   :  { %832 = vperm.xlu0 %2621, %v3179_v29   ;;  %v3286_v55 = vpop.permute.xlu0 %452  ;;  %v3288_v56 = vpop.permute.xlu1 %408 }
  0xf0   :  { %4532 = vst [vmem:[#allocation39_spill] sm:$0xff] %v3286_v55  ;;  %4533 = vst [vmem:[#allocation40_spill] sm:$0xff] %v3288_v56 }
  0xf1   :  { %243 = vperm.xlu1 %2588, %v3085_v16  }
  0xf3   :  { %848 = vperm.xlu0 %2621, %v3200_v30  }
  0xf4   :  { %v3297_v58 = vpop.permute.xlu0 %133  ;;  %v3299_v59 = vpop.permute.xlu1 %556 }
  0xf5   :  { %4535 = vst [vmem:[#allocation42_spill] sm:$0xff] %v3297_v58  ;;  %4536 = vst [vmem:[#allocation43_spill] sm:$0xff] %v3299_v59  ;;  %278 = vperm.xlu1 %2588, %v3295_v57  }
  0xf7   :  { %840 = vperm.xlu0 %2621, %v3085_v16  }
  0xf8   :  { %v3303_v60 = vpop.permute.xlu0 %138  ;;  %v3305_v61 = vpop.permute.xlu1 %572 }
  0xf9   :  { %4537 = vst [vmem:[#allocation44_spill] sm:$0xff] %v3303_v60  ;;  %4538 = vst [vmem:[#allocation45_spill] sm:$0xff] %v3305_v61  ;;  %2589 = vset.pattern.permute.xlu1 %v4490_v0 }
  0xfa   :  { %420 = vperm.xlu1 %2589, %v3279_v53  }
  0xfb   :  { %828 = vperm.xlu0 %2621, %v3162_v26  }
  0xfc   :  { %v3310_v62 = vpop.permute.xlu0 %178  ;;  %v3312_v63 = vpop.permute.xlu1 %576 }
  0xfd   :  { %4539 = vst [vmem:[#allocation46_spill] sm:$0xff] %v3312_v63  ;;  %v4559_v63 = vmov 1  }
  0xfe   :  { %472 = vperm.xlu1 %2589, %v3149_v24  }
  0xff   :  { %876 = vperm.xlu0 %2621, %v3225_v37  }
 0x100   :  { %v3316_v1 = vpop.permute.xlu0 %143 }
 0x101   :  { %v3318_v16 = vpop.permute.xlu1 %213 }
 0x102   :  { %476 = vperm.xlu1 %2589, %v3295_v57  }
 0x103   :  { %2628 = vset.pattern.permute.xlu0 %v4494_v31 }
 0x104   :  { %952 = vperm.xlu0 %2628, %v3018_v6   ;;  %v3323_v0 = vpop.permute.xlu0 %193 }
 0x105   :  { %4540 = vst [vmem:[#allocation47_spill] sm:$0xff] %v3323_v0  ;;  %v3325_v20 = vpop.permute.xlu1 %218 }
 0x106   :  { %4541 = vst [vmem:[#allocation48_spill] sm:$0xff] %v3325_v20  ;;  %2590 = vset.pattern.permute.xlu1 %v4542_v45 }
 0x107   :  { %584 = vperm.xlu1 %2590, %v3045_v10  }
 0x108   :  { %984 = vperm.xlu0 %2628, %v3060_v12   ;;  %v3330_v55 = vpop.permute.xlu0 %183 }
 0x109   :  { %4543 = vst [vmem:[#allocation49_spill] sm:$0xff] %v3330_v55 }
 0x10a   :  { %v3332_v49 = vpop.permute.xlu1 %424 }
 0x10b   :  { %612 = vperm.xlu1 %2590, %v3167_v27  }
 0x10c   :  { %956 = vperm.xlu0 %2628, %v3013_v5   ;;  %v3336_v31 = vpop.permute.xlu0 %168 }
 0x10d   :  { %4544 = vst [vmem:[#allocation50_spill] sm:$0xff] %v3336_v31 }
 0x10e   :  { %v3338_v47 = vpop.permute.xlu1 %428 }
 0x10f   :  { %4545 = vst [vmem:[#allocation51_spill] sm:$0xff] %v3338_v47  ;;  %640 = vperm.xlu1 %2590, %v3052_v11  }
 0x110   :  { %1000 = vperm.xlu0 %2628, %v3026_v7   ;;  %v3342_v20 = vpop.permute.xlu0 %238 }
 0x111   :  { %4546 = vst [vmem:[#allocation52_spill] sm:$0xff] %v3342_v20 }
 0x113   :  { %2591 = vset.pattern.permute.xlu1 %v4547_v52  ;;  %v3345_v0 = vpop.permute.xlu1 %592 }
 0x114   :  { %1012 = vperm.xlu0 %2628, %v3120_v21   ;;  %v3348_v56 = vpop.permute.xlu0 %223  ;;  %776 = vperm.xlu1 %2591, %v3072_v14  }
 0x115   :  { %4548 = vst [vmem:[#allocation53_spill] sm:$0xff] %v3348_v56  ;;  %v4556_v56 = vmov 0  }
 0x118   :  { %960 = vperm.xlu0 %2628, %v3154_v25   ;;  %v3352_v48 = vpop.permute.xlu0 %273  ;;  %800 = vperm.xlu1 %2591, %v3105_v19   ;;  %v3355_v47 = vpop.permute.xlu1 %148 }
 0x119   :  { %4549 = vst [vmem:[#allocation54_spill] sm:$0xff] %v3352_v48 }
 0x11c   :  { %1028 = vperm.xlu0 %2628, %v3179_v29   ;;  %v3358_v20 = vpop.permute.xlu0 %228  ;;  %2592 = vset.pattern.permute.xlu1 %v4551_v54  ;;  %v3361_v61 = vpop.permute.xlu1 %203 }
 0x11d   :  { %4550 = vst [vmem:[#allocation55_spill] sm:$0xff] %v3358_v20  ;;  %4552 = vst [vmem:[#allocation56_spill] sm:$0xff] %v3361_v61  ;;  %948 = vperm.xlu1 %2592, %v2999_v3  }
 0x120   :  { %1020 = vperm.xlu0 %2628, %v3141_v23   ;;  %v3365_v21 = vpop.permute.xlu0 %268  ;;  %v3367_v25 = vpop.permute.xlu1 %233 }
 0x121   :  { %4553 = vst [vmem:[#allocation57_spill] sm:$0xff] %v3365_v21  ;;  %964 = vperm.xlu1 %2592, %v2994_v2  }
 0x124   :  { %1008 = vperm.xlu0 %2628, %v3279_v53  }
 0x125   :  { %v3371_v48 = vpop.permute.xlu0 %560  ;;  %968 = vperm.xlu1 %2592, %v3006_v4   ;;  %v3374_v29 = vpop.permute.xlu1 %372 }
 0x126   :  { %4554 = vst [vmem:[#allocation58_spill] sm:$0xff] %v3371_v48 }
 0x128   :  { %1064 = vperm.xlu0 %2628, %v3295_v57  }
 0x129   :  { %v3377_v61 = vpop.permute.xlu0 %588  ;;  %2593 = vset.pattern.permute.xlu1 %v4556_v56  ;;  %v3380_v32 = vpop.permute.xlu1 %416 }
 0x12a   :  { %4555 = vst [vmem:[#allocation59_spill] sm:$0xff] %v3377_v61  ;;  %4557 = vst [vmem:[#allocation60_spill] sm:$0xff] %v3380_v32  ;;  %263 = vperm.xlu1 %2593, %v3092_v17   ;;  %v4496_v32 = vmov 5  }
 0x12c   :  { %1024 = vperm.xlu0 %2628, %v3162_v26  }
 0x12d   :  { %v3384_v21 = vpop.permute.xlu0 %580  ;;  %v3386_v31 = vpop.permute.xlu1 %440 }
 0x12e   :  { %4558 = vst [vmem:[#allocation61_spill] sm:$0xff] %v3384_v21  ;;  %2594 = vset.pattern.permute.xlu1 %v4559_v63 }
 0x12f   :  { %436 = vperm.xlu1 %2594, %v3162_v26  }
 0x130   :  { %1072 = vperm.xlu0 %2628, %v3225_v37  }
 0x131   :  { %v3391_v43 = vpop.permute.xlu0 %620 }
 0x132   :  { %v3393_v40 = vpop.permute.xlu1 %564 }
 0x133   :  { %2595 = vset.pattern.permute.xlu1 %v4542_v45 }
 0x134   :  { %2633 = vset.pattern.permute.xlu0 %v4496_v32  ;;  %600 = vperm.xlu1 %2595, %v3065_v13  }
 0x135   :  { %1148 = vperm.xlu0 %2633, %v3018_v6   ;;  %v3399_v21 = vpop.permute.xlu0 %568 }
 0x136   :  { %v3401_v35 = vpop.permute.xlu1 %604 }
 0x137   :  { %4560 = vst [vmem:[#allocation62_spill] sm:$0xff] %v3401_v35 }
 0x138   :  { %628 = vperm.xlu1 %2595, %v3141_v23  }
 0x139   :  { %1180 = vperm.xlu0 %2633, %v3060_v12   ;;  %v3405_v34 = vpop.permute.xlu0 %636 }
 0x13a   :  { %v3407_v61 = vpop.permute.xlu1 %608 }
 0x13c   :  { %656 = vperm.xlu1 %2595, %v3077_v15  }
 0x13d   :  { %1152 = vperm.xlu0 %2633, %v3013_v5   ;;  %v3411_v32 = vpop.permute.xlu0 %652 }
 0x13f   :  { %v3413_v42 = vpop.permute.xlu1 %756 }
 0x140   :  { %4561 = vst [vmem:[#allocation63_spill] sm:$0xff] %v3413_v42  ;;  %2596 = vset.pattern.permute.xlu1 %v4547_v52 }
 0x141   :  { %1196 = vperm.xlu0 %2633, %v3026_v7   ;;  %v3417_v6 = vpop.permute.xlu0 %644  ;;  %792 = vperm.xlu1 %2596, %v3033_v8  }
 0x143   :  { %v3420_v12 = vpop.permute.xlu1 %768 }
 0x144   :  { %4562 = vst [vmem:[#allocation64_spill] sm:$0xff] %v3420_v12  ;;  %v4498_v12 = vlaneseq }
 0x145   :  { %v3422_v35 = vpop.permute.xlu0 %660  ;;  %1184 = vperm.xlu0 %2633, %v3033_v8   ;;  %820 = vperm.xlu1 %2596, %v3128_v22  }
 0x146   :  { %4563 = vst [vmem:[#allocation65_spill] sm:$0xff] %v3422_v35 }
 0x148   :  { %v3426_v5 = vpop.permute.xlu1 %188 }
 0x149   :  { %4564 = vst [vmem:[#allocation66_spill] sm:$0xff] %v3426_v5  ;;  %v3428_v44 = vpop.permute.xlu0 %648  ;;  %1172 = vperm.xlu0 %2633, %v3045_v10   ;;  %2597 = vset.pattern.permute.xlu1 %v4551_v54 }
 0x14a   :  { %4565 = vst [vmem:[#allocation67_spill] sm:$0xff] %v3428_v44  ;;  %980 = vperm.xlu1 %2597, %v3038_v9   ;;  %v3445_v44 = vld [vmem:[%s4511_s28 + $0xf0] sm:$0xff] }
 0x14c   :  { %v3433_v7 = vpop.permute.xlu1 %253 }
 0x14d   :  { %v3435_v55 = vpop.permute.xlu0 %680  ;;  %1228 = vperm.xlu0 %2633, %v3052_v11  }
 0x14e   :  { %4566 = vst [vmem:[#allocation68_spill] sm:$0xff] %v3435_v55  ;;  %2598 = vset.pattern.permute.xlu1 %v4556_v56 }
 0x14f   :  { %248 = vperm.xlu1 %2598, %v3100_v18   ;;  %v3458_v18 = vshrl.u32 %v4498_v12, 7  ;;  %v3476_v12 = vld [vmem:[%s4468_s3] sm:$0x3f] }
 0x150   :  { %v3440_v35 = vpop.permute.xlu1 %258 }
 0x151   :  { %4567 = vst [vmem:[#allocation69_spill] sm:$0xff] %v3440_v35  ;;  %1216 = vperm.xlu0 %2633, %v3141_v23   ;;  %v3468_v59 = vsub.s32 0, %v3458_v18  ;;  %v881_v30 = vsub.s32 3, %v3458_v18 }
 0x152   :  { %v3448_v5 = vpop.permute.xlu0 %752 }
 0x153   :  { %4568 = vst [vmem:[#allocation70_spill] sm:$0xff] %v3448_v5  ;;  %283 = vperm.xlu1 %2598, %v3445_v44   ;;  %v3465_v5 = vsub.s32 1, %v3458_v18  ;;  %4572 = vst [vmem:[#allocation74_spill] sm:$0xff] %v3468_v59  ;;  %v3489_v38 = vrot.slane %v3476_v12, %v3468_v59  ;;  %v3510_v17 = vrot.slane %v3476_v12, %v881_v30 }
 0x155   :  { %1204 = vperm.xlu0 %2633, %v3279_v53   ;;  %v3452_v55 = vpop.permute.xlu1 %432  ;;  %4571 = vst [vmem:[#allocation73_spill] sm:$0xff] %v3465_v5  ;;  %v3483_v42 = vrot.slane %v3476_v12, %v3465_v5 }
 0x156   :  { %4569 = vst [vmem:[#allocation71_spill] sm:$0xff] %v3452_v55  ;;  %v3454_v41 = vpop.permute.xlu0 %772  ;;  %v685_v55 = vsub.s32 2, %v3458_v18 }
 0x157   :  { %4570 = vst [vmem:[#allocation72_spill] sm:$0xff] %v3454_v41  ;;  %2600 = vset.pattern.permute.xlu1 %v4559_v63  ;;  %v507_v33 = vmul.f32 %v3483_v42, %v3332_v49  ;;  %v494_v49 = vmul.f32 %v3483_v42, %v3374_v29  ;;  %v511_v30 = vmul.f32 %v3483_v42, %v3386_v31 }
 0x158   :  { %480 = vperm.xlu1 %2600, %v3445_v44   ;;  %v3492_v58 = vrot.slane %v3476_v12, %v685_v55  ;;  %v319_v31 = vmul.f32 %v3489_v38, %v3433_v7 }
 0x159   :  { %1260 = vperm.xlu0 %2633, %v3295_v57   ;;  %v457_v35 = vpop.permute.xlu1 %456 }
 0x15a   :  { %v3462_v20 = vpop.permute.xlu0 %788  ;;  %v703_v59 = vmul.f32 %v3492_v58, %v3391_v43  ;;  %v690_v43 = vmul.f32 %v3492_v58, %v3399_v21  ;;  %v707_v21 = vmul.f32 %v3492_v58, %v3405_v34 }
 0x15c   :  { %2601 = vset.pattern.permute.xlu1 %v4542_v45 }
 0x15d   :  { %1220 = vperm.xlu0 %2633, %v3162_v26   ;;  %616 = vperm.xlu1 %2601, %v3279_v53  }
 0x15e   :  { %v3479_v41 = vpop.permute.xlu0 %760  ;;  %v3485_v48 = vpop.permute.xlu1 %596 }
 0x15f   :  { %4573 = vst [vmem:[#allocation75_spill] sm:$0xff] %v3485_v48  ;;  %v311_v48 = vmul.f32 %v3489_v38, %v3318_v16  ;;  %v298_v16 = vmul.f32 %v3489_v38, %v3355_v47 }
 0x161   :  { %1252 = vperm.xlu0 %2633, %v3174_v28   ;;  %668 = vperm.xlu1 %2601, %v3149_v24   ;;  %v539_v55 = vadd.f32 %v507_v33, %v311_v48  ;;  %v526_v29 = vadd.f32 %v494_v49, %v298_v16 }
 0x162   :  { %v3499_v5 = vpop.permute.xlu0 %804  ;;  %v3505_v60 = vpop.permute.xlu1 %624 }
 0x163   :  { %4574 = vst [vmem:[#allocation76_spill] sm:$0xff] %v3505_v60  ;;  %v735_v53 = vadd.f32 %v703_v59, %v539_v55  ;;  %v722_v59 = vadd.f32 %v690_v43, %v526_v29  ;;  %v711_v43 = vmul.f32 %v3492_v58, %v3411_v32 }
 0x165   :  { %2635 = vset.pattern.permute.xlu0 %v4556_v56  ;;  %672 = vperm.xlu1 %2601, %v3295_v57   ;;  %v315_v57 = vmul.f32 %v3489_v38, %v3367_v25 }
 0x166   :  { %v817_v24 = vpop.permute.xlu0 %816 }
 0x167   :  { %v899_v33 = vmul.f32 %v3510_v17, %v817_v24  ;;  %v3519_v48 = vpop.permute.xlu1 %784  ;;  %v515_v24 = vmul.f32 %v3483_v42, %v457_v35  ;;  %v543_v49 = vadd.f32 %v511_v30, %v315_v57  ;;  %v513_v57 = vmul.f32 %v3483_v42, %v3269_v51 }
 0x168   :  { %v709_v30 = vmul.f32 %v3492_v58, %v3417_v6 }
 0x169   :  { %v3523_v60 = vadd.f32 %v899_v33, %v735_v53  ;;  %2602 = vset.pattern.permute.xlu1 %v4547_v52  ;;  %v739_v33 = vadd.f32 %v707_v21, %v543_v49  ;;  %v547_v34 = vadd.f32 %v515_v24, %v319_v31 }
 0x16a   :  { %v765_v47 = vpop.permute.xlu0 %764  ;;  %780 = vperm.xlu1 %2602, %v3045_v10  }
 0x16b   :  { %v886_v55 = vmul.f32 %v3510_v17, %v765_v47  ;;  %v743_v21 = vadd.f32 %v711_v43, %v547_v34 }
 0x16c   :  { %v3537_v25 = vpop.permute.xlu1 %208 }
 0x16d   :  { %v3535_v53 = vadd.f32 %v886_v55, %v722_v59  ;;  %4575 = vst [vmem:[#allocation77_spill] sm:$0xff] %v3537_v25 }
 0x16e   :  { %v833_v16 = vpop.permute.xlu0 %832  ;;  %808 = vperm.xlu1 %2602, %v3167_v27  }
 0x16f   :  { %v903_v35 = vmul.f32 %v3510_v17, %v833_v16 }
 0x170   :  { %v244_v7 = vpop.permute.xlu1 %243 }
 0x171   :  { %v3545_v29 = vadd.f32 %v903_v35, %v739_v33  ;;  %v317_v47 = vmul.f32 %v3489_v38, %v244_v7  ;;  %v4581_v7 = vmov 5  }
 0x172   :  { %v849_v59 = vpop.permute.xlu0 %848  ;;  %836 = vperm.xlu1 %2602, %v3052_v11  }
 0x173   :  { %4576 = vst [vmem:[#allocation78_spill] sm:$0xff] %v3545_v29  ;;  %v907_v32 = vmul.f32 %v3510_v17, %v849_v59  ;;  %v545_v24 = vadd.f32 %v513_v57, %v317_v47  ;;  %v304_v57 = vmul.f32 %v3489_v38, %v3310_v62  ;;  %v500_v47 = vmul.f32 %v3483_v42, %v3253_v46 }
 0x174   :  { %v3554_v49 = vpop.permute.xlu1 %278  ;;  %v297_v59 = vmul.f32 %v3489_v38, %v3316_v1  ;;  %v1077_v62 = vsub.s32 4, %v3458_v18  ;;  %v689_v1 = vmul.f32 %v3492_v58, %v3393_v40 }
 0x175   :  { %v3552_v55 = vadd.f32 %v907_v32, %v743_v21  ;;  %4577 = vst [vmem:[#allocation79_spill] sm:$0xff] %v3554_v49  ;;  %v741_v51 = vadd.f32 %v709_v30, %v545_v24  ;;  %v493_v30 = vmul.f32 %v3483_v42, %v3220_v36  ;;  %v696_v21 = vmul.f32 %v3492_v58, %v3345_v0 }
 0x176   :  { %v841_v31 = vpop.permute.xlu0 %840  ;;  %2603 = vset.pattern.permute.xlu1 %v4551_v54  ;;  %v892_v36 = vmul.f32 %v3510_v17, %v3462_v20  ;;  %v504_v0 = vmul.f32 %v3483_v42, %v3231_v39 }
 0x177   :  { %v905_v16 = vmul.f32 %v3510_v17, %v841_v31  ;;  %972 = vperm.xlu1 %2603, %v3072_v14   ;;  %v3593_v31 = vrot.slane %v3476_v12, %v1077_v62 }
 0x179   :  { %v3559_v6 = vadd.f32 %v905_v16, %v741_v51  ;;  %v3561_v33 = vpop.permute.xlu1 %420  ;;  %v532_v51 = vadd.f32 %v500_v47, %v304_v57  ;;  %v308_v57 = vmul.f32 %v3489_v38, %v3266_v50  ;;  %v700_v47 = vmul.f32 %v3492_v58, %v3407_v61 }
 0x17a   :  { %4579 = vst [vmem:[#allocation81_spill] sm:$0xff] %v3561_v33  ;;  %v3563_v43 = vpop.permute.xlu0 %828  ;;  %v896_v50 = vmul.f32 %v3510_v17, %v3499_v5 }
 0x17b   :  { %4578 = vst [vmem:[#allocation80_spill] sm:$0xff] %v3559_v6  ;;  %996 = vperm.xlu1 %2603, %v3105_v19   ;;  %v728_v46 = vadd.f32 %v696_v21, %v532_v51  ;;  %v536_v62 = vadd.f32 %v504_v0, %v308_v57 }
 0x17d   :  { %v3566_v34 = vpop.permute.xlu1 %472  ;;  %v924_v20 = vadd.f32 %v892_v36, %v728_v46 }
 0x17e   :  { %4580 = vst [vmem:[#allocation82_spill] sm:$0xff] %v3566_v34  ;;  %v3568_v35 = vpop.permute.xlu0 %876 }
 0x17f   :  { %2604 = vset.pattern.permute.xlu1 %v4581_v7 }
 0x180   :  { %1144 = vperm.xlu1 %2604, %v2999_v3   ;;  %v525_v3 = vadd.f32 %v493_v30, %v297_v59 }
 0x181   :  { %v3582_v32 = vpop.permute.xlu1 %476 }
 0x182   :  { %4582 = vst [vmem:[#allocation83_spill] sm:$0xff] %v3582_v32  ;;  %v721_v40 = vadd.f32 %v689_v1, %v525_v3 }
 0x183   :  { %v3585_v24 = vpop.permute.xlu0 %952 }
 0x184   :  { %1160 = vperm.xlu1 %2604, %v2994_v2   ;;  %v885_v2 = vmul.f32 %v3510_v17, %v3479_v41 }
 0x186   :  { %v3597_v16 = vpop.permute.xlu1 %584  ;;  %v917_v51 = vadd.f32 %v885_v2, %v721_v40 }
 0x187   :  { %v985_v34 = vpop.permute.xlu0 %984 }
 0x188   :  { %v1088_v30 = vmul.f32 %v3593_v31, %v985_v34  ;;  %1164 = vperm.xlu1 %2604, %v3006_v4   ;;  %v732_v34 = vadd.f32 %v700_v47, %v536_v62 }
 0x18a   :  { %v3607_v59 = vadd.f32 %v1088_v30, %v924_v20  ;;  %v3609_v39 = vpop.permute.xlu1 %612  ;;  %v928_v3 = vadd.f32 %v896_v50, %v732_v34  ;;  %v1510_v50 = vld [vmem:[#allocation2 + $0x10] sm:$0xff]  ;;  %v4587_v34 = vld [vmem:[#allocation37_spill] sm:$0xff] }
 0x18b   :  { %4583 = vst [vmem:[#allocation84_spill] sm:$0xff] %v3609_v39  ;;  %v957_v21 = vpop.permute.xlu0 %956 }
 0x18c   :  { %v1081_v41 = vmul.f32 %v3593_v31, %v957_v21  ;;  %2606 = vset.pattern.permute.xlu1 %v4559_v63 }
 0x18d   :  { %468 = vperm.xlu1 %2606, %v3174_v28  }
 0x18e   :  { %v3615_v4 = vadd.f32 %v1081_v41, %v917_v51  ;;  %v3618_v61 = vpop.permute.xlu1 %640  ;;  %v1508_v51 = vld [vmem:[#allocation2] sm:$0xff] }
 0x18f   :  { %4584 = vst [vmem:[#allocation85_spill] sm:$0xff] %v3618_v61  ;;  %v1001_v36 = vpop.permute.xlu0 %1000  ;;  %v4608_v61 = vld [vmem:[#allocation63_spill] sm:$0xff] }
 0x190   :  { %v1092_v46 = vmul.f32 %v3593_v31, %v1001_v36  ;;  %v1515_v36 = vld [vmem:[#allocation2 + $0x38] sm:$0xff] }
 0x191   :  { %2607 = vset.pattern.permute.xlu1 %v4542_v45 }
 0x192   :  { %v3621_v1 = vadd.f32 %v1092_v46, %v928_v3  ;;  %632 = vperm.xlu1 %2607, %v3162_v26   ;;  %v1512_v46 = vld [vmem:[#allocation2 + $0x20] sm:$0xff] }
 0x193   :  { %v1013_v5 = vpop.permute.xlu0 %1012  ;;  %v3626_v57 = vpop.permute.xlu1 %776 }
 0x194   :  { %v1095_v0 = vmul.f32 %v3593_v31, %v1013_v5  ;;  %v1514_v5 = vld [vmem:[#allocation2 + $0x30] sm:$0xff] }
 0x196   :  { %v3629_v20 = vadd.f32 %v1095_v0, %v3523_v60  ;;  %2608 = vset.pattern.permute.xlu1 %v4547_v52 }
 0x197   :  { %v961_v2 = vpop.permute.xlu0 %960  ;;  %796 = vperm.xlu1 %2608, %v3065_v13   ;;  %v3634_v40 = vpop.permute.xlu1 %800 }
 0x198   :  { %4585 = vst [vmem:[#allocation86_spill] sm:$0xff] %v3629_v20  ;;  %v1082_v30 = vmul.f32 %v3593_v31, %v961_v2  ;;  %v2335_v2 = vpack.c.bf16 %v1514_v5, %v1512_v46  ;;  %v1523_v46 = vld [vmem:[#allocation2 + $0x78] sm:$0xff] }
 0x19a   :  { %v3637_v47 = vadd.f32 %v1082_v30, %v3535_v53  ;;  %v1511_v53 = vld [vmem:[#allocation2 + $0x18] sm:$0xff] }
 0x19b   :  { %824 = vperm.xlu1 %2608, %v3141_v23   ;;  %v4588_v30 = vld [vmem:[#allocation20_spill] sm:$0xff] }
 0x19c   :  { %4586 = vst [vmem:[#allocation87_spill] sm:$0xff] %v3637_v47  ;;  %v3640_v26 = vpop.permute.xlu1 %948 }
 0x19f   :  { %852 = vperm.xlu1 %2608, %v3077_v15  }
 0x1a0   :  { %v3643_v60 = vpop.permute.xlu1 %964 }
 0x1a3   :  { %2609 = vset.pattern.permute.xlu1 %v4551_v54 }
 0x1a4   :  { %988 = vperm.xlu1 %2609, %v3033_v8   ;;  %v3647_v21 = vpop.permute.xlu1 %968 }
 0x1a8   :  { %1016 = vperm.xlu1 %2609, %v3128_v22  }
 0x1a9   :  { %v3650_v13 = vpop.permute.xlu1 %263 }
 0x1ac   :  { %2610 = vset.pattern.permute.xlu1 %v4581_v7 }
 0x1ad   :  { %1176 = vperm.xlu1 %2610, %v3038_v9   ;;  %v1509_v9 = vld [vmem:[#allocation2 + $0x8] sm:$0xff] }
 0x1ae   :  { %v3654_v23 = vpop.permute.xlu1 %436  ;;  %v2329_v62 = vpack.c.bf16 %v1511_v53, %v1509_v9  ;;  %v1517_v9 = vld [vmem:[#allocation2 + $0x48] sm:$0xff]  ;;  %v1519_v53 = vld [vmem:[#allocation2 + $0x58] sm:$0xff] }
 0x1af   :  { %v2337_v49 = vpack.c.bf16 %v1519_v53, %v1517_v9  ;;  %v1525_v53 = vld [vmem:[#allocation2 + $0x88] sm:$0xff] }
 0x1b0   :  { %2330 = vmatprep.subr.bf16.mxu0 %v2329_v62  ;;  %v3675_v62 = vpop.permute.xlu0 %1028 }
 0x1b1   :  { %2611 = vset.pattern.permute.xlu1 %v4556_v56  ;;  %4589 = vst [vmem:[#allocation37_spill] sm:$0xff] %v3675_v62 }
 0x1b2   :  { %288 = vperm.xlu1 %2611, %v3225_v37  }
 0x1b3   :  { %v3658_v15 = vpop.permute.xlu1 %600 }
 0x1b6   :  { %2612 = vset.pattern.permute.xlu1 %v4559_v63  ;;  %v2331_v63 = vpack.c.bf16 %v1510_v50, %v1508_v51  ;;  %v1516_v51 = vld [vmem:[#allocation2 + $0x40] sm:$0xff]  ;;  %v1518_v50 = vld [vmem:[#allocation2 + $0x50] sm:$0xff] }
 0x1b7   :  { %484 = vperm.xlu1 %2612, %v3225_v37   ;;  %v3662_v8 = vpop.permute.xlu1 %628  ;;  %v1513_v37 = vld [vmem:[#allocation2 + $0x28] sm:$0xff] }
 0x1b8   :  { %2332 = vmatpush1.bf16.msra.mxu0 %v2331_v63  ;;  %v2333_v3 = vpack.c.bf16 %v1515_v36, %v1513_v37  ;;  %v4590_v63 = vld [vmem:[#allocation41_spill] sm:$0xff]  ;;  %v1521_v36 = vld [vmem:[#allocation2 + $0x68] sm:$0xff] }
 0x1b9   :  { %v2341_v5 = vpack.c.bf16 %v1523_v46, %v1521_v36  ;;  %v1529_v46 = vld [vmem:[#allocation2 + $0xa8] sm:$0xff] }
 0x1ba   :  { %2334 = vmatprep.subr.bf16.mxu0 %v2333_v3  ;;  %v1522_v3 = vld [vmem:[#allocation2 + $0x70] sm:$0xff] }
 0x1bb   :  { %2613 = vset.pattern.permute.xlu1 %v4542_v45  ;;  %v3665_v22 = vpop.permute.xlu1 %656 }
 0x1bc   :  { %676 = vperm.xlu1 %2613, %v3445_v44   ;;  %2336 = vmatpush1.bf16.msra.mxu0 %v2335_v2 }
 0x1bd   :  { %2338 = vmatprep.subr.bf16.mxu0 %v2337_v49 }
 0x1c0   :  { %2614 = vset.pattern.permute.xlu1 %v4547_v52  ;;  %v3669_v41 = vpop.permute.xlu1 %792 }
 0x1c1   :  { %812 = vperm.xlu1 %2614, %v4587_v34   ;;  %v2339_v34 = vpack.c.bf16 %v1518_v50, %v1516_v51  ;;  %v1527_v51 = vld [vmem:[#allocation2 + $0x98] sm:$0xff]  ;;  %v3684_v50 = vpop.permute.xlu0 %1020 }
 0x1c2   :  { %v2345_v49 = vpack.c.bf16 %v1527_v51, %v1525_v53  ;;  %v1533_v53 = vld [vmem:[#allocation2 + $0xc8] sm:$0xff]  ;;  %v1535_v51 = vld [vmem:[#allocation2 + $0xd8] sm:$0xff] }
 0x1c3   :  { %2340 = vmatpush1.bf16.msra.mxu0 %v2339_v34  ;;  %v1524_v34 = vld [vmem:[#allocation2 + $0x80] sm:$0xff] }
 0x1c4   :  { %v3672_v0 = vpop.permute.xlu1 %820  ;;  %2342 = vmatprep.subr.bf16.mxu0 %v2341_v5  ;;  %v1531_v5 = vld [vmem:[#allocation2 + $0xb8] sm:$0xff] }
 0x1c5   :  { %864 = vperm.xlu1 %2614, %v4588_v30   ;;  %v1520_v30 = vld [vmem:[#allocation2 + $0x60] sm:$0xff]  ;;  %v3689_v29 = vpop.permute.xlu0 %1008 }
 0x1c6   :  { %v2343_v2 = vpack.c.bf16 %v1522_v3, %v1520_v30  ;;  %v1528_v30 = vld [vmem:[#allocation2 + $0xa0] sm:$0xff]  ;;  %v1530_v3 = vld [vmem:[#allocation2 + $0xb0] sm:$0xff]  ;;  %4592 = vst [vmem:[#allocation41_spill] sm:$0xff] %v3689_v29  ;;  %v4606_v29 = vld [vmem:[#allocation26_spill] sm:$0xff] }
 0x1c8   :  { %2344 = vmatpush1.bf16.msra.mxu0 %v2343_v2  ;;  %v2351_v2 = vpack.c.bf16 %v1530_v3, %v1528_v30  ;;  %v1538_v3 = vld [vmem:[#allocation2 + $0xf0] sm:$0xff] }
 0x1c9   :  { %868 = vperm.xlu1 %2614, %v4590_v63   ;;  %v3678_v37 = vpop.permute.xlu1 %980  ;;  %v1526_v63 = vld [vmem:[#allocation2 + $0x90] sm:$0xff]  ;;  %2346 = vmatprep.subr.bf16.mxu0 %v2345_v49  ;;  %v3695_v30 = vpop.permute.xlu0 %1064 }
 0x1ca   :  { %v2347_v32 = vpack.c.bf16 %v1526_v63, %v1524_v34  ;;  %v1532_v34 = vld [vmem:[#allocation2 + $0xc0] sm:$0xff]  ;;  %v1534_v63 = vld [vmem:[#allocation2 + $0xd0] sm:$0xff]  ;;  %4594 = vst [vmem:[#allocation89_spill] sm:$0xff] %v3695_v30 }
 0x1cc   :  { %2348 = vmatpush1.bf16.msra.mxu0 %v2347_v32  ;;  %v2355_v32 = vpack.c.bf16 %v1534_v63, %v1532_v34  ;;  %v1540_v34 = vld [vmem:[#allocation2 + $0x100] sm:$0xff]  ;;  %v1542_v63 = vld [vmem:[#allocation2 + $0x110] sm:$0xff] }
 0x1cd   :  { %2615 = vset.pattern.permute.xlu1 %v4551_v54  ;;  %v2363_v30 = vpack.c.bf16 %v1542_v63, %v1540_v34  ;;  %v3703_v47 = vpop.permute.xlu0 %1024  ;;  %v1550_v34 = vld [vmem:[#allocation2 + $0x150] sm:$0xff] }
 0x1ce   :  { %976 = vperm.xlu1 %2615, %v3045_v10   ;;  %v3682_v9 = vpop.permute.xlu1 %248  ;;  %v2349_v10 = vpack.c.bf16 %v1531_v5, %v1529_v46  ;;  %v1537_v46 = vld [vmem:[#allocation2 + $0xe8] sm:$0xff]  ;;  %v1539_v5 = vld [vmem:[#allocation2 + $0xf8] sm:$0xff]  ;;  %v4599_v63 = vld [vmem:[#allocation19_spill] sm:$0xff] }
 0x1d0   :  { %2350 = vmatprep.subr.bf16.mxu0 %v2349_v10  ;;  %v1536_v10 = vld [vmem:[#allocation2 + $0xe0] sm:$0xff] }
 0x1d1   :  { %2352 = vmatpush1.bf16.msra.mxu0 %v2351_v2  ;;  %v2359_v62 = vpack.c.bf16 %v1538_v3, %v1536_v10  ;;  %v1549_v3 = vld [vmem:[#allocation2 + $0x148] sm:$0xff] }
 0x1d2   :  { %1004 = vperm.xlu1 %2615, %v3167_v27   ;;  %v3687_v36 = vpop.permute.xlu1 %283  ;;  %v2353_v27 = vpack.c.bf16 %v1535_v51, %v1533_v53  ;;  %v1541_v53 = vld [vmem:[#allocation2 + $0x108] sm:$0xff]  ;;  %v1543_v51 = vld [vmem:[#allocation2 + $0x118] sm:$0xff] }
 0x1d3   :  { %4591 = vst [vmem:[#allocation20_spill] sm:$0xff] %v3687_v36  ;;  %v4610_v36 = vld [vmem:[#allocation70_spill] sm:$0xff] }
 0x1d4   :  { %2354 = vmatprep.subr.bf16.mxu0 %v2353_v27  ;;  %v2361_v27 = vpack.c.bf16 %v1543_v51, %v1541_v53  ;;  %v1551_v53 = vld [vmem:[#allocation2 + $0x158] sm:$0xff]  ;;  %v3709_v51 = vpop.permute.xlu0 %1072 }
 0x1d5   :  { %2356 = vmatpush1.bf16.msra.mxu0 %v2355_v32  ;;  %4598 = vst [vmem:[#allocation93_spill] sm:$0xff] %v3709_v51  ;;  %v4603_v51 = vld [vmem:[#allocation21_spill] sm:$0xff] }
 0x1d6   :  { %1032 = vperm.xlu1 %2615, %v3052_v11   ;;  %v2357_v11 = vpack.c.bf16 %v1539_v5, %v1537_v46  ;;  %v1547_v46 = vld [vmem:[#allocation2 + $0x138] sm:$0xff] }
 0x1d7   :  { %v3692_v49 = vpop.permute.xlu1 %480 }
 0x1d8   :  { %4593 = vst [vmem:[#allocation88_spill] sm:$0xff] %v3692_v49  ;;  %2358 = vmatprep.subr.bf16.mxu0 %v2357_v11  ;;  %v1546_v11 = vld [vmem:[#allocation2 + $0x130] sm:$0xff] }
 0x1d9   :  { %2360 = vmatpush1.bf16.msra.mxu0 %v2359_v62  ;;  %v1544_v62 = vld [vmem:[#allocation2 + $0x120] sm:$0xff] }
 0x1da   :  { %2616 = vset.pattern.permute.xlu1 %v4581_v7  ;;  %2362 = vmatprep.subr.bf16.mxu0 %v2361_v27  ;;  %v2367_v10 = vpack.c.bf16 %v1546_v11, %v1544_v62  ;;  %v2369_v27 = vpack.c.bf16 %v1551_v53, %v1549_v3  ;;  %v1552_v62 = vld [vmem:[#allocation2 + $0x160] sm:$0xff]  ;;  %v1554_v11 = vld [vmem:[#allocation2 + $0x170] sm:$0xff]  ;;  %v3721_v53 = vld [vmem:[%s4511_s28 + $0x58] sm:$0xff] }
 0x1db   :  { %1168 = vperm.xlu1 %2616, %v3072_v14   ;;  %v1545_v14 = vld [vmem:[#allocation2 + $0x128] sm:$0xff] }
 0x1dc   :  { %v3698_v2 = vpop.permute.xlu1 %616  ;;  %v2365_v5 = vpack.c.bf16 %v1547_v46, %v1545_v14  ;;  %v1555_v46 = vld [vmem:[#allocation2 + $0x178] sm:$0xff] }
 0x1dd   :  { %4595 = vst [vmem:[#allocation90_spill] sm:$0xff] %v3698_v2  ;;  %2364 = vmatpush1.bf16.msra.mxu0 %v2363_v30  ;;  %v1548_v30 = vld [vmem:[#allocation2 + $0x140] sm:$0xff] }
 0x1de   :  { %2366 = vmatprep.subr.bf16.mxu0 %v2365_v5 }
 0x1df   :  { %1192 = vperm.xlu1 %2616, %v3105_v19  }
 0x1e0   :  { %v3701_v32 = vpop.permute.xlu1 %668 }
 0x1e1   :  { %4596 = vst [vmem:[#allocation91_spill] sm:$0xff] %v3701_v32  ;;  %2368 = vmatpush1.bf16.msra.mxu0 %v2367_v10  ;;  %v2375_v10 = vpack.c.bf16 %v1554_v11, %v1552_v62  ;;  %v1149_v32 = vpop.permute.xlu0 %1148  ;;  %v4602_v62 = vld [vmem:[#allocation44_spill] sm:$0xff]  ;;  %v1273_v11 = vsub.s32 5, %v3458_v18  ;;  %v4607_v18 = vld [vmem:[#allocation58_spill] sm:$0xff] }
 0x1e2   :  { %2370 = vmatprep.subr.bf16.mxu0 %v2369_v27  ;;  %v1557_v27 = vld [vmem:[#allocation2 + $0x188] sm:$0xff] }
 0x1e3   :  { %2617 = vset.pattern.permute.xlu1 %v4542_v45  ;;  %v2371_v45 = vpack.c.bf16 %v1550_v34, %v1548_v30  ;;  %v1559_v30 = vld [vmem:[#allocation2 + $0x198] sm:$0xff]  ;;  %v3743_v2 = vrot.slane %v3476_v12, %v1273_v11  ;;  %v1566_v12 = vld [vmem:[#allocation2 + $0x1d0] sm:$0xff] }
 0x1e4   :  { %664 = vperm.xlu1 %2617, %v3174_v28   ;;  %v3707_v19 = vpop.permute.xlu1 %672  ;;  %v1553_v28 = vld [vmem:[#allocation2 + $0x168] sm:$0xff]  ;;  %v2377_v34 = vpack.c.bf16 %v1559_v30, %v1557_v27 }
 0x1e5   :  { %4597 = vst [vmem:[#allocation92_spill] sm:$0xff] %v3707_v19  ;;  %2372 = vmatpush1.bf16.msra.mxu0 %v2371_v45  ;;  %v2373_v5 = vpack.c.bf16 %v1555_v46, %v1553_v28  ;;  %v1556_v45 = vld [vmem:[#allocation2 + $0x180] sm:$0xff]  ;;  %v1561_v19 = vld [vmem:[#allocation2 + $0x1a8] sm:$0xff]  ;;  %v1276_v49 = vmul.f32 %v3743_v2, %v1149_v32 }
 0x1e6   :  { %v4605_v27 = vld [vmem:[#allocation42_spill] sm:$0xff] }
 0x1e7   :  { %2374 = vmatprep.subr.bf16.mxu0 %v2373_v5  ;;  %v296_v5 = vmul.f32 %v3489_v38, %v4602_v62  ;;  %v295_v30 = vmul.f32 %v3489_v38, %v4605_v27  ;;  %v492_v62 = vmul.f32 %v3483_v42, %v4606_v29 }
 0x1e8   :  { %2618 = vset.pattern.permute.xlu1 %v4547_v52 }
 0x1e9   :  { %856 = vperm.xlu1 %2618, %v4599_v63   ;;  %v3713_v14 = vpop.permute.xlu1 %780  ;;  %2376 = vmatpush1.bf16.msra.mxu0 %v2375_v10  ;;  %v1558_v63 = vld [vmem:[#allocation2 + $0x190] sm:$0xff]  ;;  %v524_v6 = vadd.f32 %v492_v62, %v296_v5  ;;  %v1080_v62 = vmul.f32 %v3593_v31, %v3585_v24  ;;  %v2648_v24 = vld [vmem:[%s4511_s28 + $0x80] sm:$0xff] }
 0x1ea   :  { %v2379_v28 = vpack.c.bf16 %v1558_v63, %v1556_v45  ;;  %2378 = vmatprep.subr.bf16.mxu0 %v2377_v34  ;;  %v4604_v10 = vld [vmem:[#allocation23_spill] sm:$0xff]  ;;  %v3734_v45 = vpop.permute.xlu0 %1180  ;;  %v1560_v34 = vld [vmem:[#allocation2 + $0x1a0] sm:$0xff] }
 0x1eb   :  { %v491_v39 = vmul.f32 %v3483_v42, %v4604_v10  ;;  %v884_v10 = vmul.f32 %v3510_v17, %v4608_v61  ;;  %v4609_v5 = vld [vmem:[#allocation43_spill] sm:$0xff] }
 0x1ed   :  { %2619 = vset.pattern.permute.xlu1 %v4551_v54  ;;  %v3716_v3 = vpop.permute.xlu1 %808  ;;  %2380 = vmatpush1.bf16.msra.mxu0 %v2379_v28  ;;  %v523_v27 = vadd.f32 %v491_v39, %v295_v30  ;;  %v1569_v30 = vld [vmem:[#allocation2 + $0x1e8] sm:$0xff] }
 0x1ee   :  { %4600 = vst [vmem:[#allocation19_spill] sm:$0xff] %v3716_v3  ;;  %992 = vperm.xlu1 %2619, %v3721_v53   ;;  %v1563_v3 = vld [vmem:[#allocation2 + $0x1b8] sm:$0xff]  ;;  %v1153_v25 = vpop.permute.xlu0 %1152 }
 0x1ef   :  { %v2381_v63 = vpack.c.bf16 %v1563_v3, %v1561_v19  ;;  %v3748_v19 = vld [vmem:[%s4511_s28 + $0xc8] sm:$0xff]  ;;  %v1277_v32 = vmul.f32 %v3743_v2, %v1153_v25 }
 0x1f0   :  { %v1565_v3 = vld [vmem:[#allocation2 + $0x1c8] sm:$0xff] }
 0x1f1   :  { %v3724_v46 = vpop.permute.xlu1 %836  ;;  %2382 = vmatprep.subr.bf16.mxu0 %v2381_v63  ;;  %v687_v63 = vmul.f32 %v3492_v58, %v4609_v5  ;;  %v1507_v25 = vld [vmem:[%s4611_s0 + $0x8] sm:$0xff] }
 0x1f2   :  { %4601 = vst [vmem:[#allocation94_spill] sm:$0xff] %v3724_v46  ;;  %1044 = vperm.xlu1 %2619, %v4603_v51   ;;  %v1562_v46 = vld [vmem:[#allocation2 + $0x1b0] sm:$0xff]  ;;  %v688_v51 = vmul.f32 %v3492_v58, %v4607_v18  ;;  %1648 = vmatprep.mubr.f32.mxu0 %v1507_v25 }
 0x1f3   :  { %v2383_v28 = vpack.c.bf16 %v1562_v46, %v1560_v34  ;;  %v1567_v46 = vld [vmem:[#allocation2 + $0x1d8] sm:$0xff]  ;;  %v1564_v34 = vld [vmem:[#allocation2 + $0x1c0] sm:$0xff] }
 0x1f4   :  { %v2385_v61 = vpack.c.bf16 %v1567_v46, %v1565_v3  ;;  %v720_v11 = vadd.f32 %v688_v51, %v524_v6  ;;  %v2387_v18 = vpack.c.bf16 %v1566_v12, %v1564_v34  ;;  %v1571_v3 = vld [vmem:[#allocation2 + $0x1f8] sm:$0xff]  ;;  %v719_v6 = vadd.f32 %v687_v63, %v523_v27  ;;  %v1570_v46 = vld [vmem:[#allocation2 + $0x1f0] sm:$0xff]  ;;  %v3772_v27 = vld [vmem:[%s4469_s4] ss:$0 sm:$0xff] }
 0x1f5   :  { %2384 = vmatpush1.bf16.msra.mxu0 %v2383_v28  ;;  %v883_v28 = vmul.f32 %v3510_v17, %v4610_v36  ;;  %v2389_v51 = vpack.c.bf16 %v1571_v3, %v1569_v30  ;;  %v1079_v36 = vmul.f32 %v3593_v31, %v3640_v26  ;;  %v2649_v63 = vld [vmem:[%s4511_s28 + $0x88] sm:$0xff] }
 0x1f6   :  { %1048 = vperm.xlu1 %2619, %v3748_v19   ;;  %v3751_v29 = vpop.permute.xlu1 %972  ;;  %2386 = vmatprep.subr.bf16.mxu0 %v2385_v61  ;;  %v916_v33 = vadd.f32 %v884_v10, %v720_v11  ;;  %v1568_v10 = vld [vmem:[#allocation2 + $0x1e0] sm:$0xff]  ;;  %v1309_v11 = vadd.f32 %v1277_v32, %v3615_v4  ;;  %v3794_v4 = vld [vmem:[%s4511_s28 + $0xb8] sm:$0xff] }
 0x1f7   :  { %v2391_v61 = vpack.c.bf16 %v1570_v46, %v1568_v10  ;;  %v915_v34 = vadd.f32 %v883_v28, %v719_v6 }
 0x1f8   :  { %v1112_v5 = vadd.f32 %v1080_v62, %v916_v33  ;;  %v1506_v62 = vld [vmem:[%s4611_s0] sm:$0xff]  ;;  %v1348_v3 = vadd.f32 %v3772_v27, %v1309_v11 }
 0x1f9   :  { %2388 = vmatpush1.bf16.msra.mxu0 %v2387_v18  ;;  %v1111_v26 = vadd.f32 %v1079_v36, %v915_v34  ;;  %v4613_v34 = vld [vmem:[#allocation55_spill] sm:$0xff] }
 0x1fa   :  { %2620 = vset.pattern.permute.xlu1 %v4581_v7  ;;  %v3761_v39 = vpop.permute.xlu1 %996  ;;  %2390 = vmatprep.subr.bf16.mxu0 %v2389_v51  ;;  %v1308_v12 = vadd.f32 %v1276_v49, %v1112_v5  ;;  %v1380_v46 = vmax.f32 %v1348_v3, 0.0  ;;  %v2654_v3 = vld [vmem:[%s4511_s28 + $0x70] sm:$0xff] }
 0x1fb   :  { %1208 = vperm.xlu1 %2620, %v2648_v24  }
 0x1fc   :  { %v1347_v18 = vadd.f32 %v3772_v27, %v1308_v12  ;;  %v314_v12 = vmul.f32 %v3489_v38, %v4613_v34 }
 0x1fd   :  { %2392 = vmatpush1.bf16.msra.mxu0 %v2391_v61  ;;  %v3808_v61 = vld [vmem:[%s4511_s28 + $0xb0] sm:$0xff] }
 0x1fe   :  { %v1379_v24 = vmax.f32 %v1347_v18, 0.0 }
 0x1ff   :  { %1212 = vperm.xlu1 %2620, %v2649_v63   ;;  %v1145_v33 = vpop.permute.xlu1 %1144  ;;  %v510_v63 = vmul.f32 %v3483_v42, %v3654_v23  ;;  %v2653_v23 = vld [vmem:[%s4511_s28 + $0x18] sm:$0xff] }
 0x200   :  { %v1275_v49 = vmul.f32 %v3743_v2, %v1145_v33  ;;  %1649 = vmatmul.mubr.f32.vlgmr.msra.gmra.mrb[0].mxu0 %v1506_v62  ;;  %v3818_v33 = vld [vmem:[%s4511_s28 + $0xe0] sm:$0xff] }
 0x201   :  { %v542_v11 = vadd.f32 %v510_v63, %v314_v12  ;;  %v4617_v63 = vld [vmem:[#allocation75_spill] sm:$0xff] }
 0x202   :  { %v1307_v28 = vadd.f32 %v1275_v49, %v1111_v26  ;;  %v902_v26 = vmul.f32 %v3510_v17, %v3563_v43 }
 0x203   :  { %2622 = vset.pattern.permute.xlu1 %v4547_v52  ;;  %v3787_v30 = vpop.permute.xlu1 %1160 }
 0x204   :  { %v1346_v6 = vadd.f32 %v3772_v27, %v1307_v28  ;;  %844 = vperm.xlu1 %2622, %v3794_v4  }
 0x206   :  { %v1378_v51 = vmax.f32 %v1346_v6, 0.0  ;;  %v4615_v6 = vld [vmem:[#allocation28_spill] sm:$0xff] }
 0x207   :  { %v3797_v10 = vpop.permute.xlu1 %1164 }
 0x208   :  { %v1410_v5 = vmax.f32 %v1378_v51, %v1379_v24  ;;  %872 = vperm.xlu1 %2622, %v3445_v44   ;;  %v501_v24 = vmul.f32 %v3483_v42, %v4615_v6  ;;  %v4616_v51 = vld [vmem:[#allocation49_spill] sm:$0xff] }
 0x209   :  { %v4619_v6 = vld [vmem:[#allocation29_spill] sm:$0xff] }
 0x20a   :  { %v3800_v36 = vmax.f32 %v1410_v5, %v1380_v46  ;;  %v305_v46 = vmul.f32 %v3489_v38, %v4616_v51  ;;  %v2655_v5 = vld [vmem:[%s4511_s28 + $0xa0] sm:$0xff] }
 0x20c   :  { %4612 = vst [vmem:[#allocation44_spill] sm:$0xff] %v3800_v36  ;;  %2623 = vset.pattern.permute.xlu1 %v4551_v54  ;;  %v3803_v32 = vpop.permute.xlu1 %468  ;;  %v533_v12 = vadd.f32 %v501_v24, %v305_v46  ;;  %v303_v24 = vmul.f32 %v3489_v38, %v4619_v6  ;;  %v3876_v6 = vld [vmem:[%s4511_s28 + $0xd0] sm:$0xff] }
 0x20d   :  { %1036 = vperm.xlu1 %2623, %v3808_v61  }
 0x211   :  { %1060 = vperm.xlu1 %2623, %v3818_v33   ;;  %v633_v25 = vpop.permute.xlu1 %632 }
 0x212   :  { %v706_v49 = vmul.f32 %v3492_v58, %v633_v25  ;;  %v697_v25 = vmul.f32 %v3492_v58, %v4617_v63  ;;  %v891_v63 = vmul.f32 %v3510_v17, %v3519_v48  ;;  %v1087_v48 = vmul.f32 %v3593_v31, %v3678_v37 }
 0x214   :  { %v738_v62 = vadd.f32 %v706_v49, %v542_v11  ;;  %v893_v49 = vmul.f32 %v3510_v17, %v3669_v41  ;;  %v729_v46 = vadd.f32 %v697_v25, %v533_v12 }
 0x215   :  { %2624 = vset.pattern.permute.xlu1 %v4581_v7 }
 0x216   :  { %v3825_v18 = vadd.f32 %v902_v26, %v738_v62  ;;  %1156 = vperm.xlu1 %2624, %v2653_v23   ;;  %v3830_v28 = vpop.permute.xlu1 %796  ;;  %v4618_v26 = vld [vmem:[#allocation31_spill] sm:$0xff]  ;;  %v3856_v62 = vld [vmem:[%s4511_s28 + $0xd8] sm:$0xff]  ;;  %v925_v36 = vadd.f32 %v893_v49, %v729_v46 }
 0x217   :  { %v499_v11 = vmul.f32 %v3483_v42, %v4618_v26  ;;  %v1284_v26 = vmul.f32 %v3743_v2, %v3734_v45 }
 0x218   :  { %4614 = vst [vmem:[#allocation21_spill] sm:$0xff] %v3825_v18 }
 0x219   :  { %v531_v41 = vadd.f32 %v499_v11, %v303_v24  ;;  %v1316_v49 = vadd.f32 %v1284_v26, %v3607_v59  ;;  %v2658_v59 = vld [vmem:[%s4511_s28 + $0xc0] sm:$0xff] }
 0x21a   :  { %1200 = vperm.xlu1 %2624, %v2654_v3   ;;  %v3835_v43 = vpop.permute.xlu1 %824  ;;  %v3859_v3 = vpop.permute.xlu0 %1196 }
 0x21e   :  { %1224 = vperm.xlu1 %2624, %v2655_v5   ;;  %v3844_v34 = vpop.permute.xlu1 %852  ;;  %v1185_v18 = vpop.permute.xlu0 %1184 }
 0x21f   :  { %v1285_v25 = vmul.f32 %v3743_v2, %v1185_v18 }
 0x222   :  { %2625 = vset.pattern.permute.xlu1 %v4547_v52  ;;  %v4620_v52 = vld [vmem:[#allocation59_spill] sm:$0xff] }
 0x223   :  { %860 = vperm.xlu1 %2625, %v3856_v62   ;;  %v989_v23 = vpop.permute.xlu1 %988  ;;  %v695_v51 = vmul.f32 %v3492_v58, %v4620_v52 }
 0x224   :  { %v1089_v5 = vmul.f32 %v3593_v31, %v989_v23 }
 0x225   :  { %v727_v12 = vadd.f32 %v695_v51, %v531_v41  ;;  %v1355_v51 = vadd.f32 %v3772_v27, %v1316_v49 }
 0x226   :  { %v1121_v45 = vadd.f32 %v1089_v5, %v925_v36 }
 0x227   :  { %2626 = vset.pattern.permute.xlu1 %v4551_v54  ;;  %v3871_v20 = vpop.permute.xlu1 %1016  ;;  %v923_v11 = vadd.f32 %v891_v63, %v727_v12  ;;  %v1387_v5 = vmax.f32 %v1355_v51, 0.0 }
 0x228   :  { %1052 = vperm.xlu1 %2626, %v3876_v6   ;;  %v1317_v52 = vadd.f32 %v1285_v25, %v1121_v45 }
 0x229   :  { %v1119_v24 = vadd.f32 %v1087_v48, %v923_v11  ;;  %v4621_v11 = vld [vmem:[#allocation68_spill] sm:$0xff] }
 0x22a   :  { %v1356_v37 = vadd.f32 %v3772_v27, %v1317_v52  ;;  %v718_v49 = vmul.f32 %v3492_v58, %v4621_v11  ;;  %v4630_v11 = vld [vmem:[#allocation45_spill] sm:$0xff] }
 0x22c   :  { %2627 = vset.pattern.permute.xlu1 %v4581_v7  ;;  %v1177_v23 = vpop.permute.xlu1 %1176  ;;  %v1388_v26 = vmax.f32 %v1356_v37, 0.0  ;;  %v4623_v37 = vld [vmem:[#allocation24_spill] sm:$0xff] }
 0x22d   :  { %v1283_v46 = vmul.f32 %v3743_v2, %v1177_v23  ;;  %1188 = vperm.xlu1 %2627, %v3721_v53   ;;  %v914_v23 = vmul.f32 %v3510_v17, %v3568_v35 }
 0x22f   :  { %v1315_v41 = vadd.f32 %v1283_v46, %v1119_v24 }
 0x231   :  { %v1354_v18 = vadd.f32 %v3772_v27, %v1315_v41  ;;  %1240 = vperm.xlu1 %2627, %v2658_v59   ;;  %v289_v36 = vpop.permute.xlu1 %288  ;;  %v4624_v59 = vld [vmem:[#allocation25_spill] sm:$0xff] }
 0x232   :  { %v326_v48 = vmul.f32 %v3489_v38, %v289_v36  ;;  %v496_v36 = vmul.f32 %v3483_v42, %v4624_v59 }
 0x233   :  { %v1386_v63 = vmax.f32 %v1354_v18, 0.0  ;;  %v300_v18 = vmul.f32 %v3489_v38, %v4623_v37 }
 0x235   :  { %v1428_v12 = vmax.f32 %v1386_v63, %v1387_v5  ;;  %1244 = vperm.xlu1 %2627, %v3748_v19   ;;  %v4625_v5 = vld [vmem:[#allocation27_spill] sm:$0xff]  ;;  %v4626_v63 = vld [vmem:[#allocation30_spill] sm:$0xff] }
 0x236   :  { %v485_v53 = vpop.permute.xlu1 %484 }
 0x237   :  { %v522_v25 = vmul.f32 %v3483_v42, %v485_v53  ;;  %v3895_v45 = vmax.f32 %v1428_v12, %v1388_v26  ;;  %v498_v26 = vmul.f32 %v3483_v42, %v4626_v63  ;;  %v4627_v12 = vld [vmem:[#allocation46_spill] sm:$0xff] }
 0x238   :  { %v4628_v53 = vld [vmem:[#allocation50_spill] sm:$0xff] }
 0x239   :  { %v554_v24 = vadd.f32 %v522_v25, %v326_v48  ;;  %2629 = vset.pattern.permute.xlu1 %v4551_v54  ;;  %v4629_v48 = vld [vmem:[#allocation22_spill] sm:$0xff] }
 0x23a   :  { %1040 = vperm.xlu1 %2629, %v3794_v4   ;;  %v299_v25 = vmul.f32 %v3489_v38, %v4629_v48  ;;  %v1084_v48 = vmul.f32 %v3593_v31, %v3647_v21 }
 0x23b   :  { %v750_v52 = vadd.f32 %v718_v49, %v554_v24  ;;  %v3903_v19 = vpop.permute.xlu1 %676  ;;  %v691_v49 = vmul.f32 %v3492_v58, %v4630_v11  ;;  %v4631_v24 = vld [vmem:[#allocation72_spill] sm:$0xff]  ;;  %v4633_v11 = vld [vmem:[#allocation38_spill] sm:$0xff] }
 0x23d   :  { %v3905_v46 = vadd.f32 %v914_v23, %v750_v52  ;;  %v528_v23 = vadd.f32 %v496_v36, %v300_v18  ;;  %v888_v52 = vmul.f32 %v3510_v17, %v4631_v24  ;;  %v1083_v36 = vmul.f32 %v3593_v31, %v3643_v60  ;;  %v1860_v60 = vld [vmem:[%s4474_s9 + $0x8] sm:$0xff]  ;;  %v1861_v24 = vld [vmem:[%s4474_s9 + $0x10] sm:$0xff] }
 0x23e   :  { %1068 = vperm.xlu1 %2629, %v3445_v44   ;;  %v495_v44 = vmul.f32 %v3483_v42, %v4625_v5  ;;  %v4632_v5 = vld [vmem:[#allocation64_spill] sm:$0xff] }
 0x23f   :  { %4622 = vst [vmem:[#allocation23_spill] sm:$0xff] %v3905_v46  ;;  %v887_v63 = vmul.f32 %v3510_v17, %v4632_v5 }
 0x240   :  { %v3908_v51 = vpop.permute.xlu1 %812  ;;  %v527_v59 = vadd.f32 %v495_v44, %v299_v25  ;;  %v4634_v44 = vld [vmem:[#allocation34_spill] sm:$0xff] }
 0x241   :  { %v301_v25 = vmul.f32 %v3489_v38, %v4634_v44  ;;  %v4636_v44 = vld [vmem:[#allocation40_spill] sm:$0xff] }
 0x242   :  { %2630 = vset.pattern.permute.xlu1 %v4581_v7  ;;  %v723_v18 = vadd.f32 %v691_v49, %v527_v59 }
 0x243   :  { %1232 = vperm.xlu1 %2630, %v3808_v61   ;;  %v692_v61 = vmul.f32 %v3492_v58, %v4627_v12 }
 0x244   :  { %v3912_v41 = vpop.permute.xlu1 %864 }
 0x245   :  { %v724_v12 = vadd.f32 %v692_v61, %v528_v23  ;;  %v919_v23 = vadd.f32 %v887_v63, %v723_v18  ;;  %v503_v63 = vmul.f32 %v3483_v42, %v4636_v44  ;;  %v4637_v18 = vld [vmem:[#allocation47_spill] sm:$0xff] }
 0x247   :  { %1256 = vperm.xlu1 %2630, %v3818_v33   ;;  %v302_v33 = vmul.f32 %v3489_v38, %v4628_v53  ;;  %v920_v61 = vadd.f32 %v888_v52, %v724_v12 }
 0x248   :  { %v3915_v35 = vpop.permute.xlu1 %868 }
 0x249   :  { %v530_v53 = vadd.f32 %v498_v26, %v302_v33  ;;  %v890_v26 = vmul.f32 %v3510_v17, %v3713_v14  ;;  %v4635_v33 = vld [vmem:[#allocation61_spill] sm:$0xff]  ;;  %v1279_v14 = vmul.f32 %v3743_v2, %v3787_v30  ;;  %v1116_v59 = vadd.f32 %v1084_v48, %v920_v61 }
 0x24a   :  { %v693_v49 = vmul.f32 %v3492_v58, %v4635_v33  ;;  %v307_v30 = vmul.f32 %v3489_v38, %v4637_v18  ;;  %v1869_v18 = vld [vmem:[%s4474_s9 + $0x50] sm:$0xff] }
 0x24b   :  { %2631 = vset.pattern.permute.xlu1 %v4551_v54  ;;  %v694_v54 = vmul.f32 %v3492_v58, %v3597_v16  ;;  %v1280_v16 = vmul.f32 %v3743_v2, %v3797_v10 }
 0x24c   :  { %1056 = vperm.xlu1 %2631, %v3856_v62   ;;  %v497_v62 = vmul.f32 %v3483_v42, %v4633_v11 }
 0x24d   :  { %v977_v37 = vpop.permute.xlu1 %976  ;;  %v726_v52 = vadd.f32 %v694_v54, %v530_v53  ;;  %v1312_v46 = vadd.f32 %v1280_v16, %v1116_v59  ;;  %v1866_v54 = vld [vmem:[%s4474_s9 + $0x38] sm:$0xff]  ;;  %v1085_v16 = vmul.f32 %v3593_v31, %v3751_v29  ;;  %v1868_v29 = vld [vmem:[%s4474_s9 + $0x48] sm:$0xff] }
 0x24e   :  { %v1086_v5 = vmul.f32 %v3593_v31, %v977_v37  ;;  %v529_v11 = vadd.f32 %v497_v62, %v301_v25  ;;  %v1864_v37 = vld [vmem:[%s4474_s9 + $0x28] sm:$0xff]  ;;  %v1173_v25 = vpop.permute.xlu0 %1172 }
 0x24f   :  { %v922_v33 = vadd.f32 %v890_v26, %v726_v52  ;;  %v4638_v62 = vld [vmem:[#allocation62_spill] sm:$0xff]  ;;  %v2461_v61 = vpack.c.bf16 %v1866_v54, %v1864_v37  ;;  %v1865_v26 = vld [vmem:[%s4474_s9 + $0x30] sm:$0xff]  ;;  %v1288_v52 = vmul.f32 %v3743_v2, %v3859_v3  ;;  %v1351_v59 = vadd.f32 %v3772_v27, %v1312_v46 }
 0x250   :  { %2632 = vset.pattern.permute.xlu1 %v4581_v7  ;;  %v1862_v7 = vld [vmem:[%s4474_s9 + $0x18] sm:$0xff]  ;;  %v725_v48 = vadd.f32 %v693_v49, %v529_v11  ;;  %v1091_v3 = vmul.f32 %v3593_v31, %v3761_v39 }
 0x251   :  { %1248 = vperm.xlu1 %2632, %v3876_v6   ;;  %v3955_v21 = vpop.permute.xlu1 %1004  ;;  %v2457_v10 = vpack.c.bf16 %v1862_v7, %v1860_v60  ;;  %v1859_v6 = vld [vmem:[%s4474_s9] sm:$0xff]  ;;  %v1115_v60 = vadd.f32 %v1083_v36, %v919_v23  ;;  %v889_v7 = vmul.f32 %v3510_v17, %v3626_v57  ;;  %v699_v36 = vmul.f32 %v3492_v58, %v4638_v62  ;;  %v2660_v62 = vld [vmem:[%s4511_s28 + $0xf8] sm:$0xff] }
 0x252   :  { %v2459_v12 = vpack.c.bf16 %v1861_v24, %v1859_v6  ;;  %v1282_v23 = vmul.f32 %v3743_v2, %v1173_v25  ;;  %v1118_v49 = vadd.f32 %v1086_v5, %v922_v33  ;;  %v535_v6 = vadd.f32 %v503_v63, %v307_v30  ;;  %v1867_v63 = vld [vmem:[%s4474_s9 + $0x40] sm:$0xff] }
 0x253   :  { %2458 = vmatprep.subr.bf16.mxu0 %v2457_v10  ;;  %v1311_v57 = vadd.f32 %v1279_v14, %v1115_v60  ;;  %v895_v14 = vmul.f32 %v3510_v17, %v3634_v40  ;;  %v921_v24 = vadd.f32 %v889_v7, %v725_v48  ;;  %v1870_v40 = vld [vmem:[%s4474_s9 + $0x58] sm:$0xff]  ;;  %v2467_v33 = vpack.c.bf16 %v1869_v18, %v1867_v63  ;;  %v1875_v63 = vld [vmem:[%s4474_s9 + $0x80] sm:$0xff]  ;;  %v1877_v18 = vld [vmem:[%s4474_s9 + $0x90] sm:$0xff] }
 0x254   :  { %2460 = vmatpush1.bf16.msra.mxu0 %v2459_v12  ;;  %v2659_v12 = vld [vmem:[%s4511_s28 + $0xf0] sm:$0xff]  ;;  %v731_v5 = vadd.f32 %v699_v36, %v535_v6  ;;  %v2465_v44 = vpack.c.bf16 %v1870_v40, %v1868_v29  ;;  %v1314_v60 = vadd.f32 %v1282_v23, %v1118_v49  ;;  %v1320_v39 = vadd.f32 %v1288_v52, %v3621_v1  ;;  %v1872_v36 = vld [vmem:[%s4474_s9 + $0x68] sm:$0xff]  ;;  %v4050_v40 = vpop.permute.xlu0 %1228  ;;  %s4685_s28 = sld [smem:[#allocation96_spill]] }
 0x255   :  { %1236 = vperm.xlu1 %2632, %v3794_v4   ;;  %v3981_v53 = vpop.permute.xlu1 %1032  ;;  %v1863_v4 = vld [vmem:[%s4474_s9 + $0x20] sm:$0xff]  ;;  %2462 = vmatprep.subr.bf16.mxu0 %v2461_v61  ;;  %v1350_v46 = vadd.f32 %v3772_v27, %v1311_v57  ;;  %v1117_v30 = vadd.f32 %v1085_v16, %v921_v24  ;;  %v1383_v54 = vmax.f32 %v1351_v59, 0.0  ;;  %v1874_v57 = vld [vmem:[%s4474_s9 + $0x78] sm:$0xff]  ;;  %v1873_v16 = vld [vmem:[%s4474_s9 + $0x70] sm:$0xff]  ;;  %v321_v52 = vmul.f32 %v3489_v38, %v3650_v13 }
 0x256   :  { %v2463_v10 = vpack.c.bf16 %v1865_v26, %v1863_v4  ;;  %v927_v37 = vadd.f32 %v895_v14, %v731_v5  ;;  %v2469_v1 = vpack.c.bf16 %v1874_v57, %v1872_v36  ;;  %v1871_v26 = vld [vmem:[%s4474_s9 + $0x60] sm:$0xff]  ;;  %v1353_v23 = vadd.f32 %v3772_v27, %v1314_v60  ;;  %v4639_v14 = vld [vmem:[#allocation36_spill] sm:$0xff] }
 0x257   :  { %v1382_v61 = vmax.f32 %v1350_v46, 0.0  ;;  %v2471_v6 = vpack.c.bf16 %v1873_v16, %v1871_v26  ;;  %v517_v24 = vmul.f32 %v3483_v42, %v4639_v14  ;;  %v518_v59 = vmul.f32 %v3483_v42, %v3803_v32  ;;  %v1876_v46 = vld [vmem:[%s4474_s9 + $0x88] sm:$0xff]  ;;  %v1878_v13 = vld [vmem:[%s4474_s9 + $0x98] sm:$0xff]  ;;  %v4640_v32 = vld [vmem:[#allocation57_spill] sm:$0xff] }
 0x258   :  { %2464 = vmatpush1.bf16.msra.mxu0 %v2463_v10  ;;  %v1123_v25 = vadd.f32 %v1091_v3, %v927_v37  ;;  %v2475_v37 = vpack.c.bf16 %v1877_v18, %v1875_v63  ;;  %v4643_v16 = vld [vmem:[#allocation66_spill] sm:$0xff]  ;;  %v1881_v14 = vld [vmem:[%s4474_s9 + $0xb0] sm:$0xff] }
 0x259   :  { %1264 = vperm.xlu1 %2632, %v2659_v12   ;;  %2466 = vmatprep.subr.bf16.mxu0 %v2465_v44  ;;  %v1359_v12 = vadd.f32 %v3772_v27, %v1320_v39  ;;  %v1419_v29 = vmax.f32 %v1382_v61, %v1383_v54  ;;  %v2473_v44 = vpack.c.bf16 %v1878_v13, %v1876_v46  ;;  %v4641_v39 = vld [vmem:[#allocation65_spill] sm:$0xff]  ;;  %v1880_v61 = vld [vmem:[%s4474_s9 + $0xa8] sm:$0xff]  ;;  %v1886_v13 = vld [vmem:[%s4474_s9 + $0xd8] sm:$0xff] }
 0x25a   :  { %v1169_v11 = vpop.permute.xlu1 %1168  ;;  %v1884_v46 = vld [vmem:[%s4474_s9 + $0xc8] sm:$0xff]  ;;  %v1885_v63 = vld [vmem:[%s4474_s9 + $0xd0] sm:$0xff] }
 0x25b   :  { %v1281_v7 = vmul.f32 %v3743_v2, %v1169_v11  ;;  %v322_v11 = vmul.f32 %v3489_v38, %v4640_v32  ;;  %v1391_v36 = vmax.f32 %v1359_v12, 0.0  ;;  %v698_v12 = vmul.f32 %v3492_v58, %v3658_v15  ;;  %v1883_v15 = vld [vmem:[%s4474_s9 + $0xc0] sm:$0xff] }
 0x25c   :  { %2468 = vmatpush1.bf16.msra.mxu0 %v2467_v33 }
 0x25d   :  { %v1313_v48 = vadd.f32 %v1281_v7, %v1117_v30  ;;  %1268 = vperm.xlu1 %2632, %v2660_v62   ;;  %2470 = vmatprep.subr.bf16.mxu0 %v2469_v1  ;;  %v1385_v30 = vmax.f32 %v1353_v23, 0.0  ;;  %v550_v54 = vadd.f32 %v518_v59, %v322_v11  ;;  %v549_v62 = vadd.f32 %v517_v24, %v321_v52  ;;  %v4642_v1 = vld [vmem:[#allocation33_spill] sm:$0xff]  ;;  %v4091_v24 = vpop.permute.xlu0 %1216 }
 0x25e   :  { %v1193_v4 = vpop.permute.xlu1 %1192  ;;  %v502_v26 = vmul.f32 %v3483_v42, %v4642_v1  ;;  %v306_v23 = vmul.f32 %v3489_v38, %v4643_v16  ;;  %v894_v11 = vmul.f32 %v3510_v17, %v3830_v28  ;;  %v1890_v28 = vld [vmem:[%s4474_s9 + $0xf8] sm:$0xff]  ;;  %v4646_v16 = vld [vmem:[#allocation53_spill] sm:$0xff] }
 0x25f   :  { %v1352_v49 = vadd.f32 %v3772_v27, %v1313_v48  ;;  %v1287_v10 = vmul.f32 %v3743_v2, %v1193_v4  ;;  %v1882_v4 = vld [vmem:[%s4474_s9 + $0xb8] sm:$0xff] }
 0x260   :  { %2472 = vmatpush1.bf16.msra.mxu0 %v2471_v6  ;;  %v1879_v6 = vld [vmem:[%s4474_s9 + $0xa0] sm:$0xff]  ;;  %v534_v32 = vadd.f32 %v502_v26, %v306_v23  ;;  %v313_v23 = vmul.f32 %v3489_v38, %v4646_v16  ;;  %v1097_v16 = vmul.f32 %v3593_v31, %v3684_v50  ;;  %v1293_v50 = vmul.f32 %v3743_v2, %v4091_v24  ;;  %v1716_v24 = vld [vmem:[#allocation5 + $0x78] sm:$0xff] }
 0x261   :  { %v1384_v5 = vmax.f32 %v1352_v49, 0.0  ;;  %v1319_v3 = vadd.f32 %v1287_v10, %v1123_v25  ;;  %2634 = vset.pattern.permute.xlu1 %v4556_v56  ;;  %v713_v56 = vmul.f32 %v3492_v58, %v4641_v39  ;;  %2474 = vmatprep.subr.bf16.mxu0 %v2473_v44  ;;  %v2477_v10 = vpack.c.bf16 %v1882_v4, %v1880_v61  ;;  %v1889_v39 = vld [vmem:[%s4474_s9 + $0xf0] sm:$0xff]  ;;  %v4645_v61 = vld [vmem:[#allocation69_spill] sm:$0xff] }
 0x262   :  { %v2479_v59 = vpack.c.bf16 %v1881_v14, %v1879_v6  ;;  %v2481_v44 = vpack.c.bf16 %v1886_v13, %v1884_v46  ;;  %v320_v4 = vmul.f32 %v3489_v38, %v4645_v61  ;;  %v712_v14 = vmul.f32 %v3492_v58, %v3665_v22  ;;  %v4648_v22 = vld [vmem:[#allocation51_spill] sm:$0xff] }
 0x263   :  { %v1420_v60 = vmax.f32 %v1419_v29, %v1384_v5  ;;  %v1358_v7 = vadd.f32 %v3772_v27, %v1319_v3  ;;  %v665_v33 = vpop.permute.xlu1 %664  ;;  %v745_v5 = vadd.f32 %v713_v56, %v549_v62  ;;  %v2837_v56 = vmov 0.0  }
 0x264   :  { %v714_v48 = vmul.f32 %v3492_v58, %v665_v33  ;;  %2476 = vmatpush1.bf16.msra.mxu0 %v2475_v37  ;;  %v730_v33 = vadd.f32 %v698_v12, %v534_v32  ;;  %1967 = vmatprep.mubr.f32.mxu0 %v2837_v56  ;;  %v705_v12 = vmul.f32 %v3492_v58, %v3662_v8 }
 0x265   :  { %v4071_v57 = vmax.f32 %v1420_v60, %v1385_v30  ;;  %v1390_v25 = vmax.f32 %v1358_v7, 0.0  ;;  %2478 = vmatprep.subr.bf16.mxu0 %v2477_v10  ;;  %v2483_v30 = vpack.c.bf16 %v1885_v63, %v1883_v15  ;;  %v1888_v60 = vld [vmem:[%s4474_s9 + $0xe8] sm:$0xff]  ;;  %v1887_v7 = vld [vmem:[%s4474_s9 + $0xe0] sm:$0xff]  ;;  %v4647_v10 = vld [vmem:[#allocation71_spill] sm:$0xff] }
 0x266   :  { %v4083_v49 = vadd.f32 %v714_v48, %v550_v54  ;;  %v2485_v37 = vpack.c.bf16 %v1890_v28, %v1888_v60  ;;  %v4127_v54 = vpop.permute.xlu0 %1204  ;;  %v2487_v62 = vpack.c.bf16 %v1889_v39, %v1887_v7  ;;  %v926_v1 = vadd.f32 %v894_v11, %v730_v33  ;;  %v1702_v63 = vld [vmem:[#allocation5 + $0x8] sm:$0xff]  ;;  %v1701_v60 = vld [vmem:[#allocation5] sm:$0xff]  ;;  %v4649_v28 = vld [vmem:[#allocation48_spill] sm:$0xff] }
 0x267   :  { %v4093_v52 = vmax.f32 %v1390_v25, %v1391_v36  ;;  %v4644_v36 = vld [vmem:[#allocation35_spill] sm:$0xff]  ;;  %v509_v6 = vmul.f32 %v3483_v42, %v4647_v10  ;;  %v901_v11 = vmul.f32 %v3510_v17, %v3835_v43  ;;  %v4650_v7 = vld [vmem:[#allocation76_spill] sm:$0xff] }
 0x268   :  { %v857_v29 = vpop.permute.xlu1 %856  ;;  %2480 = vmatpush1.bf16.msra.mxu0 %v2479_v59  ;;  %v516_v25 = vmul.f32 %v3483_v42, %v4644_v36  ;;  %v704_v33 = vmul.f32 %v3492_v58, %v4650_v7  ;;  %v1703_v43 = vld [vmem:[#allocation5 + $0x10] sm:$0xff]  ;;  %v1708_v36 = vld [vmem:[#allocation5 + $0x38] sm:$0xff]  ;;  %v4651_v7 = vld [vmem:[#allocation21_spill] sm:$0xff] }
 0x269   :  { %v909_v3 = vmul.f32 %v3510_v17, %v857_v29  ;;  %2482 = vmatprep.subr.bf16.mxu0 %v2481_v44  ;;  %v541_v13 = vadd.f32 %v509_v6, %v313_v23  ;;  %v508_v44 = vmul.f32 %v3483_v42, %v4648_v22  ;;  %v900_v6 = vmul.f32 %v3510_v17, %v3672_v0  ;;  %v1710_v22 = vld [vmem:[#allocation5 + $0x48] sm:$0xff] }
 0x26a   :  { %v4147_v32 = vpop.permute.xlu0 %1260 }
 0x26b   :  { %v4112_v18 = vadd.f32 %v909_v3, %v745_v5  ;;  %v548_v5 = vadd.f32 %v516_v25, %v320_v4  ;;  %v908_v3 = vmul.f32 %v3510_v17, %v3844_v34  ;;  %v312_v34 = vmul.f32 %v3489_v38, %v4649_v28  ;;  %v1711_v28 = vld [vmem:[#allocation5 + $0x50] sm:$0xff] }
 0x26c   :  { %2484 = vmatpush1.bf16.msra.mxu0 %v2483_v30  ;;  %v1704_v30 = vld [vmem:[#allocation5 + $0x18] sm:$0xff] }
 0x26d   :  { %v993_v48 = vpop.permute.xlu1 %992  ;;  %2486 = vmatprep.subr.bf16.mxu0 %v2485_v37  ;;  %v744_v15 = vadd.f32 %v712_v14, %v548_v5  ;;  %v737_v37 = vadd.f32 %v705_v12, %v541_v13  ;;  %v540_v10 = vadd.f32 %v508_v44, %v312_v34  ;;  %v1712_v44 = vld [vmem:[#allocation5 + $0x58] sm:$0xff]  ;;  %v1714_v34 = vld [vmem:[#allocation5 + $0x68] sm:$0xff] }
 0x26e   :  { %v1090_v26 = vmul.f32 %v3593_v31, %v993_v48  ;;  %v2393_v48 = vpack.c.bf16 %v1704_v30, %v1702_v63  ;;  %v1221_v5 = vpop.permute.xlu0 %1220 }
 0x26f   :  { %v940_v25 = vadd.f32 %v908_v3, %v744_v15  ;;  %v933_v23 = vadd.f32 %v901_v11, %v737_v37  ;;  %v736_v3 = vadd.f32 %v704_v33, %v540_v10  ;;  %v1096_v11 = vmul.f32 %v3593_v31, %v3871_v20  ;;  %v1709_v15 = vld [vmem:[#allocation5 + $0x40] sm:$0xff]  ;;  %v4652_v37 = vld [vmem:[#allocation86_spill] sm:$0xff] }
 0x270   :  { %v4140_v59 = vadd.f32 %v1090_v26, %v926_v1  ;;  %2488 = vmatpush1.bf16.msra.mxu0 %v2487_v62  ;;  %v1706_v62 = vld [vmem:[#allocation5 + $0x28] sm:$0xff]  ;;  %v1705_v1 = vld [vmem:[#allocation5 + $0x20] sm:$0xff]  ;;  %v1707_v26 = vld [vmem:[#allocation5 + $0x30] sm:$0xff]  ;;  %2394 = vmatprep.subr.bf16.mxu1 %v2393_v48  ;;  %v1294_v30 = vmul.f32 %v3743_v2, %v1221_v5  ;;  %v2405_v48 = vpack.c.bf16 %v1716_v24, %v1714_v34 }
 0x271   :  { %v1045_v29 = vpop.permute.xlu1 %1044  ;;  %v2397_v4 = vpack.c.bf16 %v1708_v36, %v1706_v62  ;;  %v2399_v12 = vpack.c.bf16 %v1707_v26, %v1705_v1  ;;  %v1129_v13 = vadd.f32 %v1097_v16, %v933_v23  ;;  %v932_v63 = vadd.f32 %v900_v6, %v736_v3  ;;  %v1715_v62 = vld [vmem:[#allocation5 + $0x70] sm:$0xff] }
 0x272   :  { %v1103_v46 = vmul.f32 %v3593_v31, %v1045_v29  ;;  %v1098_v29 = vmul.f32 %v3593_v31, %v3703_v47  ;;  %v318_v47 = vmul.f32 %v3489_v38, %v3682_v9  ;;  %v4653_v36 = vld [vmem:[#allocation39_spill] sm:$0xff]  ;;  %v1718_v9 = vld [vmem:[#allocation5 + $0x88] sm:$0xff] }
 0x273   :  { %v1128_v1 = vadd.f32 %v1096_v11, %v932_v63  ;;  %v4654_v16 = vld [vmem:[#allocation67_spill] sm:$0xff]  ;;  %v1724_v11 = vld [vmem:[#allocation5 + $0xb8] sm:$0xff] }
 0x274   :  { %v4154_v8 = vadd.f32 %v1103_v46, %v3552_v55  ;;  %v2395_v55 = vpack.c.bf16 %v1703_v43, %v1701_v60  ;;  %v2401_v60 = vpack.c.bf16 %v1712_v44, %v1710_v22  ;;  %v1130_v33 = vadd.f32 %v1098_v29, %v4651_v7  ;;  %v1713_v43 = vld [vmem:[#allocation5 + $0x60] sm:$0xff]  ;;  %v4655_v22 = vld [vmem:[#allocation88_spill] sm:$0xff] }
 0x275   :  { %v1049_v39 = vpop.permute.xlu1 %1048  ;;  %v710_v23 = vmul.f32 %v3492_v58, %v4654_v16  ;;  %v2407_v6 = vpack.c.bf16 %v1715_v62, %v1713_v43  ;;  %v4656_v44 = vld [vmem:[#allocation20_spill] sm:$0xff] }
 0x276   :  { %v1104_v61 = vmul.f32 %v3593_v31, %v1049_v39  ;;  %2396 = vmatpush1.bf16.msra.mxu1 %v2395_v55  ;;  %v2403_v39 = vpack.c.bf16 %v1711_v28, %v1709_v15  ;;  %v1720_v55 = vld [vmem:[#allocation5 + $0x98] sm:$0xff]  ;;  %v325_v15 = vmul.f32 %v3489_v38, %v4656_v44 }
 0x277   :  { %2398 = vmatprep.subr.bf16.mxu1 %v2397_v4  ;;  %v1325_v4 = vadd.f32 %v1293_v50, %v1129_v13  ;;  %v2409_v3 = vpack.c.bf16 %v1720_v55, %v1718_v9  ;;  %v521_v50 = vmul.f32 %v3483_v42, %v4655_v22  ;;  %v1722_v13 = vld [vmem:[#allocation5 + $0xa8] sm:$0xff]  ;;  %v1732_v22 = vld [vmem:[#allocation5 + $0xf8] sm:$0xff] }
 0x278   :  { %v4165_v14 = vadd.f32 %v1104_v61, %v940_v25  ;;  %v514_v25 = vmul.f32 %v3483_v42, %v4653_v36  ;;  %v1726_v36 = vld [vmem:[#allocation5 + $0xc8] sm:$0xff] }
 0x279   :  { %v1364_v63 = vadd.f32 %v3772_v27, %v1325_v4  ;;  %v553_v43 = vadd.f32 %v521_v50, %v325_v15  ;;  %v4659_v50 = vld [vmem:[#allocation52_spill] sm:$0xff]  ;;  %v4661_v15 = vld [vmem:[#allocation90_spill] sm:$0xff] }
 0x27a   :  { %v1209_v46 = vpop.permute.xlu1 %1208  ;;  %2400 = vmatpush1.bf16.msra.mxu1 %v2399_v12  ;;  %v546_v10 = vadd.f32 %v514_v25, %v318_v47  ;;  %v1326_v12 = vadd.f32 %v1294_v30, %v1130_v33  ;;  %v1728_v25 = vld [vmem:[#allocation5 + $0xd8] sm:$0xff] }
 0x27b   :  { %v1291_v0 = vmul.f32 %v3743_v2, %v1209_v46  ;;  %2402 = vmatprep.subr.bf16.mxu1 %v2401_v60  ;;  %v1717_v46 = vld [vmem:[#allocation5 + $0x80] sm:$0xff]  ;;  %v717_v60 = vmul.f32 %v3492_v58, %v3903_v19 }
 0x27c   :  { %v742_v28 = vadd.f32 %v710_v23, %v546_v10  ;;  %v1365_v7 = vadd.f32 %v3772_v27, %v1326_v12  ;;  %v1725_v12 = vld [vmem:[#allocation5 + $0xc0] sm:$0xff] }
 0x27d   :  { %v1323_v20 = vadd.f32 %v1291_v0, %v4652_v37  ;;  %v1719_v0 = vld [vmem:[#allocation5 + $0x90] sm:$0xff]  ;;  %v749_v55 = vadd.f32 %v717_v60, %v553_v43  ;;  %v4662_v43 = vld [vmem:[#allocation85_spill] sm:$0xff] }
 0x27e   :  { %v1213_v61 = vpop.permute.xlu1 %1212  ;;  %2404 = vmatpush1.bf16.msra.mxu1 %v2403_v39  ;;  %v2411_v24 = vpack.c.bf16 %v1719_v0, %v1717_v46  ;;  %v1721_v39 = vld [vmem:[#allocation5 + $0xa0] sm:$0xff]  ;;  %v1397_v23 = vmax.f32 %v1365_v7, 0.0  ;;  %v1730_v0 = vld [vmem:[#allocation5 + $0xe8] sm:$0xff] }
 0x27f   :  { %v1292_v26 = vmul.f32 %v3743_v2, %v1213_v61  ;;  %v1362_v29 = vadd.f32 %v3772_v27, %v1323_v20  ;;  %2406 = vmatprep.subr.bf16.mxu1 %v2405_v48  ;;  %v2413_v20 = vpack.c.bf16 %v1724_v11, %v1722_v13  ;;  %v1723_v48 = vld [vmem:[#allocation5 + $0xb0] sm:$0xff]  ;;  %v1396_v61 = vmax.f32 %v1364_v63, 0.0  ;;  %v4660_v11 = vld [vmem:[#allocation77_spill] sm:$0xff] }
 0x280   :  { %v316_v13 = vmul.f32 %v3489_v38, %v4659_v50  ;;  %v310_v44 = vmul.f32 %v3489_v38, %v4660_v11  ;;  %v702_v63 = vmul.f32 %v3492_v58, %v4661_v15  ;;  %v2421_v7 = vpack.c.bf16 %v1732_v22, %v1730_v0  ;;  %v4668_v0 = vld [vmem:[#allocation84_spill] sm:$0xff]  ;;  %v1738_v50 = vld [vmem:[#allocation5 + $0x128] sm:$0xff] }
 0x281   :  { %v1324_v5 = vadd.f32 %v1292_v26, %v1128_v1  ;;  %v1394_v33 = vmax.f32 %v1362_v29, 0.0  ;;  %v2415_v1 = vpack.c.bf16 %v1723_v48, %v1721_v39  ;;  %v4657_v26 = vld [vmem:[#allocation81_spill] sm:$0xff]  ;;  %v1727_v29 = vld [vmem:[#allocation5 + $0xd0] sm:$0xff]  ;;  %v1736_v39 = vld [vmem:[#allocation5 + $0x118] sm:$0xff]  ;;  %v701_v22 = vmul.f32 %v3492_v58, %v4668_v0 }
 0x282   :  { %2408 = vmatpush1.bf16.msra.mxu1 %v2407_v6  ;;  %v506_v16 = vmul.f32 %v3483_v42, %v4657_v26  ;;  %v2417_v6 = vpack.c.bf16 %v1728_v25, %v1726_v36  ;;  %v2419_v60 = vpack.c.bf16 %v1727_v29, %v1725_v12  ;;  %v708_v36 = vmul.f32 %v3492_v58, %v4662_v43  ;;  %v1733_v12 = vld [vmem:[#allocation5 + $0x100] sm:$0xff]  ;;  %v1735_v29 = vld [vmem:[#allocation5 + $0x110] sm:$0xff]  ;;  %v1746_v0 = vld [vmem:[#allocation5 + $0x168] sm:$0xff] }
 0x283   :  { %v1363_v47 = vadd.f32 %v3772_v27, %v1324_v5  ;;  %v845_v30 = vpop.permute.xlu1 %844  ;;  %2410 = vmatprep.subr.bf16.mxu1 %v2409_v3  ;;  %v4658_v5 = vld [vmem:[#allocation32_spill] sm:$0xff] }
 0x284   :  { %v906_v34 = vmul.f32 %v3510_v17, %v845_v30  ;;  %v512_v3 = vmul.f32 %v3483_v42, %v4658_v5  ;;  %v4667_v5 = vld [vmem:[#allocation56_spill] sm:$0xff] }
 0x285   :  { %v1395_v37 = vmax.f32 %v1363_v47, 0.0 }
 0x286   :  { %v4195_v62 = vadd.f32 %v906_v34, %v742_v28  ;;  %2412 = vmatpush1.bf16.msra.mxu1 %v2411_v24  ;;  %v538_v28 = vadd.f32 %v506_v16, %v310_v44  ;;  %v898_v34 = vmul.f32 %v3510_v17, %v3908_v51  ;;  %v544_v48 = vadd.f32 %v512_v3, %v316_v13  ;;  %v4666_v16 = vld [vmem:[#allocation94_spill] sm:$0xff]  ;;  %v1740_v13 = vld [vmem:[#allocation5 + $0x138] sm:$0xff] }
 0x287   :  { %v1446_v19 = vmax.f32 %v1394_v33, %v1395_v37  ;;  %v873_v9 = vpop.permute.xlu1 %872  ;;  %2414 = vmatprep.subr.bf16.mxu1 %v2413_v20  ;;  %v1729_v33 = vld [vmem:[#allocation5 + $0xe0] sm:$0xff]  ;;  %v1731_v37 = vld [vmem:[#allocation5 + $0xf0] sm:$0xff]  ;;  %v1734_v20 = vld [vmem:[#allocation5 + $0x108] sm:$0xff]  ;;  %v309_v3 = vmul.f32 %v3489_v38, %v4667_v5  ;;  %v1100_v44 = vmul.f32 %v3593_v31, %v3981_v53  ;;  %v1093_v53 = vmul.f32 %v3593_v31, %v3955_v21 }
 0x288   :  { %v913_v4 = vmul.f32 %v3510_v17, %v873_v9  ;;  %v734_v25 = vadd.f32 %v702_v63, %v538_v28  ;;  %v4664_v9 = vld [vmem:[#allocation60_spill] sm:$0xff]  ;;  %v740_v11 = vadd.f32 %v708_v36, %v544_v48  ;;  %v4669_v63 = vld [vmem:[#allocation19_spill] sm:$0xff]  ;;  %v1422_v48 = vrot.slane %v4071_v57, 4  ;;  %v1742_v36 = vld [vmem:[#allocation5 + $0x148] sm:$0xff] }
 0x289   :  { %v1447_v10 = vmax.f32 %v1446_v19, %v1396_v61  ;;  %v4663_v61 = vld [vmem:[#allocation80_spill] sm:$0xff] }
 0x28a   :  { %v4202_v46 = vadd.f32 %v913_v4, %v749_v55  ;;  %2416 = vmatpush1.bf16.msra.mxu1 %v2415_v1  ;;  %v505_v55 = vmul.f32 %v3483_v42, %v4664_v9  ;;  %v2423_v4 = vpack.c.bf16 %v1731_v37, %v1729_v33  ;;  %v4665_v1 = vld [vmem:[#allocation41_spill] sm:$0xff]  ;;  %v2429_v33 = vpack.c.bf16 %v1740_v13, %v1738_v50 }
 0x28b   :  { %v4210_v47 = vmax.f32 %v1447_v10, %v1397_v23  ;;  %2418 = vmatprep.subr.bf16.mxu1 %v2417_v6  ;;  %v1094_v26 = vmul.f32 %v3593_v31, %v4665_v1  ;;  %v904_v23 = vmul.f32 %v3510_v17, %v4666_v16  ;;  %v930_v10 = vadd.f32 %v898_v34, %v734_v25  ;;  %v1737_v37 = vld [vmem:[#allocation5 + $0x120] sm:$0xff]  ;;  %v1744_v25 = vld [vmem:[#allocation5 + $0x158] sm:$0xff] }
 0x28c   :  { %v1037_v30 = vpop.permute.xlu1 %1036  ;;  %v2425_v6 = vpack.c.bf16 %v1736_v39, %v1734_v20  ;;  %v537_v15 = vadd.f32 %v505_v55, %v309_v3  ;;  %v1290_v34 = vmul.f32 %v3743_v2, %v4127_v54  ;;  %v1739_v20 = vld [vmem:[#allocation5 + $0x130] sm:$0xff]  ;;  %v1423_v5 = vmax.f32 %v4071_v57, %v1422_v48 }
 0x28d   :  { %v1101_v24 = vmul.f32 %v3593_v31, %v1037_v30  ;;  %v897_v30 = vmul.f32 %v3510_v17, %v4669_v63  ;;  %v936_v28 = vadd.f32 %v904_v23, %v740_v11  ;;  %v4670_v55 = vld [vmem:[#allocation87_spill] sm:$0xff]  ;;  %v2431_v1 = vpack.c.bf16 %v1739_v20, %v1737_v37 }
 0x28e   :  { %2420 = vmatpush1.bf16.msra.mxu1 %v2419_v60  ;;  %v2427_v60 = vpack.c.bf16 %v1735_v29, %v1733_v12  ;;  %v733_v39 = vadd.f32 %v701_v22, %v537_v15  ;;  %v1743_v12 = vld [vmem:[#allocation5 + $0x150] sm:$0xff]  ;;  %v1748_v22 = vld [vmem:[#allocation5 + $0x178] sm:$0xff]  ;;  %v4672_v15 = vld [vmem:[#allocation78_spill] sm:$0xff] }
 0x28f   :  { %v4218_v19 = vadd.f32 %v1101_v24, %v4663_v61  ;;  %2422 = vmatprep.subr.bf16.mxu1 %v2421_v7  ;;  %v1126_v24 = vadd.f32 %v1094_v26, %v930_v10  ;;  %v1296_v61 = vmul.f32 %v3743_v2, %v4050_v40  ;;  %v1132_v54 = vadd.f32 %v1100_v44, %v936_v28  ;;  %v4671_v26 = vld [vmem:[#allocation37_spill] sm:$0xff]  ;;  %v1747_v57 = vld [vmem:[#allocation5 + $0x170] sm:$0xff] }
 0x290   :  { %v4222_v51 = vpop.permute.xlu1 %1060  ;;  %v929_v9 = vadd.f32 %v897_v30, %v733_v39  ;;  %v1099_v16 = vmul.f32 %v3593_v31, %v4671_v26  ;;  %v2433_v10 = vpack.c.bf16 %v1744_v25, %v1742_v36  ;;  %v2437_v28 = vpack.c.bf16 %v1748_v22, %v1746_v0  ;;  %v1750_v39 = vld [vmem:[#allocation5 + $0x188] sm:$0xff]  ;;  %v1755_v22 = vld [vmem:[#allocation5 + $0x1b0] sm:$0xff] }
 0x291   :  { %v1322_v23 = vadd.f32 %v1290_v34, %v1126_v24  ;;  %v1328_v50 = vadd.f32 %v1296_v61, %v1132_v54  ;;  %v1745_v34 = vld [vmem:[#allocation5 + $0x160] sm:$0xff]  ;;  %v1424_v24 = vrot.slane %v1423_v5, 2 }
 0x292   :  { %2424 = vmatpush1.bf16.msra.mxu1 %v2423_v4  ;;  %v1125_v29 = vadd.f32 %v1093_v53, %v929_v9  ;;  %v1131_v63 = vadd.f32 %v1099_v16, %v4672_v15  ;;  %v1752_v53 = vld [vmem:[#allocation5 + $0x198] sm:$0xff]  ;;  %v2439_v61 = vpack.c.bf16 %v1747_v57, %v1745_v34  ;;  %v1757_v34 = vld [vmem:[#allocation5 + $0x1c0] sm:$0xff]  ;;  %v1759_v57 = vld [vmem:[#allocation5 + $0x1d0] sm:$0xff] }
 0x293   :  { %2426 = vmatprep.subr.bf16.mxu1 %v2425_v6  ;;  %v1741_v6 = vld [vmem:[#allocation5 + $0x140] sm:$0xff]  ;;  %v1361_v30 = vadd.f32 %v3772_v27, %v1322_v23  ;;  %v1367_v48 = vadd.f32 %v3772_v27, %v1328_v50  ;;  %v2441_v9 = vpack.c.bf16 %v1752_v53, %v1750_v39  ;;  %v1760_v15 = vld [vmem:[#allocation5 + $0x1d8] sm:$0xff]  ;;  %v2451_v53 = vpack.c.bf16 %v1759_v57, %v1757_v34 }
 0x294   :  { %v2435_v44 = vpack.c.bf16 %v1743_v12, %v1741_v6  ;;  %v4260_v23 = vld [vmem:[%s4469_s4] ss:$0 sm:$0xff]  ;;  %v1756_v6 = vld [vmem:[#allocation5 + $0x1b8] sm:$0xff] }
 0x295   :  { %v1157_v7 = vpop.permute.xlu1 %1156  ;;  %v1393_v54 = vmax.f32 %v1361_v30, 0.0  ;;  %v1399_v12 = vmax.f32 %v1367_v48, 0.0 }
 0x296   :  { %v1278_v43 = vmul.f32 %v3743_v2, %v1157_v7  ;;  %2428 = vmatpush1.bf16.msra.mxu1 %v2427_v60  ;;  %v4673_v7 = vld [vmem:[#allocation44_spill] sm:$0xff] }
 0x297   :  { %2430 = vmatprep.subr.bf16.mxu1 %v2429_v33 }
 0x298   :  { %v1310_v4 = vadd.f32 %v1278_v43, %v4670_v55  ;;  %v1749_v55 = vld [vmem:[#allocation5 + $0x180] sm:$0xff] }
 0x299   :  { %v1201_v21 = vpop.permute.xlu1 %1200 }
 0x29a   :  { %v1349_v40 = vadd.f32 %v3772_v27, %v1310_v4  ;;  %v1289_v3 = vmul.f32 %v3743_v2, %v1201_v21  ;;  %2432 = vmatpush1.bf16.msra.mxu1 %v2431_v1  ;;  %v1751_v4 = vld [vmem:[#allocation5 + $0x190] sm:$0xff]  ;;  %v1425_v1 = vmax.f32 %v1423_v5, %v1424_v24 }
 0x29b   :  { %2434 = vmatprep.subr.bf16.mxu1 %v2433_v10  ;;  %v1754_v10 = vld [vmem:[#allocation5 + $0x1a8] sm:$0xff]  ;;  %v2443_v5 = vpack.c.bf16 %v1751_v4, %v1749_v55 }
 0x29c   :  { %v1381_v13 = vmax.f32 %v1349_v40, 0.0  ;;  %v1321_v11 = vadd.f32 %v1289_v3, %v1125_v29  ;;  %v2445_v0 = vpack.c.bf16 %v1756_v6, %v1754_v10  ;;  %v1426_v50 = vrot.slane %v1425_v1, 1 }
 0x29d   :  { %v1225_v60 = vpop.permute.xlu1 %1224 }
 0x29e   :  { %v1412_v33 = vmax.f32 %v4673_v7, %v1381_v13  ;;  %v1360_v37 = vadd.f32 %v3772_v27, %v1321_v11  ;;  %v1295_v20 = vmul.f32 %v3743_v2, %v1225_v60  ;;  %2436 = vmatpush1.bf16.msra.mxu1 %v2435_v44  ;;  %v1758_v44 = vld [vmem:[#allocation5 + $0x1c8] sm:$0xff]  ;;  %v1427_v24 = vmax.f32 %v1425_v1, %v1426_v50 }
 0x29f   :  { %2438 = vmatprep.subr.bf16.mxu1 %v2437_v28  ;;  %v2449_v28 = vpack.c.bf16 %v1760_v15, %v1758_v44 }
 0x2a0   :  { %v1413_v43 = vrot.slane %v1412_v33, 4  ;;  %v1392_v36 = vmax.f32 %v1360_v37, 0.0  ;;  %v1327_v25 = vadd.f32 %v1295_v20, %v1131_v63  ;;  %v1764_v37 = vld [vmem:[#allocation5 + $0x1f8] sm:$0xff] }
 0x2a2   :  { %v1414_v26 = vmax.f32 %v1412_v33, %v1413_v43  ;;  %v1438_v16 = vmax.f32 %v4093_v52, %v1392_v36  ;;  %v1366_v27 = vadd.f32 %v4260_v23, %v1327_v25  ;;  %v4263_v21 = vpop.permute.xlu1 %860  ;;  %2440 = vmatpush1.bf16.msra.mxu1 %v2439_v61  ;;  %v1753_v52 = vld [vmem:[#allocation5 + $0x1a0] sm:$0xff]  ;;  %v1762_v33 = vld [vmem:[#allocation5 + $0x1e8] sm:$0xff]  ;;  %v1763_v25 = vld [vmem:[#allocation5 + $0x1f0] sm:$0xff] }
 0x2a3   :  { %2442 = vmatprep.subr.bf16.mxu1 %v2441_v9  ;;  %v2447_v60 = vpack.c.bf16 %v1755_v22, %v1753_v52  ;;  %v2453_v43 = vpack.c.bf16 %v1764_v37, %v1762_v33  ;;  %v1761_v36 = vld [vmem:[#allocation5 + $0x1e0] sm:$0xff]  ;;  %v4676_v22 = vld [vmem:[#allocation92_spill] sm:$0xff] }
 0x2a4   :  { %v1415_v29 = vrot.slane %v1414_v26, 2  ;;  %v1439_v40 = vmax.f32 %v1438_v16, %v1393_v54  ;;  %v1398_v3 = vmax.f32 %v1366_v27, 0.0  ;;  %v1449_v54 = vrot.slane %v4210_v47, 4 }
 0x2a5   :  { %v2455_v4 = vpack.c.bf16 %v1763_v25, %v1761_v36 }
 0x2a6   :  { %v1416_v13 = vmax.f32 %v1414_v26, %v1415_v29  ;;  %v4265_v11 = vmax.f32 %v1398_v3, %v1399_v12  ;;  %2444 = vmatpush1.bf16.msra.mxu1 %v2443_v5  ;;  %v1440_v61 = vrot.slane %v1439_v40, 4  ;;  %v1450_v27 = vmax.f32 %v4210_v47, %v1449_v54  ;;  %v4674_v12 = vld [vmem:[#allocation83_spill] sm:$0xff] }
 0x2a7   :  { %v4267_v63 = vpop.permute.xlu1 %1052  ;;  %2446 = vmatprep.subr.bf16.mxu1 %v2445_v0  ;;  %v520_v29 = vmul.f32 %v3483_v42, %v4674_v12  ;;  %v4675_v0 = vld [vmem:[#allocation79_spill] sm:$0xff] }
 0x2a8   :  { %v1417_v30 = vrot.slane %v1416_v13, 1  ;;  %v1441_v16 = vmax.f32 %v1439_v40, %v1440_v61  ;;  %v324_v52 = vmul.f32 %v3489_v38, %v4675_v0  ;;  %v716_v40 = vmul.f32 %v3492_v58, %v4676_v22 }
 0x2a9   :  { %v1451_v47 = vrot.slane %v1450_v27, 2 }
 0x2aa   :  { %v1418_v7 = vmax.f32 %v1416_v13, %v1417_v30  ;;  %2448 = vmatpush1.bf16.msra.mxu1 %v2447_v60  ;;  %v1442_v50 = vrot.slane %v1441_v16, 2  ;;  %v552_v15 = vadd.f32 %v520_v29, %v324_v52  ;;  %v912_v30 = vmul.f32 %v3510_v17, %v3915_v35 }
 0x2ab   :  { %2450 = vmatprep.subr.bf16.mxu1 %v2449_v28 }
 0x2ac   :  { %v1189_v20 = vpop.permute.xlu1 %1188  ;;  %v4269_v39 = vsel %vm1490_vm0, %v1427_v24, %v1418_v7  ;;  %v748_v34 = vadd.f32 %v716_v40, %v552_v15  ;;  %v1443_v57 = vmax.f32 %v1441_v16, %v1442_v50  ;;  %v1452_v24 = vmax.f32 %v1450_v27, %v1451_v47  ;;  %v1253_v15 = vpop.permute.xlu0 %1252 }
 0x2ad   :  { %v1286_v48 = vmul.f32 %v3743_v2, %v1189_v20  ;;  %v4677_v20 = vld [vmem:[#allocation54_spill] sm:$0xff] }
 0x2ae   :  { %2452 = vmatpush1.bf16.msra.mxu1 %v2451_v53  ;;  %v323_v53 = vmul.f32 %v3489_v38, %v4677_v20  ;;  %v944_v35 = vadd.f32 %v912_v30, %v748_v34  ;;  %v1304_v38 = vmul.f32 %v3743_v2, %v4147_v32 }
 0x2af   :  { %v1318_v9 = vadd.f32 %v1286_v48, %v4140_v59  ;;  %2454 = vmatprep.subr.bf16.mxu1 %v2453_v43  ;;  %v4678_v48 = vld [vmem:[#allocation82_spill] sm:$0xff]  ;;  %v4679_v43 = vld [vmem:[#allocation89_spill] sm:$0xff] }
 0x2b0   :  { %v1241_v55 = vpop.permute.xlu1 %1240  ;;  %v1108_v36 = vmul.f32 %v3593_v31, %v4679_v43  ;;  %v4682_v43 = vld [vmem:[#allocation73_spill] sm:$0xff] }
 0x2b1   :  { %v1357_v1 = vadd.f32 %v4260_v23, %v1318_v9  ;;  %v1299_v26 = vmul.f32 %v3743_v2, %v1241_v55  ;;  %v4680_v9 = vld [vmem:[#allocation91_spill] sm:$0xff] }
 0x2b2   :  { %2456 = vmatpush1.bf16.msra.mxu1 %v2455_v4  ;;  %v715_v55 = vmul.f32 %v3492_v58, %v4680_v9  ;;  %v1444_v4 = vrot.slane %v1443_v57, 1  ;;  %v1140_v27 = vadd.f32 %v1108_v36, %v944_v35  ;;  %v1107_v58 = vmul.f32 %v3593_v31, %v4222_v51 }
 0x2b3   :  { %v1389_v10 = vmax.f32 %v1357_v1, 0.0  ;;  %v1331_v6 = vadd.f32 %v1299_v26, %v4154_v8  ;;  %v1453_v26 = vrot.slane %v1452_v24, 1  ;;  %v910_v51 = vmul.f32 %v3510_v17, %v4263_v21 }
 0x2b4   :  { %v1245_v3 = vpop.permute.xlu1 %1244  ;;  %v1445_v12 = vmax.f32 %v1443_v57, %v1444_v4  ;;  %v1336_v52 = vadd.f32 %v1304_v38, %v1140_v27  ;;  %v1105_v57 = vmul.f32 %v3593_v31, %v4267_v63 }
 0x2b5   :  { %v1430_v59 = vmax.f32 %v3895_v45, %v1389_v10  ;;  %v1300_v5 = vmul.f32 %v3743_v2, %v1245_v3  ;;  %v1370_v8 = vadd.f32 %v4260_v23, %v1331_v6 }
 0x2b7   :  { %v1431_v13 = vrot.slane %v1430_v59, 4  ;;  %v1332_v44 = vadd.f32 %v1300_v5, %v4165_v14  ;;  %v1402_v33 = vmax.f32 %v1370_v8, 0.0  ;;  %v519_v14 = vmul.f32 %v3483_v42, %v4678_v48 }
 0x2b8   :  { %v911_v42 = vmul.f32 %v3510_v17, %v3912_v41  ;;  %v1375_v8 = vadd.f32 %v4260_v23, %v1336_v52  ;;  %v1302_v17 = vmul.f32 %v3743_v2, %v1253_v15 }
 0x2b9   :  { %v1432_v45 = vmax.f32 %v1430_v59, %v1431_v13  ;;  %v1371_v60 = vadd.f32 %v4260_v23, %v1332_v44  ;;  %v1041_v28 = vpop.permute.xlu1 %1040  ;;  %v551_v16 = vadd.f32 %v519_v14, %v323_v53  ;;  %v1454_v59 = vmax.f32 %v1452_v24, %v1453_v26  ;;  %v4681_v14 = vld [vmem:[#allocation74_spill] sm:$0xff] }
 0x2ba   :  { %v1137_v53 = vadd.f32 %v1105_v57, %v4112_v18 }
 0x2bb   :  { %v1433_v7 = vrot.slane %v1432_v45, 2  ;;  %v1403_v37 = vmax.f32 %v1371_v60, 0.0  ;;  %v747_v6 = vadd.f32 %v715_v55, %v551_v16  ;;  %v942_v60 = vadd.f32 %v910_v51, %v4083_v49 }
 0x2bc   :  { %v1102_v49 = vmul.f32 %v3593_v31, %v1041_v28 }
 0x2bd   :  { %v1434_v25 = vmax.f32 %v1432_v45, %v1433_v7  ;;  %v4297_v61 = vmax.f32 %v1402_v33, %v1403_v37  ;;  %v1069_v54 = vpop.permute.xlu1 %1068  ;;  %v943_v0 = vadd.f32 %v911_v42, %v747_v6  ;;  %v1407_v7 = vmax.f32 %v1375_v8, 0.0  ;;  %v1572_v33 = vld [vmem:[%s4471_s6] sm:$0x3] }
 0x2be   :  { %v1577_v63 = vrot.slane %v1572_v33, %v4681_v14  ;;  %v1581_v36 = vrot.slane %v1572_v33, %v4682_v43  ;;  %v4683_v42 = vld [vmem:[#allocation93_spill] sm:$0xff] }
 0x2bf   :  { %v1435_v1 = vrot.slane %v1434_v25, 1  ;;  %v1139_v50 = vadd.f32 %v1107_v58, %v943_v0  ;;  %v1110_v27 = vmul.f32 %v3593_v31, %v4683_v42 }
 0x2c1   :  { %v1436_v10 = vmax.f32 %v1434_v25, %v1435_v1  ;;  %v1109_v25 = vmul.f32 %v3593_v31, %v1069_v54  ;;  %v1134_v1 = vadd.f32 %v1102_v49, %v4195_v62 }
 0x2c2   :  { %v1233_v29 = vpop.permute.xlu1 %1232 }
 0x2c3   :  { %v1297_v3 = vmul.f32 %v3743_v2, %v1233_v29  ;;  %v1493_v5 = vsel %vm1492_vm1, %v1436_v10, %v4269_v39 }
 0x2c4   :  { %v1495_v32 = vsel %vm1494_vm2, %v1445_v12, %v1493_v5  ;;  %v1141_v12 = vadd.f32 %v1109_v25, %v4202_v46 }
 0x2c5   :  { %v1329_v41 = vadd.f32 %v1297_v3, %v4218_v19  ;;  %v4310_v22 = vsel %vm1496_vm3, %v1454_v59, %v1495_v32 }
 0x2c6   :  { %v1257_v40 = vpop.permute.xlu1 %1256 }
 0x2c7   :  { %v1368_v47 = vadd.f32 %v4260_v23, %v1329_v41  ;;  %v1303_v13 = vmul.f32 %v3743_v2, %v1257_v40 }
 0x2c9   :  { %v1400_v44 = vmax.f32 %v1368_v47, 0.0  ;;  %v1335_v39 = vadd.f32 %v1303_v13, %v1139_v50  ;;  %v4684_v13 = vld [vmem:[#allocation23_spill] sm:$0xff] }
 0x2ca   :  { %v1142_v46 = vadd.f32 %v1110_v27, %v4684_v13 }
 0x2cb   :  { %v1456_v30 = vmax.f32 %v4265_v11, %v1400_v44  ;;  %v1374_v19 = vadd.f32 %v4260_v23, %v1335_v39  ;;  %v1057_v45 = vpop.permute.xlu1 %1056 }
 0x2cc   :  { %v1106_v34 = vmul.f32 %v3593_v31, %v1057_v45 }
 0x2cd   :  { %v1406_v24 = vmax.f32 %v1374_v19, 0.0 }
 0x2ce   :  { %v1138_v21 = vadd.f32 %v1106_v34, %v942_v60 }
 0x2cf   :  { %v1473_v11 = vmax.f32 %v1406_v24, %v1407_v7 }
 0x2d0   :  { %v1334_v37 = vadd.f32 %v1302_v17, %v1138_v21  ;;  %v1249_v20 = vpop.permute.xlu1 %1248 }
 0x2d1   :  { %v1301_v48 = vmul.f32 %v3743_v2, %v1249_v20 }
 0x2d2   :  { %v1373_v9 = vadd.f32 %v4260_v23, %v1334_v37 }
 0x2d3   :  { %v1333_v35 = vadd.f32 %v1301_v48, %v1137_v53  ;;  %v1650_v4 = vpop.f32.mrb[0].mxu0 }
 0x2d4   :  { %v1237_v55 = vpop.permute.xlu1 %1236  ;;  %v1651_v26 = vadd.f32 %v1650_v4, %v1577_v63  ;;  %v1652_v16 = vpop.f32.mrb[1].mxu0  ;;  %v1405_v29 = vmax.f32 %v1373_v9, 0.0 }
 0x2d5   :  { %v1372_v18 = vadd.f32 %v4260_v23, %v1333_v35  ;;  %v1298_v28 = vmul.f32 %v3743_v2, %v1237_v55  ;;  %v1653_v38 = vadd.f32 %v1652_v16, %v1581_v36 }
 0x2d6   :  { %v1656_v54 = vsel %vm1655_vm4, %v1651_v26, 0.0 }
 0x2d7   :  { %v1404_v10 = vmax.f32 %v1372_v18, 0.0  ;;  %v1330_v6 = vadd.f32 %v1298_v28, %v1134_v1  ;;  %v1657_v3 = vrot.slane %v1656_v54, 4  ;;  %v1663_v62 = vsel %vm1655_vm4, %v1653_v38, 0.0 }
 0x2d8   :  { %v1265_v58 = vpop.permute.xlu1 %1264  ;;  %v1664_v0 = vrot.slane %v1663_v62, 4 }
 0x2d9   :  { %v1465_v59 = vmax.f32 %v4297_v61, %v1404_v10  ;;  %v1369_v5 = vadd.f32 %v4260_v23, %v1330_v6  ;;  %v1305_v32 = vmul.f32 %v3743_v2, %v1265_v58  ;;  %v1658_v52 = vadd.f32 %v1657_v3, %v1656_v54 }
 0x2da   :  { %v1665_v50 = vadd.f32 %v1664_v0, %v1663_v62 }
 0x2db   :  { %v1466_v31 = vmax.f32 %v1465_v59, %v1405_v29  ;;  %v1401_v41 = vmax.f32 %v1369_v5, 0.0  ;;  %v1337_v40 = vadd.f32 %v1305_v32, %v1141_v12  ;;  %v1659_v51 = vrot.slane %v1658_v52, 2 }
 0x2dc   :  { %v1269_v47 = vpop.permute.xlu1 %1268  ;;  %v1666_v19 = vrot.slane %v1665_v50, 2 }
 0x2dd   :  { %v1467_v8 = vrot.slane %v1466_v31, 4  ;;  %v1457_v44 = vmax.f32 %v1456_v30, %v1401_v41  ;;  %v1376_v39 = vadd.f32 %v4260_v23, %v1337_v40  ;;  %v1306_v61 = vmul.f32 %v3743_v2, %v1269_v47 }
 0x2de   :  { %v1660_v15 = vadd.f32 %v1659_v51, %v1658_v52  ;;  %v1667_v7 = vadd.f32 %v1666_v19, %v1665_v50 }
 0x2df   :  { %v1468_v45 = vmax.f32 %v1466_v31, %v1467_v8  ;;  %v1458_v60 = vrot.slane %v1457_v44, 4  ;;  %v1408_v34 = vmax.f32 %v1376_v39, 0.0  ;;  %v1338_v57 = vadd.f32 %v1306_v61, %v1142_v46 }
 0x2e0   :  { %v1661_v24 = vrot.slane %v1660_v15, 1  ;;  %v1668_v53 = vrot.slane %v1667_v7, 1 }
 0x2e1   :  { %v1469_v17 = vrot.slane %v1468_v45, 2  ;;  %v1459_v21 = vmax.f32 %v1457_v44, %v1458_v60  ;;  %v1474_v33 = vmax.f32 %v1473_v11, %v1408_v34  ;;  %v1377_v37 = vadd.f32 %v4260_v23, %v1338_v57 }
 0x2e2   :  { %v1662_v20 = vadd.f32 %v1661_v24, %v1660_v15  ;;  %v1669_v2 = vadd.f32 %v1668_v53, %v1667_v7  ;;  %v2024_v53 = vld [vmem:[#allocation7 + $0x18] sm:$0xff] }
 0x2e3   :  { %v1460_v30 = vrot.slane %v1459_v21, 2  ;;  %v1409_v49 = vmax.f32 %v1377_v37, 0.0  ;;  %v1470_v48 = vmax.f32 %v1468_v45, %v1469_v17  ;;  %v1891_v45 = vld [vmem:[%s4475_s10] sm:$0x3] }
 0x2e4   :  { %v1671_v63 = vmul.f32 0.5, %v1662_v20  ;;  %v1672_v55 = vmul.f32 0.5, %v1669_v2  ;;  %v1896_v60 = vrot.slane %v1891_v45, %v4681_v14  ;;  %v1900_v34 = vrot.slane %v1891_v45, %v4682_v43  ;;  %v2022_v20 = vld [vmem:[#allocation7 + $0x8] sm:$0xff]  ;;  %v2028_v2 = vld [vmem:[#allocation7 + $0x38] sm:$0xff]  ;;  %v2053_v45 = vld [vmem:[#allocation7 + $0x100] sm:$0xff] }
 0x2e5   :  { %v1461_v36 = vmax.f32 %v1459_v21, %v1460_v30  ;;  %v1475_v35 = vmax.f32 %v1474_v33, %v1409_v49  ;;  %v1471_v25 = vrot.slane %v1470_v48, 1  ;;  %v2021_v30 = vld [vmem:[#allocation7] sm:$0xff]  ;;  %v2489_v49 = vpack.c.bf16 %v2024_v53, %v2022_v20  ;;  %v2059_v53 = vld [vmem:[#allocation7 + $0x130] sm:$0xff] }
 0x2e6   :  { %v1673_v9 = vsub.f32 %v1651_v26, %v1671_v63  ;;  %v1674_v28 = vsub.f32 %v1653_v38, %v1672_v55  ;;  %v2026_v63 = vld [vmem:[#allocation7 + $0x28] sm:$0xff]  ;;  %v2057_v20 = vld [vmem:[#allocation7 + $0x120] sm:$0xff] }
 0x2e7   :  { %v1462_v4 = vrot.slane %v1461_v36, 1  ;;  %v1476_v1 = vrot.slane %v1475_v35, 4  ;;  %v1472_v23 = vmax.f32 %v1470_v48, %v1471_v25  ;;  %v2023_v48 = vld [vmem:[#allocation7 + $0x10] sm:$0xff]  ;;  %v2025_v25 = vld [vmem:[#allocation7 + $0x20] sm:$0xff]  ;;  %v2030_v55 = vld [vmem:[#allocation7 + $0x48] sm:$0xff]  ;;  %2490 = vmatprep.subr.bf16.mxu1 %v2489_v49 }
 0x2e8   :  { %v1675_v18 = vmul.f32 %v1673_v9, %v1673_v9  ;;  %v1676_v27 = vmul.f32 %v1674_v28, %v1674_v28  ;;  %v1765_v49 = vld [vmem:[%s4473_s8] sm:$0x3] }
 0x2e9   :  { %v1477_v11 = vmax.f32 %v1475_v35, %v1476_v1  ;;  %v1463_v16 = vmax.f32 %v1461_v36, %v1462_v4  ;;  %v2491_v36 = vpack.c.bf16 %v2023_v48, %v2021_v30  ;;  %v2493_v35 = vpack.c.bf16 %v2028_v2, %v2026_v63  ;;  %v2032_v4 = vld [vmem:[#allocation7 + $0x58] sm:$0xff] }
 0x2ea   :  { %v1677_v42 = vsel %vm1655_vm4, %v1675_v18, 0.0  ;;  %v1684_v26 = vsel %vm1655_vm4, %v1676_v27, 0.0  ;;  %v2497_v18 = vpack.c.bf16 %v2032_v4, %v2030_v55  ;;  %v2527_v30 = vpack.c.bf16 %v2059_v53, %v2057_v20  ;;  %v2005_v20 = vld [vmem:[%s4477_s12] sm:$0x3] }
 0x2eb   :  { %v1478_v10 = vrot.slane %v1477_v11, 2  ;;  %v1499_v6 = vsel %vm1498_vm5, %v1463_v16, %v4310_v22  ;;  %v1678_v54 = vrot.slane %v1677_v42, 4  ;;  %v1685_v3 = vrot.slane %v1684_v26, 4  ;;  %v2034_v16 = vld [vmem:[#allocation7 + $0x68] sm:$0xff] }
 0x2ec   :  { %v1501_v12 = vsel %vm1500_vm6, %v1472_v23, %v1499_v6  ;;  %v2036_v23 = vld [vmem:[#allocation7 + $0x78] sm:$0xff]  ;;  %v2035_v6 = vld [vmem:[#allocation7 + $0x70] sm:$0xff]  ;;  %v1770_v48 = vrot.slane %v1765_v49, %v4681_v14  ;;  %v1774_v63 = vrot.slane %v1765_v49, %v4682_v43 }
 0x2ed   :  { %v1479_v29 = vmax.f32 %v1477_v11, %v1478_v10  ;;  %v1679_v58 = vadd.f32 %v1678_v54, %v1677_v42  ;;  %v1686_v38 = vadd.f32 %v1685_v3, %v1684_v26  ;;  %v2031_v11 = vld [vmem:[#allocation7 + $0x50] sm:$0xff]  ;;  %v2501_v27 = vpack.c.bf16 %v2036_v23, %v2034_v16  ;;  %v2033_v10 = vld [vmem:[#allocation7 + $0x60] sm:$0xff]  ;;  %v2038_v54 = vld [vmem:[#allocation7 + $0x88] sm:$0xff] }
 0x2ee   :  { %v2503_v26 = vpack.c.bf16 %v2035_v6, %v2033_v10  ;;  %v2039_v3 = vld [vmem:[#allocation7 + $0x90] sm:$0xff]  ;;  %v2061_v16 = vld [vmem:[#allocation7 + $0x140] sm:$0xff]  ;;  %v2068_v10 = vld [vmem:[#allocation7 + $0x178] sm:$0xff] }
 0x2ef   :  { %v1480_v62 = vrot.slane %v1479_v29, 1  ;;  %v1680_v59 = vrot.slane %v1679_v58, 2  ;;  %v1687_v0 = vrot.slane %v1686_v38, 2  ;;  %v2063_v23 = vld [vmem:[#allocation7 + $0x150] sm:$0xff] }
 0x2f1   :  { %v1481_v5 = vmax.f32 %v1479_v29, %v1480_v62  ;;  %v1681_v32 = vadd.f32 %v1680_v59, %v1679_v58  ;;  %v1688_v41 = vadd.f32 %v1687_v0, %v1686_v38  ;;  %v2037_v58 = vld [vmem:[#allocation7 + $0x80] sm:$0xff]  ;;  %v2042_v62 = vld [vmem:[#allocation7 + $0xa8] sm:$0xff]  ;;  %v2044_v59 = vld [vmem:[#allocation7 + $0xb8] sm:$0xff] }
 0x2f2   :  { %v2507_v38 = vpack.c.bf16 %v2039_v3, %v2037_v58  ;;  %v2043_v0 = vld [vmem:[#allocation7 + $0xb0] sm:$0xff]  ;;  %v2072_v58 = vld [vmem:[#allocation7 + $0x198] sm:$0xff] }
 0x2f3   :  { %v1503_v52 = vsel %vm1502_vm7, %v1481_v5, %v1501_v12  ;;  %v1682_v31 = vrot.slane %v1681_v32, 1  ;;  %v1689_v40 = vrot.slane %v1688_v41, 1  ;;  %v2040_v12 = vld [vmem:[#allocation7 + $0x98] sm:$0xff]  ;;  %v2509_v5 = vpack.c.bf16 %v2044_v59, %v2042_v62  ;;  %v2069_v62 = vld [vmem:[#allocation7 + $0x180] sm:$0xff]  ;;  %v2071_v59 = vld [vmem:[#allocation7 + $0x190] sm:$0xff] }
 0x2f4   :  { %1968 = vmatmul.mubr.f32.vlgmr.msra.gmra.mrb[2].mxu0 %v1503_v52  ;;  %1505 = vst [vmem:[#allocation8] sm:$0xff] %v1503_v52  ;;  %v2505_v29 = vpack.c.bf16 %v2040_v12, %v2038_v54  ;;  %v2046_v52 = vld [vmem:[#allocation7 + $0xc8] sm:$0xff]  ;;  %v2065_v54 = vld [vmem:[#allocation7 + $0x160] sm:$0xff]  ;;  %v2067_v12 = vld [vmem:[#allocation7 + $0x170] sm:$0xff] }
 0x2f5   :  { %v1683_v22 = vadd.f32 %v1682_v31, %v1681_v32  ;;  %2256 = vmatprep.mubr.f32.mxu0 %v2837_v56  ;;  %v1690_v47 = vadd.f32 %v1689_v40, %v1688_v41  ;;  %v2041_v32 = vld [vmem:[#allocation7 + $0xa0] sm:$0xff]  ;;  %v2048_v31 = vld [vmem:[#allocation7 + $0xd8] sm:$0xff] }
 0x2f6   :  { %v2511_v41 = vpack.c.bf16 %v2043_v0, %v2041_v32  ;;  %v2045_v40 = vld [vmem:[#allocation7 + $0xc0] sm:$0xff]  ;;  %v2076_v32 = vld [vmem:[#allocation7 + $0x1b8] sm:$0xff] }
 0x2f7   :  { %v1691_v50 = vmul.f32 0.5, %v1683_v22  ;;  %v1692_v46 = vmul.f32 0.5, %v1690_v47  ;;  %v2513_v22 = vpack.c.bf16 %v2048_v31, %v2046_v52  ;;  %v2050_v47 = vld [vmem:[#allocation7 + $0xe8] sm:$0xff]  ;;  %v2073_v0 = vld [vmem:[#allocation7 + $0x1a0] sm:$0xff]  ;;  %v2075_v52 = vld [vmem:[#allocation7 + $0x1b0] sm:$0xff] }
 0x2f9   :  { %v1693_v13 = vadd.f32 1e-05, %v1691_v50  ;;  %v1694_v51 = vadd.f32 1e-05, %v1692_v46  ;;  %v2047_v50 = vld [vmem:[#allocation7 + $0xd0] sm:$0xff] }
 0x2fa   :  { %v2515_v46 = vpack.c.bf16 %v2047_v50, %v2045_v40  ;;  %v2543_v40 = vpack.c.bf16 %v2075_v52, %v2073_v0 }
 0x2fb   :  { %2636 = vrsqrt.f32 %v1693_v13  ;;  %v2052_v13 = vld [vmem:[#allocation7 + $0xf8] sm:$0xff] }
 0x2fc   :  { %2638 = vrsqrt.f32 %v1694_v51  ;;  %v2517_v51 = vpack.c.bf16 %v2052_v13, %v2050_v47  ;;  %v2077_v47 = vld [vmem:[#allocation7 + $0x1c0] sm:$0xff]  ;;  %v2079_v13 = vld [vmem:[#allocation7 + $0x1d0] sm:$0xff] }
 0x305   :  { %v2637_v8 = vpop.eup %2636 }
 0x306   :  { %v1697_v44 = vmul.f32 %v2637_v8, %v1673_v9  ;;  %v2639_v39 = vpop.eup %2638  ;;  %v2027_v9 = vld [vmem:[#allocation7 + $0x30] sm:$0xff]  ;;  %v2049_v8 = vld [vmem:[#allocation7 + $0xe0] sm:$0xff] }
 0x307   :  { %v1698_v61 = vmul.f32 %v2639_v39, %v1674_v28  ;;  %v2495_v1 = vpack.c.bf16 %v2027_v9, %v2025_v25  ;;  %v2029_v28 = vld [vmem:[#allocation7 + $0x40] sm:$0xff]  ;;  %v2054_v39 = vld [vmem:[#allocation7 + $0x108] sm:$0xff] }
 0x308   :  { %v1699_v15 = vmax.f32 %v1697_v44, 0.0  ;;  %v2499_v42 = vpack.c.bf16 %v2031_v11, %v2029_v28  ;;  %v2051_v44 = vld [vmem:[#allocation7 + $0xf0] sm:$0xff]  ;;  %v2064_v11 = vld [vmem:[#allocation7 + $0x158] sm:$0xff] }
 0x309   :  { %v1700_v19 = vmax.f32 %v1698_v61, 0.0  ;;  %v2056_v61 = vld [vmem:[#allocation7 + $0x118] sm:$0xff] }
 0x30b   :  { %1841 = vmatprep.mubr.f32.mxu1 %v1700_v19  ;;  %v2521_v19 = vpack.c.bf16 %v2056_v61, %v2054_v39  ;;  %v2081_v39 = vld [vmem:[#allocation7 + $0x1e0] sm:$0xff]  ;;  %v2083_v61 = vld [vmem:[#allocation7 + $0x1f0] sm:$0xff] }
 0x30c   :  { %1842 = vmatmul.mubr.f32.vlgmr.msra.gmra.mrb[0].mxu1 %v1699_v15  ;;  %v2519_v15 = vpack.c.bf16 %v2051_v44, %v2049_v8  ;;  %v2084_v8 = vld [vmem:[#allocation7 + $0x1f8] sm:$0xff] }
 0x30d   :  { %2492 = vmatpush1.bf16.msra.mxu1 %v2491_v36 }
 0x30e   :  { %2494 = vmatprep.subr.bf16.mxu1 %v2493_v35 }
 0x311   :  { %2496 = vmatpush1.bf16.msra.mxu1 %v2495_v1 }
 0x312   :  { %2498 = vmatprep.subr.bf16.mxu1 %v2497_v18 }
 0x315   :  { %2500 = vmatpush1.bf16.msra.mxu1 %v2499_v42  ;;  %v2531_v42 = vpack.c.bf16 %v2063_v23, %v2061_v16 }
 0x316   :  { %2502 = vmatprep.subr.bf16.mxu1 %v2501_v27  ;;  %v2066_v27 = vld [vmem:[#allocation7 + $0x168] sm:$0xff] }
 0x317   :  { %v2533_v6 = vpack.c.bf16 %v2068_v10, %v2066_v27 }
 0x319   :  { %2504 = vmatpush1.bf16.msra.mxu1 %v2503_v26  ;;  %v2535_v26 = vpack.c.bf16 %v2067_v12, %v2065_v54 }
 0x31a   :  { %2506 = vmatprep.subr.bf16.mxu1 %v2505_v29  ;;  %v2070_v29 = vld [vmem:[#allocation7 + $0x188] sm:$0xff] }
 0x31b   :  { %v2537_v3 = vpack.c.bf16 %v2072_v58, %v2070_v29 }
 0x31d   :  { %2508 = vmatpush1.bf16.msra.mxu1 %v2507_v38  ;;  %v2074_v38 = vld [vmem:[#allocation7 + $0x1a8] sm:$0xff] }
 0x31e   :  { %2510 = vmatprep.subr.bf16.mxu1 %v2509_v5  ;;  %v2539_v5 = vpack.c.bf16 %v2071_v59, %v2069_v62  ;;  %v2541_v31 = vpack.c.bf16 %v2076_v32, %v2074_v38 }
 0x321   :  { %2512 = vmatpush1.bf16.msra.mxu1 %v2511_v41  ;;  %v2078_v41 = vld [vmem:[#allocation7 + $0x1c8] sm:$0xff] }
 0x322   :  { %2514 = vmatprep.subr.bf16.mxu1 %v2513_v22  ;;  %v2080_v22 = vld [vmem:[#allocation7 + $0x1d8] sm:$0xff] }
 0x323   :  { %v2545_v50 = vpack.c.bf16 %v2080_v22, %v2078_v41 }
 0x325   :  { %2516 = vmatpush1.bf16.msra.mxu1 %v2515_v46  ;;  %v2547_v46 = vpack.c.bf16 %v2079_v13, %v2077_v47 }
 0x326   :  { %2518 = vmatprep.subr.bf16.mxu1 %v2517_v51  ;;  %v2082_v51 = vld [vmem:[#allocation7 + $0x1e8] sm:$0xff] }
 0x327   :  { %v2549_v44 = vpack.c.bf16 %v2084_v8, %v2082_v51 }
 0x329   :  { %2520 = vmatpush1.bf16.msra.mxu1 %v2519_v15  ;;  %v2551_v15 = vpack.c.bf16 %v2083_v61, %v2081_v39 }
 0x32a   :  { %2522 = vmatprep.subr.bf16.mxu1 %v2521_v19  ;;  %v2179_v19 = vld [vmem:[%s4685_s28] sm:$0xff] }
 0x3c7   :  { %v1969_v57 = vpop.f32.mrb[2].mxu0 }
 0x3c8   :  { %v4358_v24 = vadd.f32 %v1969_v57, %v1896_v60  ;;  %v1971_v7 = vpop.f32.mrb[3].mxu0  ;;  %v2055_v60 = vld [vmem:[#allocation7 + $0x110] sm:$0xff]  ;;  %v2060_v57 = vld [vmem:[#allocation7 + $0x138] sm:$0xff] }
 0x3c9   :  { %v4360_v17 = vadd.f32 %v1971_v7, %v1900_v34  ;;  %v2058_v34 = vld [vmem:[#allocation7 + $0x128] sm:$0xff]  ;;  %v2523_v7 = vpack.c.bf16 %v2055_v60, %v2053_v45 }
 0x3cb   :  { %v1974_v21 = vadd.f32 %v4360_v17, %v4358_v24  ;;  %2524 = vmatpush1.bf16.msra.mxu1 %v2523_v7 }
 0x3cd   :  { %1975 = vadd.xlane.f32.xlu1 %v1974_v21  ;;  %v2525_v21 = vpack.c.bf16 %v2060_v57, %v2058_v34 }
 0x3cf   :  { %2526 = vmatprep.subr.bf16.mxu1 %v2525_v21  ;;  %v1991_v21 = vld [vmem:[%s4476_s11] sm:$0x3] }
 0x3d0   :  { %2528 = vmatpush1.bf16.msra.mxu1 %v2527_v30  ;;  %v1996_v53 = vrot.slane %v1991_v21, %v4681_v14  ;;  %v2000_v30 = vrot.slane %v1991_v21, %v4682_v43 }
 0x3de   :  { %2183 = vperm.xlu1 %2634, %v2179_v19  }
 0x3df   :  { %v4364_v33 = vpop.f32.mrb[0].mxu1 }
 0x3e0   :  { %v4366_v37 = vpop.f32.mrb[1].mxu1  ;;  %v4374_v35 = vadd.f32 %v4364_v33, %v1770_v48 }
 0x3e1   :  { %v4377_v25 = vadd.f32 %v4366_v37, %v1774_v63  ;;  %v2010_v63 = vrot.slane %v2005_v20, %v4681_v14 }
 0x3e2   :  { %v1848_v18 = vmul.f32 %v4374_v35, %v4374_v35 }
 0x3e3   :  { %v1849_v33 = vmul.f32 %v4377_v25, %v4377_v25 }
 0x3e5   :  { %v1850_v28 = vadd.f32 %v1849_v33, %v1848_v18 }
 0x45a   :  { %v1976_v2 = vpop.xlane.xlu1 %1975 }
 0x45b   :  { %v1978_v36 = vmul.f32 0.00390625, %v1976_v2  ;;  %v2014_v2 = vrot.slane %v2005_v20, %v4682_v43 }
 0x45d   :  { %v4380_v9 = vsub.f32 %v4358_v24, %v1978_v36  ;;  %v4383_v55 = vsub.f32 %v4360_v17, %v1978_v36  ;;  %v2062_v24 = vld [vmem:[#allocation7 + $0x148] sm:$0xff] }
 0x45e   :  { %v2529_v17 = vpack.c.bf16 %v2064_v11, %v2062_v24 }
 0x45f   :  { %v1981_v4 = vmul.f32 %v4380_v9, %v4380_v9  ;;  %v1982_v1 = vmul.f32 %v4383_v55, %v4383_v55 }
 0x460   :  { %2530 = vmatprep.subr.bf16.mxu1 %v2529_v17  ;;  %v4686_v17 = vlaneseq }
 0x461   :  { %v1983_v37 = vadd.f32 %v1982_v1, %v1981_v4  ;;  %2532 = vmatpush1.bf16.msra.mxu1 %v2531_v42 }
 0x462   :  { %2534 = vmatprep.subr.bf16.mxu1 %v2533_v6  ;;  %v2181_v16 = vand.u32 127, %v4686_v17 }
 0x463   :  { %1984 = vadd.xlane.f32.xlu0 %v1983_v37 }
 0x465   :  { %2536 = vmatpush1.bf16.msra.mxu1 %v2535_v26 }
 0x466   :  { %2538 = vmatprep.subr.bf16.mxu1 %v2537_v3 }
 0x467   :  { %1851 = vadd.xlane.f32.xlu0 %v1850_v28 }
 0x469   :  { %2540 = vmatpush1.bf16.msra.mxu1 %v2539_v5 }
 0x46a   :  { %2542 = vmatprep.subr.bf16.mxu1 %v2541_v31 }
 0x46d   :  { %2544 = vmatpush1.bf16.msra.mxu1 %v2543_v40 }
 0x46e   :  { %2546 = vmatprep.subr.bf16.mxu1 %v2545_v50 }
 0x471   :  { %2548 = vmatpush1.bf16.msra.mxu1 %v2547_v46 }
 0x472   :  { %2550 = vmatprep.subr.bf16.mxu1 %v2549_v44 }
 0x475   :  { %2552 = vmatpush1.bf16.msra.mxu1 %v2551_v15 }
 0x4f0   :  { %v1985_v45 = vpop.xlane.xlu0 %1984 }
 0x4f1   :  { %v1986_v60 = vmul.f32 0.00390625, %v1985_v45 }
 0x4f3   :  { %v1987_v34 = vadd.f32 1e-05, %v1986_v60 }
 0x4f4   :  { %v1852_v57 = vpop.xlane.xlu0 %1851 }
 0x4f5   :  { %2640 = vrsqrt.f32 %v1987_v34  ;;  %v1853_v7 = vmax.f32 %v1852_v57, 1e-12 }
 0x4f7   :  { %2642 = vrsqrt.f32 %v1853_v7 }
 0x4ff   :  { %v2641_v49 = vpop.eup %2640 }
 0x500   :  { %v1990_v48 = vmul.f32 %v2641_v49, %v4383_v55  ;;  %v1989_v36 = vmul.f32 %v2641_v49, %v4380_v9  ;;  %v2184_v9 = vpop.permute.xlu1 %2183 }
 0x501   :  { %v2643_v4 = vpop.eup %2642  ;;  %vm2185_vm9 = vcmp.eq.s32.totalorder %v2184_v9, %v2181_v16 }
 0x502   :  { %v1856_v1 = vmul.f32 %v2643_v4, %v4377_v25  ;;  %v1855_v18 = vmul.f32 %v2643_v4, %v4374_v35  ;;  %v2004_v33 = vmul.f32 %v2000_v30, %v1990_v48  ;;  %v2003_v37 = vmul.f32 %v1996_v53, %v1989_v36  ;;  %v2085_v35 = vld [vmem:[%s4479_s14] sm:$0x3]  ;;  %s2838_s14 = smov [#allocation9]  }
 0x503   :  { %v2327_v25 = vsel %vm2185_vm9, 1.0, %v2837_v56  ;;  %v2090_v23 = vrot.slane %v2085_v35, %v4681_v14  ;;  %v2094_v42 = vrot.slane %v2085_v35, %v4682_v43  ;;  %s2285_s3 = sshll.u32 %s2838_s14, 4  ;;  %s2286_s3 = int_to_ptr.vmem [resolvable:$true] %s2285_s3 }
 0x504   :  { %2192 = vmatprep.subr.mxu0 %v1856_v1  ;;  %1858 = vst [vmem:[#allocation9 + $0x8] sm:$0xff] %v1856_v1  ;;  %1857 = vst [vmem:[#allocation9] sm:$0xff] %v1855_v18  ;;  %v2018_v28 = vadd.f32 %v2014_v2, %v2004_v33  ;;  %v2017_v24 = vadd.f32 %v2010_v63, %v2003_v37  ;;  %s2728_s2 = scalar_lea.vmem %s2286_s3, 256  ;;  %p2733_p11 = scmp.lt.s32.totalorder %s2286_s3, %s2286_s3 }
 0x505   :  { %2193 = vmatpush1.msra.mxu0 %v1855_v18  ;;  %p2729_p10 = scmp.ne.s32.totalorder %s2286_s3, %s2728_s2  ;;  %p2734_p12 = scmp.lt.s32.totalorder %s2728_s2, %s2728_s2 }
 0x506   :  { %v2020_v55 = vmax.f32 %v2018_v28, 0.0  ;;  %v2019_v11 = vmax.f32 %v2017_v24, 0.0  ;;  %2328 = vmatmul.mubr.msk.f32.vlgmr.msra.gmra.mrb[4].mxu0 %vm2188_vm8, %v2327_v25 }
 0x507   :  { %p2735_p13 = por %p2734_p12, %p2733_p11 }
 0x508   :  { %2161 = vmatprep.mubr.f32.mxu1 %v2020_v55 }
 0x509   :  { %2162 = vmatmul.mubr.f32.vlgmr.msra.gmra.mrb[2].mxu1 %v2019_v11  ;;  %p2736_p0 = pnand %p2735_p13, %p2729_p10 }
 0x5d9   :  { %v2258_v58 = vpop.f32.mrb[4].mxu0 }
 0x5da   :  { %v2260_v3 = vpop.f32.mrb[5].mxu0 }
 0x5dc   :  { %v2163_v27 = vpop.f32.mrb[2].mxu1 }
 0x5dd   :  { %v2164_v10 = vadd.f32 %v2163_v27, %v2090_v23  ;;  %v2165_v6 = vpop.f32.mrb[3].mxu1 }
 0x5de   :  { %v2166_v54 = vadd.f32 %v2165_v6, %v2094_v42 }
 0x5df   :  { %v2168_v12 = vmul.f32 %v2164_v10, %v2164_v10 }
 0x5e0   :  { %v2169_v26 = vmul.f32 %v2166_v54, %v2166_v54 }
 0x5e2   :  { %v2170_v29 = vadd.f32 %v2169_v26, %v2168_v12 }
 0x5e4   :  { %2171 = vadd.xlane.f32.xlu0 %v2170_v29 }
 0x671   :  { %v2172_v56 = vpop.xlane.xlu0 %2171 }
 0x672   :  { %v2173_v62 = vmax.f32 %v2172_v56, 1e-12 }
 0x674   :  { %2644 = vrsqrt.f32 %v2173_v62 }
 0x67e   :  { %v2645_v59 = vpop.eup %2644 }
 0x67f   :  { %v2175_v38 = vmul.f32 %v2645_v59, %v2164_v10  ;;  %v2176_v5 = vmul.f32 %v2645_v59, %v2166_v54 }
 0x681   :  { %2177 = vst [vmem:[#allocation11] sm:$0xff] %v2175_v38  ;;  %v2263_v14 = vmul.f32 %v2258_v58, %v2175_v38  ;;  %2178 = vst [vmem:[#allocation11 + $0x8] sm:$0xff] %v2176_v5  ;;  %v2264_v43 = vmul.f32 %v2260_v3, %v2176_v5 }
 0x683   :  { %v2265_v32 = vadd.f32 %v2264_v43, %v2263_v14 }
 0x685   :  { %2266 = vadd.xlane.f32.xlu0 %v2265_v32 }
 0x686   :  { %2739 = shalt.err (!%p2736_p0)
}
 0x687   :  { %s2740_s27 = scalar_lea.hbm %s4481_s16, 256 }
 0x688   :  { %p2741_p1 = scmp.ne.s32.totalorder %s4481_s16, %s2740_s27  ;;  %p2744_p2 = scmp.lt.u32.totalorder %s2740_s27, %s4481_s16 }
 0x68a   :  { %p2746_p3 = pnand %p2744_p2, %p2741_p1 }
 0x68c   :  { %2749 = shalt.err (!%p2746_p3)
}
 0x68d   :  { %2288 = dma.vmem_to_hbm [thread:$0]  %s2286_s3, 256, %s4481_s16, [#allocation10]  }
 0x68e   :  { %s2750_s6 = scalar_lea.vmem %s2276_s30, 128  ;;  %p2755_p5 = scmp.lt.s32.totalorder %s2276_s30, %s2276_s30 }
 0x68f   :  { %p2751_p4 = scmp.ne.s32.totalorder %s2276_s30, %s2750_s6  ;;  %p2756_p6 = scmp.lt.s32.totalorder %s2750_s6, %s2750_s6 }
 0x691   :  { %p2757_p7 = por %p2756_p6, %p2755_p5 }
 0x693   :  { %p2758_p8 = pnand %p2757_p7, %p2751_p4 }
 0x695   :  { %2761 = shalt.err (!%p2758_p8)
}
 0x696   :  { %s2762_s0 = scalar_lea.hbm %s4480_s15, 128 }
 0x697   :  { %p2763_p9 = scmp.ne.s32.totalorder %s4480_s15, %s2762_s0  ;;  %p2766_p10 = scmp.lt.u32.totalorder %s2762_s0, %s4480_s15 }
 0x699   :  { %p2768_p11 = pnand %p2766_p10, %p2763_p9 }
 0x69b   :  { %2771 = shalt.err (!%p2768_p11)
}
 0x69c   :  { %2278 = dma.vmem_to_hbm [thread:$0]  %s2276_s30, 128, %s4480_s15, [#allocation4]  }
 0x69d   :  { %s2840_s21 = smov [#allocation11]  }
 0x69e   :  { %s2295_s22 = sshll.u32 %s2840_s21, 4  ;;  %s2296_s22 = int_to_ptr.vmem [resolvable:$true] %s2295_s22 }
 0x69f   :  { %s2772_s11 = scalar_lea.vmem %s2296_s22, 256  ;;  %p2777_p13 = scmp.lt.s32.totalorder %s2296_s22, %s2296_s22 }
 0x6a0   :  { %p2773_p12 = scmp.ne.s32.totalorder %s2296_s22, %s2772_s11  ;;  %p2778_p0 = scmp.lt.s32.totalorder %s2772_s11, %s2772_s11 }
 0x6a2   :  { %p2779_p1 = por %p2778_p0, %p2777_p13 }
 0x6a4   :  { %p2780_p2 = pnand %p2779_p1, %p2773_p12 }
 0x6a6   :  { %2783 = shalt.err (!%p2780_p2)
}
 0x6a7   :  { %s2784_s3 = scalar_lea.hbm %s4482_s17, 256 }
 0x6a8   :  { %p2785_p3 = scmp.ne.s32.totalorder %s4482_s17, %s2784_s3  ;;  %p2788_p4 = scmp.lt.u32.totalorder %s2784_s3, %s4482_s17 }
 0x6aa   :  { %p2790_p5 = pnand %p2788_p4, %p2785_p3 }
 0x6ac   :  { %2793 = shalt.err (!%p2790_p5)
}
 0x6ad   :  { %2298 = dma.vmem_to_hbm [thread:$0]  %s2296_s22, 256, %s4482_s17, [#allocation10]  }
 0x6ae   :  { %s2841_s27 = smov [#allocation12]  }
 0x6af   :  { %s2305_s13 = sshll.u32 %s2841_s27, 4  ;;  %s2306_s13 = int_to_ptr.vmem [resolvable:$true] %s2305_s13 }
 0x6b0   :  { %s2794_s24 = scalar_lea.vmem %s2306_s13, 128  ;;  %p2799_p7 = scmp.lt.s32.totalorder %s2306_s13, %s2306_s13 }
 0x6b1   :  { %p2795_p6 = scmp.ne.s32.totalorder %s2306_s13, %s2794_s24  ;;  %p2800_p8 = scmp.lt.s32.totalorder %s2794_s24, %s2794_s24 }
 0x6b3   :  { %p2801_p9 = por %p2800_p8, %p2799_p7 }
 0x6b5   :  { %p2802_p10 = pnand %p2801_p9, %p2795_p6 }
 0x712   :  { %v2267_v0 = vpop.xlane.xlu0 %2266 }
 0x713   :  { %2268 = vst [vmem:[#allocation12] sm:$0xff] %v2267_v0 }
 0x714   :  { %2805 = shalt.err (!%p2802_p10)
}
 0x715   :  { %s2806_s4 = scalar_lea.hbm %s4483_s18, 128 }
 0x716   :  { %p2807_p11 = scmp.ne.s32.totalorder %s4483_s18, %s2806_s4  ;;  %p2810_p12 = scmp.lt.u32.totalorder %s2806_s4, %s4483_s18 }
 0x718   :  { %p2812_p13 = pnand %p2810_p12, %p2807_p11 }
 0x71a   :  { %2815 = shalt.err (!%p2812_p13)
}
 0x71b   :  { %2308 = dma.vmem_to_hbm [thread:$0]  %s2306_s13, 128, %s4483_s18, [#allocation13]  }
 0x71c   :  { %2820 = dma.done.wait [#allocation4], 128  }
 0x71d   :  { %2821 = vsyncadd [#allocation4], 4294967168 }
 0x71e   :  { %2822 = dma.done.wait [#allocation10], 512  }
 0x71f   :  { %2823 = vsyncadd [#allocation10], 4294966784 }
 0x720   :  { %2824 = dma.done.wait [#allocation13], 128  }
 0x721   :  { %2825 = vsyncadd [#allocation13], 4294967168 }
 0x722   :  { %2321 = vsyncpa [#allocation3], 1 }
 0x723   :  { %2322 = vsyncpa [#allocation6], 1 }
 0x724   :  { %2323 = vsyncpa [#allocation4], 1 }
 0x725   :  { %2324 = vsyncpa [#allocation10], 1 }
 0x726   :  { %2325 = vsyncpa [#allocation13], 1 }

</bundles_post_ra>
